<compile_context>
chip_gen: v6e
topology: v6e:2x2x1
jax: 0.10.0
libtpu: 0.0.40
codegen_flags: <defaults>
</compile_context>

<pallas_src>
import functools

import jax
import jax.numpy as jnp
from jax.experimental import pallas as pl
from jax.experimental.pallas import tpu as pltpu

_EPS = 1e-5


# ----------------------------- Pallas kernels -----------------------------

def _conv1_stats_kernel(p_ref, w_ref, b_ref, y_ref, s_ref, q_ref, *, g_rows):
    """Stage 1: 3x3 conv as ONE K=Kp matmul per row chunk (im2col'd in the
    wrapper) + bias, plus per-image partial BatchNorm statistics (f32).

      p_ref : (1, H*W, Kp)    bf16  im2col patches (K = 9*cin zero-padded)
      w_ref : (Kp, Cpad)      bf16  packed conv1 weights
      b_ref : (1, Cpad)       f32   bias
      y_ref : (1, H, W, Cpad) bf16  pre-BN conv output
      s_ref : (1, 1, Cpad)    f32   partial sum
      q_ref : (1, 1, Cpad)    f32   partial sum of squares
    """
    H, W, cpad = y_ref.shape[1], y_ref.shape[2], y_ref.shape[3]
    f32 = jnp.float32
    ch = g_rows * W                                     # rows per chunk
    bias = b_ref[...]                                   # (1, Cpad)
    s_tot = jnp.zeros((1, cpad), f32)
    q_tot = jnp.zeros((1, cpad), f32)
    for m in range(H // g_rows):
        lhs = p_ref[0, m * ch:(m + 1) * ch, :]          # (ch, Kp) bf16, aligned
        y = jnp.dot(lhs, w_ref[...], preferred_element_type=f32) + bias
        y_ref[0, m * g_rows:(m + 1) * g_rows] = (
            y.reshape(g_rows, W, cpad).astype(y_ref.dtype))
        s_tot = s_tot + jnp.sum(y, axis=0, keepdims=True)
        q_tot = q_tot + jnp.sum(y * y, axis=0, keepdims=True)
    s_ref[...] = s_tot.reshape(1, 1, cpad)
    q_ref[...] = q_tot.reshape(1, 1, cpad)


def _bn_relu_conv2_stats_kernel(y1_ref, sc_ref, sh_ref, w_ref, b_ref,
                                y_ref, s_ref, q_ref, z_ref, *, g_rows):
    """Stage 2 (fused): BN(scale/shift)+ReLU of stage 1 (single bf16 cast),
    dx folded into the matmul K dim (K = 3*Cpad), 3 dots per row chunk with a
    value-held accumulator initialized with the bias, plus partial BN stats.

      y1_ref : (1, H, W, Cpad)   bf16  pre-BN stage-1 conv output
      sc_ref : (1, Cpad)         f32   gamma * rsqrt(var+eps)
      sh_ref : (1, Cpad)         f32   beta  - mean * scale
      w_ref  : (3, 3*Cpad, Cpad) bf16  conv2 weights, dx folded into K
      b_ref  : (1, Cpad)         f32   bias
      y_ref  : (1, H, W, Cpad)   bf16  pre-BN conv2 output
      s_ref/q_ref : (1, 1, Cpad) f32   partial stats
      z_ref  : (H+2, W, 3*Cpad)  bf16  scratch: dx-expanded, H-padded act
    """
    H, W, cpad = y_ref.shape[1], y_ref.shape[2], y_ref.shape[3]
    f32 = jnp.float32
    bf16 = jnp.bfloat16

    # BN + ReLU of stage 1 in f32, cast to bf16 exactly once.
    a1 = jnp.maximum(y1_ref[0].astype(f32) * sc_ref[...] + sh_ref[...], 0.0)
    a1 = a1.astype(bf16)                                # (H, W, Cpad)

    # dx-expansion: z[r, j, dx*C:(dx+1)*C] = P[r, j+dx, :] with P the SAME-
    # padded activation.  The W-shift relayout happens once per grid step;
    # the tap loop below only slices the (free) outer row dimension.
    zc = jnp.zeros((H, 1, cpad), bf16)
    a1_l = jnp.concatenate([zc, a1[:, :W - 1, :]], axis=1)   # P[., j+0]
    a1_r = jnp.concatenate([a1[:, 1:, :], zc], axis=1)       # P[., j+2]
    zrow = jnp.zeros((1, W, 3 * cpad), bf16)
    z_ref[0:1] = zrow                                   # top halo row only
    z_ref[H + 1:H + 2] = zrow                           # bottom halo row only
    z_ref[1:H + 1] = jnp.concatenate([a1_l, a1, a1_r], axis=-1)

    # conv2: 3 dy taps, K = 3*Cpad, per-chunk value accumulator.
    bias_blk = jnp.broadcast_to(b_ref[...], (g_rows * W, cpad))
    s_tot = jnp.zeros((1, cpad), f32)
    q_tot = jnp.zeros((1, cpad), f32)
    for m in range(H // g_rows):
        r0 = m * g_rows
        acc = bias_blk                                   # init with bias
        for dy in range(3):
            lhs = z_ref[r0 + dy:r0 + dy + g_rows].reshape(g_rows * W, 3 * cpad)
            acc = acc + jnp.dot(lhs, w_ref[dy], preferred_element_type=f32)
        y_ref[0, r0:r0 + g_rows] = (
            acc.reshape(g_rows, W, cpad).astype(y_ref.dtype))
        s_tot = s_tot + jnp.sum(acc, axis=0, keepdims=True)
        q_tot = q_tot + jnp.sum(acc * acc, axis=0, keepdims=True)
    s_ref[...] = s_tot.reshape(1, 1, cpad)
    q_ref[...] = q_tot.reshape(1, 1, cpad)


# ----------------------------- wrapper -------------------------------------

def _finalize_stats(s, q, count, gamma, beta):
    """Reduce per-image partial sums into folded BN scale / shift (f32)."""
    total = jnp.sum(s, axis=0)                          # (1, Cpad)
    totsq = jnp.sum(q, axis=0)
    mean = total / count
    var = jnp.maximum(totsq / count - mean * mean, 0.0)
    scale = gamma * jax.lax.rsqrt(var + _EPS)
    shift = beta - mean * scale
    return scale, shift


def _pick_chunk_rows(H, W):
    for g in (4, 2, 1):
        if H % g == 0 and (g * W) % 8 == 0:
            return g
    return 1


@functools.partial(jax.jit, static_argnames=("out_ch",))
def conv_block_forward(x_nchw, kp, *, out_ch):
    N, cin, H, W = x_nchw.shape
    kpad = kp["w1"].shape[0]                            # padded K for conv1
    cpad = kp["w1"].shape[1]
    rows = H * W
    f32 = jnp.float32
    g_rows = _pick_chunk_rows(H, W)

    # NCHW -> NHWC, SAME pre-pad, im2col (K = 9*cin, zero-padded to kpad).
    x = jnp.transpose(x_nchw, (0, 2, 3, 1))
    xp = jnp.pad(x, ((0, 0), (1, 1), (1, 1), (0, 0)))
    taps = [xp[:, dy:dy + H, dx:dx + W, :]
            for dy in range(3) for dx in range(3)]
    patches = jnp.concatenate(taps, axis=-1)            # (N, H, W, 9*cin)
    patches = jnp.pad(patches, ((0, 0), (0, 0), (0, 0), (0, kpad - 9 * cin)))
    patches = patches.astype(jnp.bfloat16).reshape(N, rows, kpad)

    cparams = pltpu.CompilerParams(
        dimension_semantics=("parallel",),
        vmem_limit_bytes=32 * 1024 * 1024,
    )

    def const_spec(shape):
        nd = len(shape)
        return pl.BlockSpec(shape, lambda n: (0,) * nd)

    img_out_specs = (
        pl.BlockSpec((1, H, W, cpad), lambda n: (n, 0, 0, 0)),
        pl.BlockSpec((1, 1, cpad), lambda n: (n, 0, 0)),
        pl.BlockSpec((1, 1, cpad), lambda n: (n, 0, 0)),
    )
    img_out_shape = (
        jax.ShapeDtypeStruct((N, H, W, cpad), jnp.bfloat16),
        jax.ShapeDtypeStruct((N, 1, cpad), f32),
        jax.ShapeDtypeStruct((N, 1, cpad), f32),
    )

    # ---- stage 1: conv1 (single large-K matmul) + bias + partial stats ----
    y1, s1, q1 = pl.pallas_call(
        functools.partial(_conv1_stats_kernel, g_rows=g_rows),
        grid=(N,),
        in_specs=[
            pl.BlockSpec((1, rows, kpad), lambda n: (n, 0, 0)),
            const_spec(kp["w1"].shape),
            const_spec(kp["b1"].shape),
        ],
        out_specs=img_out_specs,
        out_shape=img_out_shape,
        compiler_params=cparams,
        cost_estimate=pl.CostEstimate(
            flops=2 * N * rows * kpad * cpad,
            transcendentals=0,
            bytes_accessed=int(patches.size) * 2 + int(kp["w1"].size) * 2
            + N * rows * cpad * 2,
        ),
    )(patches, kp["w1"], kp["b1"])

    sc1, sh1 = _finalize_stats(s1, q1, N * rows, kp["g1"], kp["be1"])

    # ---- stage 2: BN1+ReLU fused into conv2 + bias + partial stats --------
    y2, s2, q2 = pl.pallas_call(
        functools.partial(_bn_relu_conv2_stats_kernel, g_rows=g_rows),
        grid=(N,),
        in_specs=[
            pl.BlockSpec((1, H, W, cpad), lambda n: (n, 0, 0, 0)),
            const_spec((1, cpad)),
            const_spec((1, cpad)),
            const_spec(kp["w2"].shape),
            const_spec(kp["b2"].shape),
        ],
        out_specs=img_out_specs,
        out_shape=img_out_shape,
        scratch_shapes=[pltpu.VMEM((H + 2, W, 3 * cpad), jnp.bfloat16)],
        compiler_params=cparams,
        cost_estimate=pl.CostEstimate(
            flops=2 * N * rows * 9 * cpad * cpad,
            transcendentals=0,
            bytes_accessed=N * rows * cpad * 4 + int(kp["w2"].size) * 2,
        ),
    )(y1, sc1, sh1, kp["w2"], kp["b2"])

    sc2, sh2 = _finalize_stats(s2, q2, N * rows, kp["g2"], kp["be2"])

    # ---- final BN2 + ReLU + channel un-pad + NHWC->NCHW: one fused XLA pass
    out = jnp.maximum(y2.astype(f32) * sc2 + sh2, 0.0)[..., :out_ch]
    return jnp.transpose(out, (0, 3, 1, 2))


# ----------------------------- params & reference --------------------------

def init_conv_block_params(key, in_ch, out_ch):
    """Raw (PyTorch-default-like) params + kernel-ready packed/padded params."""
    cpad = ((out_ch + 127) // 128) * 128
    kpad = ((9 * in_ch + 127) // 128) * 128
    k1, k2 = jax.random.split(key)

    def conv_init(k, kh, kw, cin, cout):
        fan_in = kh * kw * cin
        bound = 1.0 / (fan_in ** 0.5)
        kw_, kb_ = jax.random.split(k)
        w = jax.random.uniform(kw_, (kh, kw, cin, cout), jnp.float32,
                               -bound, bound)
        b = jax.random.uniform(kb_, (cout,), jnp.float32, -bound, bound)
        return w, b

    w1, b1 = conv_init(k1, 3, 3, in_ch, out_ch)
    w2, b2 = conv_init(k2, 3, 3, out_ch, out_ch)
    g = jnp.ones((out_ch,), jnp.float32)
    be = jnp.zeros((out_ch,), jnp.float32)
    raw = dict(w1=w1, b1=b1, g1=g, be1=be, w2=w2, b2=b2, g2=g, be2=be)

    pc = cpad - out_ch

    def padv(v):
        return jnp.pad(v, (0, pc)).reshape(1, cpad).astype(jnp.float32)

    # conv1 weights: (3,3,cin,out) -> (9*cin, out), pad K to kpad, C to cpad.
    w1p = w1.reshape(9 * in_ch, out_ch)
    w1p = jnp.pad(w1p, ((0, kpad - 9 * in_ch), (0, pc))).astype(jnp.bfloat16)
    # conv2 weights: pad channels, fold dx into K: (3, 3*cpad, cpad).
    w2p = jnp.pad(w2, ((0, 0), (0, 0), (0, pc), (0, pc)))
    w2p = w2p.reshape(3, 3 * cpad, cpad).astype(jnp.bfloat16)

    kp = dict(w1=w1p, b1=padv(b1), g1=padv(g), be1=padv(be),
              w2=w2p, b2=padv(b2), g2=padv(g), be2=padv(be))
    return raw, kp


def reference_conv_block(x_nchw, raw):
    """Pure-JAX reference mirroring the kernel's quantization points
    (bf16 matmul operands, bf16 HBM intermediates, f32 accumulation/stats)."""
    f32 = jnp.float32
    q = lambda t: t.astype(jnp.bfloat16).astype(f32)

    def conv(a, w, b):
        ap = jnp.pad(a, ((0, 0), (1, 1), (1, 1), (0, 0)))
        y = jax.lax.conv_general_dilated(
            ap, q(w), (1, 1), "VALID",
            dimension_numbers=("NHWC", "HWIO", "NHWC"),
            precision=jax.lax.Precision.HIGHEST)
        return y + b

    def fold_bn(y, g, be):
        m = jnp.mean(y, axis=(0, 1, 2), keepdims=True)
        v = jnp.maximum(jnp.mean(y * y, axis=(0, 1, 2), keepdims=True) - m * m,
                        0.0)
        scale = g * jax.lax.rsqrt(v + _EPS)
        return scale, be - m * scale

    x = jnp.transpose(x_nchw, (0, 2, 3, 1))
    y1 = conv(q(x), raw["w1"], raw["b1"])               # f32 accumulation
    sc1, sh1 = fold_bn(y1, raw["g1"], raw["be1"])       # stats from f32 y1
    a1 = jnp.maximum(q(y1) * sc1 + sh1, 0.0)            # y1 stored as bf16
    y2 = conv(q(a1), raw["w2"], raw["b2"])              # a1 fed to MXU as bf16
    sc2, sh2 = fold_bn(y2, raw["g2"], raw["be2"])
    a2 = jnp.maximum(q(y2) * sc2 + sh2, 0.0)            # y2 stored as bf16
    return jnp.transpose(a2, (0, 3, 1, 2))


# ----------------------------- main ----------------------------------------

if __name__ == "__main__":
    in_ch, out_ch = 4, 32
    N, H, W = 2, 16, 16

    key = jax.random.PRNGKey(0)
    kx, kparams = jax.random.split(key)
    raw, kp = init_conv_block_params(kparams, in_ch, out_ch)
    x = jax.random.normal(kx, (N, in_ch, H, W), jnp.float32)

    out = jax.block_until_ready(conv_block_forward(x, kp, out_ch=out_ch))

    assert out.shape == (N, out_ch, H, W)
    assert bool(jnp.all(jnp.isfinite(out)))

    ref = jax.block_until_ready(reference_conv_block(x, raw))
    err = float(jnp.max(jnp.abs(out - ref)))
    assert err < 2e-2, f"max abs error vs reference: {err}"

    print("KERNEL_OK")
</pallas_src>

<mosaic_0001>
module attributes {stable_mosaic.version = 11 : i64} {
  func.func @_conv1_stats_kernel(%arg0: i32, %arg1: memref<1x256x128xbf16, #tpu.memory_space<vmem>>, %arg2: memref<128x128xbf16, #tpu.memory_space<vmem>>, %arg3: memref<1x128xf32, #tpu.memory_space<vmem>>, %arg4: memref<1x16x16x128xbf16, #tpu.memory_space<vmem>>, %arg5: memref<1x1x128xf32, #tpu.memory_space<vmem>>, %arg6: memref<1x1x128xf32, #tpu.memory_space<vmem>>) attributes {dimension_semantics = [#tpu.dimension_semantics<parallel>], iteration_bounds = array<i64: 2>, scalar_prefetch = 0 : i64, scratch_operands = 0 : i64, tpu.core_type = #tpu.core_type<tc>, window_params = [{transform_indices = @transform_0, window_bounds = array<i64: 1, 256, 128>}, {pipeline_mode = #tpu.pipeline_mode<synchronous>, transform_indices = @transform_1, window_bounds = array<i64: 128, 128>}, {pipeline_mode = #tpu.pipeline_mode<synchronous>, transform_indices = @transform_2, window_bounds = array<i64: 1, 128>}, {transform_indices = @transform_3, window_bounds = array<i64: 1, 16, 16, 128>}, {transform_indices = @transform_4, window_bounds = array<i64: 1, 1, 128>}, {transform_indices = @transform_5, window_bounds = array<i64: 1, 1, 128>}]} {
    %c0 = arith.constant 0 : index
    %c0_0 = arith.constant 0 : index
    %0 = vector.load %arg3[%c0, %c0_0] : memref<1x128xf32, #tpu.memory_space<vmem>>, vector<1x128xf32>
    %cst = arith.constant 0.000000e+00 : f32
    %1 = vector.broadcast %cst : f32 to vector<1x128xf32>
    %cst_1 = arith.constant 0.000000e+00 : f32
    %2 = vector.broadcast %cst_1 : f32 to vector<1x128xf32>
    %c0_2 = arith.constant 0 : index
    %c0_3 = arith.constant 0 : index
    %c0_4 = arith.constant 0 : index
    %3 = vector.load %arg1[%c0_2, %c0_3, %c0_4] : memref<1x256x128xbf16, #tpu.memory_space<vmem>>, vector<1x64x128xbf16>
    %4 = vector.shape_cast %3 : vector<1x64x128xbf16> to vector<64x128xbf16>
    %c0_5 = arith.constant 0 : index
    %c0_6 = arith.constant 0 : index
    %5 = vector.load %arg2[%c0_5, %c0_6] : memref<128x128xbf16, #tpu.memory_space<vmem>>, vector<128x128xbf16>
    %cst_7 = arith.constant dense<0.000000e+00> : vector<64x128xf32>
    %6 = tpu.matmul %4, %5, %cst_7 {dimension_numbers = #tpu.dot_dimension_numbers<[1], [0], [0], [1], [0, 0, 1, 1], [], []>} : vector<64x128xbf16>, vector<128x128xbf16>, vector<64x128xf32> -> vector<64x128xf32>
    %7 = vector.broadcast %0 : vector<1x128xf32> to vector<64x128xf32>
    %8 = arith.addf %6, %7 : vector<64x128xf32>
    %9 = vector.shape_cast %8 : vector<64x128xf32> to vector<4x16x128xf32>
    %10 = arith.truncf %9 : vector<4x16x128xf32> to vector<4x16x128xbf16>
    %c0_8 = arith.constant 0 : index
    %c0_9 = arith.constant 0 : index
    %c0_10 = arith.constant 0 : index
    %c0_11 = arith.constant 0 : index
    %11 = vector.load %arg4[%c0_8, %c0_9, %c0_10, %c0_11] : memref<1x16x16x128xbf16, #tpu.memory_space<vmem>>, vector<1x4x16x128xbf16>
    %12 = vector.shape_cast %11 : vector<1x4x16x128xbf16> to vector<4x16x128xbf16>
    %13 = vector.shape_cast %10 : vector<4x16x128xbf16> to vector<1x4x16x128xbf16>
    tpu.vector_store %arg4[%c0_8, %c0_9, %c0_10, %c0_11], %13 {strides = array<i32>} : memref<1x16x16x128xbf16, #tpu.memory_space<vmem>>, vector<1x4x16x128xbf16>,
    %cst_12 = arith.constant dense<0.000000e+00> : vector<128xf32>
    %14 = vector.multi_reduction <add>, %8, %cst_12 [0] : vector<64x128xf32> to vector<128xf32>
    %15 = vector.shape_cast %14 : vector<128xf32> to vector<1x128xf32>
    %16 = arith.addf %1, %15 : vector<1x128xf32>
    %17 = arith.mulf %8, %8 : vector<64x128xf32>
    %cst_13 = arith.constant dense<0.000000e+00> : vector<128xf32>
    %18 = vector.multi_reduction <add>, %17, %cst_13 [0] : vector<64x128xf32> to vector<128xf32>
    %19 = vector.shape_cast %18 : vector<128xf32> to vector<1x128xf32>
    %20 = arith.addf %2, %19 : vector<1x128xf32>
    %c0_14 = arith.constant 0 : index
    %c64 = arith.constant 64 : index
    %c0_15 = arith.constant 0 : index
    %21 = vector.load %arg1[%c0_14, %c64, %c0_15] : memref<1x256x128xbf16, #tpu.memory_space<vmem>>, vector<1x64x128xbf16>
    %22 = vector.shape_cast %21 : vector<1x64x128xbf16> to vector<64x128xbf16>
    %c0_16 = arith.constant 0 : index
    %c0_17 = arith.constant 0 : index
    %23 = vector.load %arg2[%c0_16, %c0_17] : memref<128x128xbf16, #tpu.memory_space<vmem>>, vector<128x128xbf16>
    %cst_18 = arith.constant dense<0.000000e+00> : vector<64x128xf32>
    %24 = tpu.matmul %22, %23, %cst_18 {dimension_numbers = #tpu.dot_dimension_numbers<[1], [0], [0], [1], [0, 0, 1, 1], [], []>} : vector<64x128xbf16>, vector<128x128xbf16>, vector<64x128xf32> -> vector<64x128xf32>
    %25 = vector.broadcast %0 : vector<1x128xf32> to vector<64x128xf32>
    %26 = arith.addf %24, %25 : vector<64x128xf32>
    %27 = vector.shape_cast %26 : vector<64x128xf32> to vector<4x16x128xf32>
    %28 = arith.truncf %27 : vector<4x16x128xf32> to vector<4x16x128xbf16>
    %c0_19 = arith.constant 0 : index
    %c4 = arith.constant 4 : index
    %c0_20 = arith.constant 0 : index
    %c0_21 = arith.constant 0 : index
    %29 = vector.load %arg4[%c0_19, %c4, %c0_20, %c0_21] : memref<1x16x16x128xbf16, #tpu.memory_space<vmem>>, vector<1x4x16x128xbf16>
    %30 = vector.shape_cast %29 : vector<1x4x16x128xbf16> to vector<4x16x128xbf16>
    %31 = vector.shape_cast %28 : vector<4x16x128xbf16> to vector<1x4x16x128xbf16>
    tpu.vector_store %arg4[%c0_19, %c4, %c0_20, %c0_21], %31 {strides = array<i32>} : memref<1x16x16x128xbf16, #tpu.memory_space<vmem>>, vector<1x4x16x128xbf16>,
    %cst_22 = arith.constant dense<0.000000e+00> : vector<128xf32>
    %32 = vector.multi_reduction <add>, %26, %cst_22 [0] : vector<64x128xf32> to vector<128xf32>
    %33 = vector.shape_cast %32 : vector<128xf32> to vector<1x128xf32>
    %34 = arith.addf %16, %33 : vector<1x128xf32>
    %35 = arith.mulf %26, %26 : vector<64x128xf32>
    %cst_23 = arith.constant dense<0.000000e+00> : vector<128xf32>
    %36 = vector.multi_reduction <add>, %35, %cst_23 [0] : vector<64x128xf32> to vector<128xf32>
    %37 = vector.shape_cast %36 : vector<128xf32> to vector<1x128xf32>
    %38 = arith.addf %20, %37 : vector<1x128xf32>
    %c0_24 = arith.constant 0 : index
    %c128 = arith.constant 128 : index
    %c0_25 = arith.constant 0 : index
    %39 = vector.load %arg1[%c0_24, %c128, %c0_25] : memref<1x256x128xbf16, #tpu.memory_space<vmem>>, vector<1x64x128xbf16>
    %40 = vector.shape_cast %39 : vector<1x64x128xbf16> to vector<64x128xbf16>
    %c0_26 = arith.constant 0 : index
    %c0_27 = arith.constant 0 : index
    %41 = vector.load %arg2[%c0_26, %c0_27] : memref<128x128xbf16, #tpu.memory_space<vmem>>, vector<128x128xbf16>
    %cst_28 = arith.constant dense<0.000000e+00> : vector<64x128xf32>
    %42 = tpu.matmul %40, %41, %cst_28 {dimension_numbers = #tpu.dot_dimension_numbers<[1], [0], [0], [1], [0, 0, 1, 1], [], []>} : vector<64x128xbf16>, vector<128x128xbf16>, vector<64x128xf32> -> vector<64x128xf32>
    %43 = vector.broadcast %0 : vector<1x128xf32> to vector<64x128xf32>
    %44 = arith.addf %42, %43 : vector<64x128xf32>
    %45 = vector.shape_cast %44 : vector<64x128xf32> to vector<4x16x128xf32>
    %46 = arith.truncf %45 : vector<4x16x128xf32> to vector<4x16x128xbf16>
    %c0_29 = arith.constant 0 : index
    %c8 = arith.constant 8 : index
    %c0_30 = arith.constant 0 : index
    %c0_31 = arith.constant 0 : index
    %47 = vector.load %arg4[%c0_29, %c8, %c0_30, %c0_31] : memref<1x16x16x128xbf16, #tpu.memory_space<vmem>>, vector<1x4x16x128xbf16>
    %48 = vector.shape_cast %47 : vector<1x4x16x128xbf16> to vector<4x16x128xbf16>
    %49 = vector.shape_cast %46 : vector<4x16x128xbf16> to vector<1x4x16x128xbf16>
    tpu.vector_store %arg4[%c0_29, %c8, %c0_30, %c0_31], %49 {strides = array<i32>} : memref<1x16x16x128xbf16, #tpu.memory_space<vmem>>, vector<1x4x16x128xbf16>,
    %cst_32 = arith.constant dense<0.000000e+00> : vector<128xf32>
    %50 = vector.multi_reduction <add>, %44, %cst_32 [0] : vector<64x128xf32> to vector<128xf32>
    %51 = vector.shape_cast %50 : vector<128xf32> to vector<1x128xf32>
    %52 = arith.addf %34, %51 : vector<1x128xf32>
    %53 = arith.mulf %44, %44 : vector<64x128xf32>
    %cst_33 = arith.constant dense<0.000000e+00> : vector<128xf32>
    %54 = vector.multi_reduction <add>, %53, %cst_33 [0] : vector<64x128xf32> to vector<128xf32>
    %55 = vector.shape_cast %54 : vector<128xf32> to vector<1x128xf32>
    %56 = arith.addf %38, %55 : vector<1x128xf32>
    %c0_34 = arith.constant 0 : index
    %c192 = arith.constant 192 : index
    %c0_35 = arith.constant 0 : index
    %57 = vector.load %arg1[%c0_34, %c192, %c0_35] : memref<1x256x128xbf16, #tpu.memory_space<vmem>>, vector<1x64x128xbf16>
    %58 = vector.shape_cast %57 : vector<1x64x128xbf16> to vector<64x128xbf16>
    %c0_36 = arith.constant 0 : index
    %c0_37 = arith.constant 0 : index
    %59 = vector.load %arg2[%c0_36, %c0_37] : memref<128x128xbf16, #tpu.memory_space<vmem>>, vector<128x128xbf16>
    %cst_38 = arith.constant dense<0.000000e+00> : vector<64x128xf32>
    %60 = tpu.matmul %58, %59, %cst_38 {dimension_numbers = #tpu.dot_dimension_numbers<[1], [0], [0], [1], [0, 0, 1, 1], [], []>} : vector<64x128xbf16>, vector<128x128xbf16>, vector<64x128xf32> -> vector<64x128xf32>
    %61 = vector.broadcast %0 : vector<1x128xf32> to vector<64x128xf32>
    %62 = arith.addf %60, %61 : vector<64x128xf32>
    %63 = vector.shape_cast %62 : vector<64x128xf32> to vector<4x16x128xf32>
    %64 = arith.truncf %63 : vector<4x16x128xf32> to vector<4x16x128xbf16>
    %c0_39 = arith.constant 0 : index
    %c12 = arith.constant 12 : index
    %c0_40 = arith.constant 0 : index
    %c0_41 = arith.constant 0 : index
    %65 = vector.load %arg4[%c0_39, %c12, %c0_40, %c0_41] : memref<1x16x16x128xbf16, #tpu.memory_space<vmem>>, vector<1x4x16x128xbf16>
    %66 = vector.shape_cast %65 : vector<1x4x16x128xbf16> to vector<4x16x128xbf16>
    %67 = vector.shape_cast %64 : vector<4x16x128xbf16> to vector<1x4x16x128xbf16>
    tpu.vector_store %arg4[%c0_39, %c12, %c0_40, %c0_41], %67 {strides = array<i32>} : memref<1x16x16x128xbf16, #tpu.memory_space<vmem>>, vector<1x4x16x128xbf16>,
    %cst_42 = arith.constant dense<0.000000e+00> : vector<128xf32>
    %68 = vector.multi_reduction <add>, %62, %cst_42 [0] : vector<64x128xf32> to vector<128xf32>
    %69 = vector.shape_cast %68 : vector<128xf32> to vector<1x128xf32>
    %70 = arith.addf %52, %69 : vector<1x128xf32>
    %71 = arith.mulf %62, %62 : vector<64x128xf32>
    %cst_43 = arith.constant dense<0.000000e+00> : vector<128xf32>
    %72 = vector.multi_reduction <add>, %71, %cst_43 [0] : vector<64x128xf32> to vector<128xf32>
    %73 = vector.shape_cast %72 : vector<128xf32> to vector<1x128xf32>
    %74 = arith.addf %56, %73 : vector<1x128xf32>
    %75 = vector.shape_cast %70 : vector<1x128xf32> to vector<1x1x128xf32>
    %c0_44 = arith.constant 0 : index
    %c0_45 = arith.constant 0 : index
    %c0_46 = arith.constant 0 : index
    %76 = vector.load %arg5[%c0_44, %c0_45, %c0_46] : memref<1x1x128xf32, #tpu.memory_space<vmem>>, vector<1x1x128xf32>
    tpu.vector_store %arg5[%c0_44, %c0_45, %c0_46], %75 {strides = array<i32>} : memref<1x1x128xf32, #tpu.memory_space<vmem>>, vector<1x1x128xf32>,
    %77 = vector.shape_cast %74 : vector<1x128xf32> to vector<1x1x128xf32>
    %c0_47 = arith.constant 0 : index
    %c0_48 = arith.constant 0 : index
    %c0_49 = arith.constant 0 : index
    %78 = vector.load %arg6[%c0_47, %c0_48, %c0_49] : memref<1x1x128xf32, #tpu.memory_space<vmem>>, vector<1x1x128xf32>
    tpu.vector_store %arg6[%c0_47, %c0_48, %c0_49], %77 {strides = array<i32>} : memref<1x1x128xf32, #tpu.memory_space<vmem>>, vector<1x1x128xf32>,
    return
  }
  func.func @transform_0(%arg0: i32) -> (i32, i32, i32) {
    %c0_i32 = arith.constant 0 : i32
    %c0_i32_0 = arith.constant 0 : i32
    %c0_i32_1 = arith.constant 0 : i32
    return %arg0, %c0_i32, %c0_i32_0 : i32, i32, i32
  }
  func.func @transform_1(%arg0: i32) -> (i32, i32) {
    %c0_i32 = arith.constant 0 : i32
    %c0_i32_0 = arith.constant 0 : i32
    %c0_i32_1 = arith.constant 0 : i32
    return %c0_i32, %c0_i32_0 : i32, i32
  }
  func.func @transform_2(%arg0: i32) -> (i32, i32) {
    %c0_i32 = arith.constant 0 : i32
    %c0_i32_0 = arith.constant 0 : i32
    %c0_i32_1 = arith.constant 0 : i32
    return %c0_i32, %c0_i32_0 : i32, i32
  }
  func.func @transform_3(%arg0: i32) -> (i32, i32, i32, i32) {
    %c0_i32 = arith.constant 0 : i32
    %c0_i32_0 = arith.constant 0 : i32
    %c0_i32_1 = arith.constant 0 : i32
    %c0_i32_2 = arith.constant 0 : i32
    return %arg0, %c0_i32, %c0_i32_0, %c0_i32_1 : i32, i32, i32, i32
  }
  func.func @transform_4(%arg0: i32) -> (i32, i32, i32) {
    %c0_i32 = arith.constant 0 : i32
    %c0_i32_0 = arith.constant 0 : i32
    %c0_i32_1 = arith.constant 0 : i32
    return %arg0, %c0_i32, %c0_i32_0 : i32, i32, i32
  }
  func.func @transform_5(%arg0: i32) -> (i32, i32, i32) {
    %c0_i32 = arith.constant 0 : i32
    %c0_i32_0 = arith.constant 0 : i32
    %c0_i32_1 = arith.constant 0 : i32
    return %arg0, %c0_i32, %c0_i32_0 : i32, i32, i32
  }
}

module attributes {stable_mosaic.version = 11 : i64} {
  func.func @_bn_relu_conv2_stats_kernel(%arg0: i32, %arg1: memref<1x16x16x128xbf16, #tpu.memory_space<vmem>>, %arg2: memref<1x128xf32, #tpu.memory_space<vmem>>, %arg3: memref<1x128xf32, #tpu.memory_space<vmem>>, %arg4: memref<3x384x128xbf16, #tpu.memory_space<vmem>>, %arg5: memref<1x128xf32, #tpu.memory_space<vmem>>, %arg6: memref<1x16x16x128xbf16, #tpu.memory_space<vmem>>, %arg7: memref<1x1x128xf32, #tpu.memory_space<vmem>>, %arg8: memref<1x1x128xf32, #tpu.memory_space<vmem>>, %arg9: memref<18x16x384xbf16, #tpu.memory_space<vmem>>) attributes {dimension_semantics = [#tpu.dimension_semantics<parallel>], iteration_bounds = array<i64: 2>, scalar_prefetch = 0 : i64, scratch_operands = 1 : i64, tpu.core_type = #tpu.core_type<tc>, window_params = [{transform_indices = @transform_0, window_bounds = array<i64: 1, 16, 16, 128>}, {pipeline_mode = #tpu.pipeline_mode<synchronous>, transform_indices = @transform_1, window_bounds = array<i64: 1, 128>}, {pipeline_mode = #tpu.pipeline_mode<synchronous>, transform_indices = @transform_2, window_bounds = array<i64: 1, 128>}, {pipeline_mode = #tpu.pipeline_mode<synchronous>, transform_indices = @transform_3, window_bounds = array<i64: 3, 384, 128>}, {pipeline_mode = #tpu.pipeline_mode<synchronous>, transform_indices = @transform_4, window_bounds = array<i64: 1, 128>}, {transform_indices = @transform_5, window_bounds = array<i64: 1, 16, 16, 128>}, {transform_indices = @transform_6, window_bounds = array<i64: 1, 1, 128>}, {transform_indices = @transform_7, window_bounds = array<i64: 1, 1, 128>}]} {
    %c0 = arith.constant 0 : index
    %c0_0 = arith.constant 0 : index
    %c0_1 = arith.constant 0 : index
    %c0_2 = arith.constant 0 : index
    %0 = vector.load %arg1[%c0, %c0_0, %c0_1, %c0_2] : memref<1x16x16x128xbf16, #tpu.memory_space<vmem>>, vector<1x16x16x128xbf16>
    %1 = vector.shape_cast %0 : vector<1x16x16x128xbf16> to vector<16x16x128xbf16>
    %2 = arith.extf %1 : vector<16x16x128xbf16> to vector<16x16x128xf32>
    %c0_3 = arith.constant 0 : index
    %c0_4 = arith.constant 0 : index
    %3 = vector.load %arg2[%c0_3, %c0_4] : memref<1x128xf32, #tpu.memory_space<vmem>>, vector<1x128xf32>
    %4 = vector.shape_cast %3 : vector<1x128xf32> to vector<1x1x128xf32>
    %5 = vector.broadcast %4 : vector<1x1x128xf32> to vector<16x16x128xf32>
    %6 = arith.mulf %2, %5 : vector<16x16x128xf32>
    %c0_5 = arith.constant 0 : index
    %c0_6 = arith.constant 0 : index
    %7 = vector.load %arg3[%c0_5, %c0_6] : memref<1x128xf32, #tpu.memory_space<vmem>>, vector<1x128xf32>
    %8 = vector.shape_cast %7 : vector<1x128xf32> to vector<1x1x128xf32>
    %9 = vector.broadcast %8 : vector<1x1x128xf32> to vector<16x16x128xf32>
    %10 = arith.addf %6, %9 : vector<16x16x128xf32>
    %cst = arith.constant 0.000000e+00 : f32
    %11 = vector.broadcast %cst : f32 to vector<16x16x128xf32>
    %12 = arith.maximumf %10, %11 : vector<16x16x128xf32>
    %13 = arith.truncf %12 : vector<16x16x128xf32> to vector<16x16x128xbf16>
    %cst_7 = arith.constant 0.000000e+00 : bf16
    %14 = vector.broadcast %cst_7 : bf16 to vector<16x1x128xbf16>
    %15 = vector.extract_strided_slice %13 {offsets = [0, 0, 0], sizes = [16, 15, 128], strides = [1, 1, 1]} : vector<16x16x128xbf16> to vector<16x15x128xbf16>
    %16 = tpu.concatenate %14, %15 in 1 : vector<16x1x128xbf16>, vector<16x15x128xbf16> -> vector<16x16x128xbf16>
    %17 = vector.extract_strided_slice %13 {offsets = [0, 1, 0], sizes = [16, 15, 128], strides = [1, 1, 1]} : vector<16x16x128xbf16> to vector<16x15x128xbf16>
    %18 = tpu.concatenate %17, %14 in 1 : vector<16x15x128xbf16>, vector<16x1x128xbf16> -> vector<16x16x128xbf16>
    %cst_8 = arith.constant 0.000000e+00 : bf16
    %19 = vector.broadcast %cst_8 : bf16 to vector<1x16x384xbf16>
    %c0_9 = arith.constant 0 : index
    %c0_10 = arith.constant 0 : index
    %c0_11 = arith.constant 0 : index
    %20 = vector.load %arg9[%c0_9, %c0_10, %c0_11] : memref<18x16x384xbf16, #tpu.memory_space<vmem>>, vector<1x16x384xbf16>
    tpu.vector_store %arg9[%c0_9, %c0_10, %c0_11], %19 {strides = array<i32>} : memref<18x16x384xbf16, #tpu.memory_space<vmem>>, vector<1x16x384xbf16>,
    %c17 = arith.constant 17 : index
    %c0_12 = arith.constant 0 : index
    %c0_13 = arith.constant 0 : index
    %21 = vector.load %arg9[%c17, %c0_12, %c0_13] : memref<18x16x384xbf16, #tpu.memory_space<vmem>>, vector<1x16x384xbf16>
    tpu.vector_store %arg9[%c17, %c0_12, %c0_13], %19 {strides = array<i32>} : memref<18x16x384xbf16, #tpu.memory_space<vmem>>, vector<1x16x384xbf16>,
    %22 = tpu.concatenate %16, %13, %18 in 2 : vector<16x16x128xbf16>, vector<16x16x128xbf16>, vector<16x16x128xbf16> -> vector<16x16x384xbf16>
    %c1 = arith.constant 1 : index
    %c0_14 = arith.constant 0 : index
    %c0_15 = arith.constant 0 : index
    %23 = vector.load %arg9[%c1, %c0_14, %c0_15] : memref<18x16x384xbf16, #tpu.memory_space<vmem>>, vector<16x16x384xbf16>
    tpu.vector_store %arg9[%c1, %c0_14, %c0_15], %22 {strides = array<i32>} : memref<18x16x384xbf16, #tpu.memory_space<vmem>>, vector<16x16x384xbf16>,
    %c0_16 = arith.constant 0 : index
    %c0_17 = arith.constant 0 : index
    %24 = vector.load %arg5[%c0_16, %c0_17] : memref<1x128xf32, #tpu.memory_space<vmem>>, vector<1x128xf32>
    %25 = vector.shape_cast %24 : vector<1x128xf32> to vector<1x128xf32>
    %26 = vector.broadcast %25 : vector<1x128xf32> to vector<64x128xf32>
    %cst_18 = arith.constant 0.000000e+00 : f32
    %27 = vector.broadcast %cst_18 : f32 to vector<1x128xf32>
    %cst_19 = arith.constant 0.000000e+00 : f32
    %28 = vector.broadcast %cst_19 : f32 to vector<1x128xf32>
    %c0_20 = arith.constant 0 : index
    %c0_21 = arith.constant 0 : index
    %c0_22 = arith.constant 0 : index
    %29 = vector.load %arg9[%c0_20, %c0_21, %c0_22] : memref<18x16x384xbf16, #tpu.memory_space<vmem>>, vector<4x16x384xbf16>
    %30 = vector.shape_cast %29 : vector<4x16x384xbf16> to vector<64x384xbf16>
    %c0_23 = arith.constant 0 : index
    %c0_24 = arith.constant 0 : index
    %c0_25 = arith.constant 0 : index
    %31 = vector.load %arg4[%c0_23, %c0_24, %c0_25] : memref<3x384x128xbf16, #tpu.memory_space<vmem>>, vector<1x384x128xbf16>
    %32 = vector.shape_cast %31 : vector<1x384x128xbf16> to vector<384x128xbf16>
    %cst_26 = arith.constant dense<0.000000e+00> : vector<64x128xf32>
    %33 = tpu.matmul %30, %32, %cst_26 {dimension_numbers = #tpu.dot_dimension_numbers<[1], [0], [0], [1], [0, 0, 1, 1], [], []>} : vector<64x384xbf16>, vector<384x128xbf16>, vector<64x128xf32> -> vector<64x128xf32>
    %34 = arith.addf %26, %33 : vector<64x128xf32>
    %c1_27 = arith.constant 1 : index
    %c0_28 = arith.constant 0 : index
    %c0_29 = arith.constant 0 : index
    %35 = vector.load %arg9[%c1_27, %c0_28, %c0_29] : memref<18x16x384xbf16, #tpu.memory_space<vmem>>, vector<4x16x384xbf16>
    %36 = vector.shape_cast %35 : vector<4x16x384xbf16> to vector<64x384xbf16>
    %c1_30 = arith.constant 1 : index
    %c0_31 = arith.constant 0 : index
    %c0_32 = arith.constant 0 : index
    %37 = vector.load %arg4[%c1_30, %c0_31, %c0_32] : memref<3x384x128xbf16, #tpu.memory_space<vmem>>, vector<1x384x128xbf16>
    %38 = vector.shape_cast %37 : vector<1x384x128xbf16> to vector<384x128xbf16>
    %cst_33 = arith.constant dense<0.000000e+00> : vector<64x128xf32>
    %39 = tpu.matmul %36, %38, %cst_33 {dimension_numbers = #tpu.dot_dimension_numbers<[1], [0], [0], [1], [0, 0, 1, 1], [], []>} : vector<64x384xbf16>, vector<384x128xbf16>, vector<64x128xf32> -> vector<64x128xf32>
    %40 = arith.addf %34, %39 : vector<64x128xf32>
    %c2 = arith.constant 2 : index
    %c0_34 = arith.constant 0 : index
    %c0_35 = arith.constant 0 : index
    %41 = vector.load %arg9[%c2, %c0_34, %c0_35] : memref<18x16x384xbf16, #tpu.memory_space<vmem>>, vector<4x16x384xbf16>
    %42 = vector.shape_cast %41 : vector<4x16x384xbf16> to vector<64x384xbf16>
    %c2_36 = arith.constant 2 : index
    %c0_37 = arith.constant 0 : index
    %c0_38 = arith.constant 0 : index
    %43 = vector.load %arg4[%c2_36, %c0_37, %c0_38] : memref<3x384x128xbf16, #tpu.memory_space<vmem>>, vector<1x384x128xbf16>
    %44 = vector.shape_cast %43 : vector<1x384x128xbf16> to vector<384x128xbf16>
    %cst_39 = arith.constant dense<0.000000e+00> : vector<64x128xf32>
    %45 = tpu.matmul %42, %44, %cst_39 {dimension_numbers = #tpu.dot_dimension_numbers<[1], [0], [0], [1], [0, 0, 1, 1], [], []>} : vector<64x384xbf16>, vector<384x128xbf16>, vector<64x128xf32> -> vector<64x128xf32>
    %46 = arith.addf %40, %45 : vector<64x128xf32>
    %47 = vector.shape_cast %46 : vector<64x128xf32> to vector<4x16x128xf32>
    %48 = arith.truncf %47 : vector<4x16x128xf32> to vector<4x16x128xbf16>
    %c0_40 = arith.constant 0 : index
    %c0_41 = arith.constant 0 : index
    %c0_42 = arith.constant 0 : index
    %c0_43 = arith.constant 0 : index
    %49 = vector.load %arg6[%c0_40, %c0_41, %c0_42, %c0_43] : memref<1x16x16x128xbf16, #tpu.memory_space<vmem>>, vector<1x4x16x128xbf16>
    %50 = vector.shape_cast %49 : vector<1x4x16x128xbf16> to vector<4x16x128xbf16>
    %51 = vector.shape_cast %48 : vector<4x16x128xbf16> to vector<1x4x16x128xbf16>
    tpu.vector_store %arg6[%c0_40, %c0_41, %c0_42, %c0_43], %51 {strides = array<i32>} : memref<1x16x16x128xbf16, #tpu.memory_space<vmem>>, vector<1x4x16x128xbf16>,
    %cst_44 = arith.constant dense<0.000000e+00> : vector<128xf32>
    %52 = vector.multi_reduction <add>, %46, %cst_44 [0] : vector<64x128xf32> to vector<128xf32>
    %53 = vector.shape_cast %52 : vector<128xf32> to vector<1x128xf32>
    %54 = arith.addf %27, %53 : vector<1x128xf32>
    %55 = arith.mulf %46, %46 : vector<64x128xf32>
    %cst_45 = arith.constant dense<0.000000e+00> : vector<128xf32>
    %56 = vector.multi_reduction <add>, %55, %cst_45 [0] : vector<64x128xf32> to vector<128xf32>
    %57 = vector.shape_cast %56 : vector<128xf32> to vector<1x128xf32>
    %58 = arith.addf %28, %57 : vector<1x128xf32>
    %c4 = arith.constant 4 : index
    %c0_46 = arith.constant 0 : index
    %c0_47 = arith.constant 0 : index
    %59 = vector.load %arg9[%c4, %c0_46, %c0_47] : memref<18x16x384xbf16, #tpu.memory_space<vmem>>, vector<4x16x384xbf16>
    %60 = vector.shape_cast %59 : vector<4x16x384xbf16> to vector<64x384xbf16>
    %c0_48 = arith.constant 0 : index
    %c0_49 = arith.constant 0 : index
    %c0_50 = arith.constant 0 : index
    %61 = vector.load %arg4[%c0_48, %c0_49, %c0_50] : memref<3x384x128xbf16, #tpu.memory_space<vmem>>, vector<1x384x128xbf16>
    %62 = vector.shape_cast %61 : vector<1x384x128xbf16> to vector<384x128xbf16>
    %cst_51 = arith.constant dense<0.000000e+00> : vector<64x128xf32>
    %63 = tpu.matmul %60, %62, %cst_51 {dimension_numbers = #tpu.dot_dimension_numbers<[1], [0], [0], [1], [0, 0, 1, 1], [], []>} : vector<64x384xbf16>, vector<384x128xbf16>, vector<64x128xf32> -> vector<64x128xf32>
    %64 = arith.addf %26, %63 : vector<64x128xf32>
    %c5 = arith.constant 5 : index
    %c0_52 = arith.constant 0 : index
    %c0_53 = arith.constant 0 : index
    %65 = vector.load %arg9[%c5, %c0_52, %c0_53] : memref<18x16x384xbf16, #tpu.memory_space<vmem>>, vector<4x16x384xbf16>
    %66 = vector.shape_cast %65 : vector<4x16x384xbf16> to vector<64x384xbf16>
    %c1_54 = arith.constant 1 : index
    %c0_55 = arith.constant 0 : index
    %c0_56 = arith.constant 0 : index
    %67 = vector.load %arg4[%c1_54, %c0_55, %c0_56] : memref<3x384x128xbf16, #tpu.memory_space<vmem>>, vector<1x384x128xbf16>
    %68 = vector.shape_cast %67 : vector<1x384x128xbf16> to vector<384x128xbf16>
    %cst_57 = arith.constant dense<0.000000e+00> : vector<64x128xf32>
    %69 = tpu.matmul %66, %68, %cst_57 {dimension_numbers = #tpu.dot_dimension_numbers<[1], [0], [0], [1], [0, 0, 1, 1], [], []>} : vector<64x384xbf16>, vector<384x128xbf16>, vector<64x128xf32> -> vector<64x128xf32>
    %70 = arith.addf %64, %69 : vector<64x128xf32>
    %c6 = arith.constant 6 : index
    %c0_58 = arith.constant 0 : index
    %c0_59 = arith.constant 0 : index
    %71 = vector.load %arg9[%c6, %c0_58, %c0_59] : memref<18x16x384xbf16, #tpu.memory_space<vmem>>, vector<4x16x384xbf16>
    %72 = vector.shape_cast %71 : vector<4x16x384xbf16> to vector<64x384xbf16>
    %c2_60 = arith.constant 2 : index
    %c0_61 = arith.constant 0 : index
    %c0_62 = arith.constant 0 : index
    %73 = vector.load %arg4[%c2_60, %c0_61, %c0_62] : memref<3x384x128xbf16, #tpu.memory_space<vmem>>, vector<1x384x128xbf16>
    %74 = vector.shape_cast %73 : vector<1x384x128xbf16> to vector<384x128xbf16>
    %cst_63 = arith.constant dense<0.000000e+00> : vector<64x128xf32>
    %75 = tpu.matmul %72, %74, %cst_63 {dimension_numbers = #tpu.dot_dimension_numbers<[1], [0], [0], [1], [0, 0, 1, 1], [], []>} : vector<64x384xbf16>, vector<384x128xbf16>, vector<64x128xf32> -> vector<64x128xf32>
    %76 = arith.addf %70, %75 : vector<64x128xf32>
    %77 = vector.shape_cast %76 : vector<64x128xf32> to vector<4x16x128xf32>
    %78 = arith.truncf %77 : vector<4x16x128xf32> to vector<4x16x128xbf16>
    %c0_64 = arith.constant 0 : index
    %c4_65 = arith.constant 4 : index
    %c0_66 = arith.constant 0 : index
    %c0_67 = arith.constant 0 : index
    %79 = vector.load %arg6[%c0_64, %c4_65, %c0_66, %c0_67] : memref<1x16x16x128xbf16, #tpu.memory_space<vmem>>, vector<1x4x16x128xbf16>
    %80 = vector.shape_cast %79 : vector<1x4x16x128xbf16> to vector<4x16x128xbf16>
    %81 = vector.shape_cast %78 : vector<4x16x128xbf16> to vector<1x4x16x128xbf16>
    tpu.vector_store %arg6[%c0_64, %c4_65, %c0_66, %c0_67], %81 {strides = array<i32>} : memref<1x16x16x128xbf16, #tpu.memory_space<vmem>>, vector<1x4x16x128xbf16>,
    %cst_68 = arith.constant dense<0.000000e+00> : vector<128xf32>
    %82 = vector.multi_reduction <add>, %76, %cst_68 [0] : vector<64x128xf32> to vector<128xf32>
    %83 = vector.shape_cast %82 : vector<128xf32> to vector<1x128xf32>
    %84 = arith.addf %54, %83 : vector<1x128xf32>
    %85 = arith.mulf %76, %76 : vector<64x128xf32>
    %cst_69 = arith.constant dense<0.000000e+00> : vector<128xf32>
    %86 = vector.multi_reduction <add>, %85, %cst_69 [0] : vector<64x128xf32> to vector<128xf32>
    %87 = vector.shape_cast %86 : vector<128xf32> to vector<1x128xf32>
    %88 = arith.addf %58, %87 : vector<1x128xf32>
    %c8 = arith.constant 8 : index
    %c0_70 = arith.constant 0 : index
    %c0_71 = arith.constant 0 : index
    %89 = vector.load %arg9[%c8, %c0_70, %c0_71] : memref<18x16x384xbf16, #tpu.memory_space<vmem>>, vector<4x16x384xbf16>
    %90 = vector.shape_cast %89 : vector<4x16x384xbf16> to vector<64x384xbf16>
    %c0_72 = arith.constant 0 : index
    %c0_73 = arith.constant 0 : index
    %c0_74 = arith.constant 0 : index
    %91 = vector.load %arg4[%c0_72, %c0_73, %c0_74] : memref<3x384x128xbf16, #tpu.memory_space<vmem>>, vector<1x384x128xbf16>
    %92 = vector.shape_cast %91 : vector<1x384x128xbf16> to vector<384x128xbf16>
    %cst_75 = arith.constant dense<0.000000e+00> : vector<64x128xf32>
    %93 = tpu.matmul %90, %92, %cst_75 {dimension_numbers = #tpu.dot_dimension_numbers<[1], [0], [0], [1], [0, 0, 1, 1], [], []>} : vector<64x384xbf16>, vector<384x128xbf16>, vector<64x128xf32> -> vector<64x128xf32>
    %94 = arith.addf %26, %93 : vector<64x128xf32>
    %c9 = arith.constant 9 : index
    %c0_76 = arith.constant 0 : index
    %c0_77 = arith.constant 0 : index
    %95 = vector.load %arg9[%c9, %c0_76, %c0_77] : memref<18x16x384xbf16, #tpu.memory_space<vmem>>, vector<4x16x384xbf16>
    %96 = vector.shape_cast %95 : vector<4x16x384xbf16> to vector<64x384xbf16>
    %c1_78 = arith.constant 1 : index
    %c0_79 = arith.constant 0 : index
    %c0_80 = arith.constant 0 : index
    %97 = vector.load %arg4[%c1_78, %c0_79, %c0_80] : memref<3x384x128xbf16, #tpu.memory_space<vmem>>, vector<1x384x128xbf16>
    %98 = vector.shape_cast %97 : vector<1x384x128xbf16> to vector<384x128xbf16>
    %cst_81 = arith.constant dense<0.000000e+00> : vector<64x128xf32>
    %99 = tpu.matmul %96, %98, %cst_81 {dimension_numbers = #tpu.dot_dimension_numbers<[1], [0], [0], [1], [0, 0, 1, 1], [], []>} : vector<64x384xbf16>, vector<384x128xbf16>, vector<64x128xf32> -> vector<64x128xf32>
    %100 = arith.addf %94, %99 : vector<64x128xf32>
    %c10 = arith.constant 10 : index
    %c0_82 = arith.constant 0 : index
    %c0_83 = arith.constant 0 : index
    %101 = vector.load %arg9[%c10, %c0_82, %c0_83] : memref<18x16x384xbf16, #tpu.memory_space<vmem>>, vector<4x16x384xbf16>
    %102 = vector.shape_cast %101 : vector<4x16x384xbf16> to vector<64x384xbf16>
    %c2_84 = arith.constant 2 : index
    %c0_85 = arith.constant 0 : index
    %c0_86 = arith.constant 0 : index
    %103 = vector.load %arg4[%c2_84, %c0_85, %c0_86] : memref<3x384x128xbf16, #tpu.memory_space<vmem>>, vector<1x384x128xbf16>
    %104 = vector.shape_cast %103 : vector<1x384x128xbf16> to vector<384x128xbf16>
    %cst_87 = arith.constant dense<0.000000e+00> : vector<64x128xf32>
    %105 = tpu.matmul %102, %104, %cst_87 {dimension_numbers = #tpu.dot_dimension_numbers<[1], [0], [0], [1], [0, 0, 1, 1], [], []>} : vector<64x384xbf16>, vector<384x128xbf16>, vector<64x128xf32> -> vector<64x128xf32>
    %106 = arith.addf %100, %105 : vector<64x128xf32>
    %107 = vector.shape_cast %106 : vector<64x128xf32> to vector<4x16x128xf32>
    %108 = arith.truncf %107 : vector<4x16x128xf32> to vector<4x16x128xbf16>
    %c0_88 = arith.constant 0 : index
    %c8_89 = arith.constant 8 : index
    %c0_90 = arith.constant 0 : index
    %c0_91 = arith.constant 0 : index
    %109 = vector.load %arg6[%c0_88, %c8_89, %c0_90, %c0_91] : memref<1x16x16x128xbf16, #tpu.memory_space<vmem>>, vector<1x4x16x128xbf16>
    %110 = vector.shape_cast %109 : vector<1x4x16x128xbf16> to vector<4x16x128xbf16>
    %111 = vector.shape_cast %108 : vector<4x16x128xbf16> to vector<1x4x16x128xbf16>
    tpu.vector_store %arg6[%c0_88, %c8_89, %c0_90, %c0_91], %111 {strides = array<i32>} : memref<1x16x16x128xbf16, #tpu.memory_space<vmem>>, vector<1x4x16x128xbf16>,
    %cst_92 = arith.constant dense<0.000000e+00> : vector<128xf32>
    %112 = vector.multi_reduction <add>, %106, %cst_92 [0] : vector<64x128xf32> to vector<128xf32>
    %113 = vector.shape_cast %112 : vector<128xf32> to vector<1x128xf32>
    %114 = arith.addf %84, %113 : vector<1x128xf32>
    %115 = arith.mulf %106, %106 : vector<64x128xf32>
    %cst_93 = arith.constant dense<0.000000e+00> : vector<128xf32>
    %116 = vector.multi_reduction <add>, %115, %cst_93 [0] : vector<64x128xf32> to vector<128xf32>
    %117 = vector.shape_cast %116 : vector<128xf32> to vector<1x128xf32>
    %118 = arith.addf %88, %117 : vector<1x128xf32>
    %c12 = arith.constant 12 : index
    %c0_94 = arith.constant 0 : index
    %c0_95 = arith.constant 0 : index
    %119 = vector.load %arg9[%c12, %c0_94, %c0_95] : memref<18x16x384xbf16, #tpu.memory_space<vmem>>, vector<4x16x384xbf16>
    %120 = vector.shape_cast %119 : vector<4x16x384xbf16> to vector<64x384xbf16>
    %c0_96 = arith.constant 0 : index
    %c0_97 = arith.constant 0 : index
    %c0_98 = arith.constant 0 : index
    %121 = vector.load %arg4[%c0_96, %c0_97, %c0_98] : memref<3x384x128xbf16, #tpu.memory_space<vmem>>, vector<1x384x128xbf16>
    %122 = vector.shape_cast %121 : vector<1x384x128xbf16> to vector<384x128xbf16>
    %cst_99 = arith.constant dense<0.000000e+00> : vector<64x128xf32>
    %123 = tpu.matmul %120, %122, %cst_99 {dimension_numbers = #tpu.dot_dimension_numbers<[1], [0], [0], [1], [0, 0, 1, 1], [], []>} : vector<64x384xbf16>, vector<384x128xbf16>, vector<64x128xf32> -> vector<64x128xf32>
    %124 = arith.addf %26, %123 : vector<64x128xf32>
    %c13 = arith.constant 13 : index
    %c0_100 = arith.constant 0 : index
    %c0_101 = arith.constant 0 : index
    %125 = vector.load %arg9[%c13, %c0_100, %c0_101] : memref<18x16x384xbf16, #tpu.memory_space<vmem>>, vector<4x16x384xbf16>
    %126 = vector.shape_cast %125 : vector<4x16x384xbf16> to vector<64x384xbf16>
    %c1_102 = arith.constant 1 : index
    %c0_103 = arith.constant 0 : index
    %c0_104 = arith.constant 0 : index
    %127 = vector.load %arg4[%c1_102, %c0_103, %c0_104] : memref<3x384x128xbf16, #tpu.memory_space<vmem>>, vector<1x384x128xbf16>
    %128 = vector.shape_cast %127 : vector<1x384x128xbf16> to vector<384x128xbf16>
    %cst_105 = arith.constant dense<0.000000e+00> : vector<64x128xf32>
    %129 = tpu.matmul %126, %128, %cst_105 {dimension_numbers = #tpu.dot_dimension_numbers<[1], [0], [0], [1], [0, 0, 1, 1], [], []>} : vector<64x384xbf16>, vector<384x128xbf16>, vector<64x128xf32> -> vector<64x128xf32>
    %130 = arith.addf %124, %129 : vector<64x128xf32>
    %c14 = arith.constant 14 : index
    %c0_106 = arith.constant 0 : index
    %c0_107 = arith.constant 0 : index
    %131 = vector.load %arg9[%c14, %c0_106, %c0_107] : memref<18x16x384xbf16, #tpu.memory_space<vmem>>, vector<4x16x384xbf16>
    %132 = vector.shape_cast %131 : vector<4x16x384xbf16> to vector<64x384xbf16>
    %c2_108 = arith.constant 2 : index
    %c0_109 = arith.constant 0 : index
    %c0_110 = arith.constant 0 : index
    %133 = vector.load %arg4[%c2_108, %c0_109, %c0_110] : memref<3x384x128xbf16, #tpu.memory_space<vmem>>, vector<1x384x128xbf16>
    %134 = vector.shape_cast %133 : vector<1x384x128xbf16> to vector<384x128xbf16>
    %cst_111 = arith.constant dense<0.000000e+00> : vector<64x128xf32>
    %135 = tpu.matmul %132, %134, %cst_111 {dimension_numbers = #tpu.dot_dimension_numbers<[1], [0], [0], [1], [0, 0, 1, 1], [], []>} : vector<64x384xbf16>, vector<384x128xbf16>, vector<64x128xf32> -> vector<64x128xf32>
    %136 = arith.addf %130, %135 : vector<64x128xf32>
    %137 = vector.shape_cast %136 : vector<64x128xf32> to vector<4x16x128xf32>
    %138 = arith.truncf %137 : vector<4x16x128xf32> to vector<4x16x128xbf16>
    %c0_112 = arith.constant 0 : index
    %c12_113 = arith.constant 12 : index
    %c0_114 = arith.constant 0 : index
    %c0_115 = arith.constant 0 : index
    %139 = vector.load %arg6[%c0_112, %c12_113, %c0_114, %c0_115] : memref<1x16x16x128xbf16, #tpu.memory_space<vmem>>, vector<1x4x16x128xbf16>
    %140 = vector.shape_cast %139 : vector<1x4x16x128xbf16> to vector<4x16x128xbf16>
    %141 = vector.shape_cast %138 : vector<4x16x128xbf16> to vector<1x4x16x128xbf16>
    tpu.vector_store %arg6[%c0_112, %c12_113, %c0_114, %c0_115], %141 {strides = array<i32>} : memref<1x16x16x128xbf16, #tpu.memory_space<vmem>>, vector<1x4x16x128xbf16>,
    %cst_116 = arith.constant dense<0.000000e+00> : vector<128xf32>
    %142 = vector.multi_reduction <add>, %136, %cst_116 [0] : vector<64x128xf32> to vector<128xf32>
    %143 = vector.shape_cast %142 : vector<128xf32> to vector<1x128xf32>
    %144 = arith.addf %114, %143 : vector<1x128xf32>
    %145 = arith.mulf %136, %136 : vector<64x128xf32>
    %cst_117 = arith.constant dense<0.000000e+00> : vector<128xf32>
    %146 = vector.multi_reduction <add>, %145, %cst_117 [0] : vector<64x128xf32> to vector<128xf32>
    %147 = vector.shape_cast %146 : vector<128xf32> to vector<1x128xf32>
    %148 = arith.addf %118, %147 : vector<1x128xf32>
    %149 = vector.shape_cast %144 : vector<1x128xf32> to vector<1x1x128xf32>
    %c0_118 = arith.constant 0 : index
    %c0_119 = arith.constant 0 : index
    %c0_120 = arith.constant 0 : index
    %150 = vector.load %arg7[%c0_118, %c0_119, %c0_120] : memref<1x1x128xf32, #tpu.memory_space<vmem>>, vector<1x1x128xf32>
    tpu.vector_store %arg7[%c0_118, %c0_119, %c0_120], %149 {strides = array<i32>} : memref<1x1x128xf32, #tpu.memory_space<vmem>>, vector<1x1x128xf32>,
    %151 = vector.shape_cast %148 : vector<1x128xf32> to vector<1x1x128xf32>
    %c0_121 = arith.constant 0 : index
    %c0_122 = arith.constant 0 : index
    %c0_123 = arith.constant 0 : index
    %152 = vector.load %arg8[%c0_121, %c0_122, %c0_123] : memref<1x1x128xf32, #tpu.memory_space<vmem>>, vector<1x1x128xf32>
    tpu.vector_store %arg8[%c0_121, %c0_122, %c0_123], %151 {strides = array<i32>} : memref<1x1x128xf32, #tpu.memory_space<vmem>>, vector<1x1x128xf32>,
    return
  }
  func.func @transform_0(%arg0: i32) -> (i32, i32, i32, i32) {
    %c0_i32 = arith.constant 0 : i32
    %c0_i32_0 = arith.constant 0 : i32
    %c0_i32_1 = arith.constant 0 : i32
    %c0_i32_2 = arith.constant 0 : i32
    return %arg0, %c0_i32, %c0_i32_0, %c0_i32_1 : i32, i32, i32, i32
  }
  func.func @transform_1(%arg0: i32) -> (i32, i32) {
    %c0_i32 = arith.constant 0 : i32
    %c0_i32_0 = arith.constant 0 : i32
    %c0_i32_1 = arith.constant 0 : i32
    return %c0_i32, %c0_i32_0 : i32, i32
  }
  func.func @transform_2(%arg0: i32) -> (i32, i32) {
    %c0_i32 = arith.constant 0 : i32
    %c0_i32_0 = arith.constant 0 : i32
    %c0_i32_1 = arith.constant 0 : i32
    return %c0_i32, %c0_i32_0 : i32, i32
  }
  func.func @transform_3(%arg0: i32) -> (i32, i32, i32) {
    %c0_i32 = arith.constant 0 : i32
    %c0_i32_0 = arith.constant 0 : i32
    %c0_i32_1 = arith.constant 0 : i32
    %c0_i32_2 = arith.constant 0 : i32
    return %c0_i32, %c0_i32_0, %c0_i32_1 : i32, i32, i32
  }
  func.func @transform_4(%arg0: i32) -> (i32, i32) {
    %c0_i32 = arith.constant 0 : i32
    %c0_i32_0 = arith.constant 0 : i32
    %c0_i32_1 = arith.constant 0 : i32
    return %c0_i32, %c0_i32_0 : i32, i32
  }
  func.func @transform_5(%arg0: i32) -> (i32, i32, i32, i32) {
    %c0_i32 = arith.constant 0 : i32
    %c0_i32_0 = arith.constant 0 : i32
    %c0_i32_1 = arith.constant 0 : i32
    %c0_i32_2 = arith.constant 0 : i32
    return %arg0, %c0_i32, %c0_i32_0, %c0_i32_1 : i32, i32, i32, i32
  }
  func.func @transform_6(%arg0: i32) -> (i32, i32, i32) {
    %c0_i32 = arith.constant 0 : i32
    %c0_i32_0 = arith.constant 0 : i32
    %c0_i32_1 = arith.constant 0 : i32
    return %arg0, %c0_i32, %c0_i32_0 : i32, i32, i32
  }
  func.func @transform_7(%arg0: i32) -> (i32, i32, i32) {
    %c0_i32 = arith.constant 0 : i32
    %c0_i32_0 = arith.constant 0 : i32
    %c0_i32_1 = arith.constant 0 : i32
    return %arg0, %c0_i32, %c0_i32_0 : i32, i32, i32
  }
}

</mosaic_0001>

<bundles_post_ra>
// kernel: conv_block_forward.2
= control target key start
LH: loop header
LB: loop body
LE: loop exit
PB: predicated region body
PF: predicated region fallthrough
CT: control target
= control target key end

     0   :  { %s1791_s18 = smov 0   ;;  %s2008_s0 = inlined_call_operand.vmem [shape: bf16[2,256,128], index: 0, kind: input, shape index: {}]   ;;  %s2009_s1 = inlined_call_operand.vmem [shape: bf16[128,128], index: 1, kind: input, shape index: {}]   ;;  %s2010_s2 = inlined_call_operand.vmem [shape: f32[1,128], index: 2, kind: input, shape index: {}]   ;;  %s2011_s3 = inlined_call_operand.vmem [shape: bf16[2,16,16,128], index: 3, kind: output, shape index: {0}]   ;;  %s2012_s4 = inlined_call_operand.vmem [shape: f32[2,1,128], index: 4, kind: output, shape index: {1}]   ;;  %s2013_s5 = inlined_call_operand.vmem [shape: f32[2,1,128], index: 5, kind: output, shape index: {2}]  }
   0x1 LB: > { %s1308_s19 = sadd.s32 4294967295, %s1759_s18   ;;  %p1312_p0 = scmp.ge.s32.totalorder %s1759_s18, 1  ;;  %s1759_s18 = sphi %s1791_s18, %s16_s18  }
   0x2   : > { %p192_p1 = scmp.lt.s32.totalorder %s1759_s18, 3 }
   0x4   : > { %p193_p2 = pnand %p1312_p0, %p192_p1 }
   0x5   : > { %p226_p3 = scmp.lt.s32.totalorder (!%p193_p2), %s1308_s19, 1 }
   0x6   : > { %196 = sbr.rel (%p193_p2) target bundleno = 310 (0x136), region = 32 }
   0xb   : > { %v1705_v0 = vld [vmem:[%s2009_s1 + $0x38] sm:$0xff]   ;;  %v1707_v2 = vld [vmem:[%s2009_s1 + $0x30] sm:$0xff]   ;;  %v1709_v4 = vld [vmem:[%s2009_s1 + $0x28] sm:$0xff]   ;;  %s2015_s19 = smov (!%p226_p3, %s1308_s19), 1 }
   0xc   : > { %v1706_v1 = vld [vmem:[%s2009_s1 + $0x38] sm:$0xff]   ;;  %1601 = vmatprep.subr.bf16.mxu0 %v1705_v0  ;;  %v1708_v3 = vld [vmem:[%s2009_s1 + $0x30] sm:$0xff]   ;;  %v1710_v5 = vld [vmem:[%s2009_s1 + $0x28] sm:$0xff]   ;;  %s1424_s11 = sshll.u32 %s2015_s19, 7  ;;  %s238_s28 = scalar_lea.vmem %s2012_s4, %s2015_s19 }
   0xd   : > { %1625 = vmatprep.subr.bf16.mxu1 %v1706_v1  ;;  %1602 = vmatpush3.bf16.msra.mxu0 %v1705_v0  ;;  %v1711_v6 = vld [vmem:[%s2009_s1 + $0x20] sm:$0xff]   ;;  %v1713_v8 = vld [vmem:[%s2009_s1 + $0x18] sm:$0xff]   ;;  %s1837_s20 = scalar_lea.vmem %s2008_s0, %s1424_s11  ;;  %v1715_v10 = vld [vmem:[%s2009_s1 + $0x10] sm:$0xff]   ;;  %s1936_s26 = scalar_lea.vmem %s2011_s3, %s1424_s11 }
   0xe   : > { %1626 = vmatpush3.bf16.msra.mxu1 %v1706_v1  ;;  %1603 = vmatprep.subr.bf16.mxu0 %v1707_v2  ;;  %v1712_v7 = vld [vmem:[%s2009_s1 + $0x20] sm:$0xff]   ;;  %v1714_v9 = vld [vmem:[%s2009_s1 + $0x18] sm:$0xff]   ;;  %v1716_v11 = vld [vmem:[%s2009_s1 + $0x10] sm:$0xff]   ;;  %s241_s6 = scalar_lea.vmem %s2013_s5, %s2015_s19 }
   0xf   : > { %1627 = vmatprep.subr.bf16.mxu1 %v1708_v3  ;;  %v1721_v12 = vld [vmem:[%s1837_s20] sm:$0xff]   ;;  %v1717_v14 = vld [vmem:[%s2009_s1 + $0x8] sm:$0xff]   ;;  %v1725_v19 = vld [vmem:[%s2009_s1 + $0x38] sm:$0xff]  }
  0x10   : > { %v1722_v13 = vld [vmem:[%s1837_s20 + $0x20] sm:$0xff]   ;;  %1617 = vmatprep.mubr.bf16.mxu0 %v1721_v12  ;;  %v1718_v15 = vld [vmem:[%s2009_s1 + $0x8] sm:$0xff]   ;;  %v1726_v20 = vld [vmem:[%s2009_s1 + $0x38] sm:$0xff]  }
  0x11   : > { %1604 = vmatpush3.bf16.msra.mxu0 %v1707_v2  ;;  %1641 = vmatprep.mubr.bf16.mxu1 %v1722_v13  ;;  %v1719_v16 = vld [vmem:[%s2009_s1] sm:$0xff]   ;;  %v1723_v18 = vld [vmem:[%s1837_s20 + $0x8] sm:$0xff]   ;;  %v1727_v22 = vld [vmem:[%s2009_s1 + $0x30] sm:$0xff]  }
  0x12   : > { %1628 = vmatpush3.bf16.msra.mxu1 %v1708_v3  ;;  %1605 = vmatprep.subr.bf16.mxu0 %v1709_v4  ;;  %v1720_v17 = vld [vmem:[%s2009_s1] sm:$0xff]   ;;  %v1724_v21 = vld [vmem:[%s1837_s20 + $0x28] sm:$0xff]   ;;  %v1728_v23 = vld [vmem:[%s2009_s1 + $0x30] sm:$0xff]  }
  0x13   : > { %1629 = vmatprep.subr.bf16.mxu1 %v1710_v5  ;;  %v1729_v24 = vld [vmem:[%s1837_s20 + $0x10] sm:$0xff]   ;;  %v1731_v26 = vld [vmem:[%s1837_s20 + $0x18] sm:$0xff]   ;;  %v1733_v27 = vld [vmem:[%s2009_s1 + $0x28] sm:$0xff]  }
  0x14   : > { %v1730_v25 = vld [vmem:[%s1837_s20 + $0x30] sm:$0xff]   ;;  %v1734_v28 = vld [vmem:[%s2009_s1 + $0x28] sm:$0xff]   ;;  %v1732_v29 = vld [vmem:[%s1837_s20 + $0x38] sm:$0xff]  }
  0x15   : > { %1606 = vmatpush3.bf16.msra.mxu0 %v1709_v4  ;;  %v1735_v30 = vld [vmem:[%s2009_s1 + $0x20] sm:$0xff]   ;;  %v1737_v34 = vld [vmem:[%s2009_s1 + $0x18] sm:$0xff]   ;;  %v1739_v36 = vld [vmem:[%s2009_s1 + $0x10] sm:$0xff]  }
  0x16   : > { %1630 = vmatpush3.bf16.msra.mxu1 %v1710_v5  ;;  %1607 = vmatprep.subr.bf16.mxu0 %v1711_v6  ;;  %v1736_v31 = vld [vmem:[%s2009_s1 + $0x20] sm:$0xff]   ;;  %v1738_v35 = vld [vmem:[%s2009_s1 + $0x18] sm:$0xff]   ;;  %v1740_v37 = vld [vmem:[%s2009_s1 + $0x10] sm:$0xff]  }
  0x17   : > { %1631 = vmatprep.subr.bf16.mxu1 %v1712_v7  ;;  %v1745_v32 = vld [vmem:[%s1837_s20 + $0x40] sm:$0xff]   ;;  %v1741_v38 = vld [vmem:[%s2009_s1 + $0x8] sm:$0xff]   ;;  %v1749_v44 = vld [vmem:[%s1837_s20 + $0x50] sm:$0xff]  }
  0x18   : > { %v1746_v33 = vld [vmem:[%s1837_s20 + $0x60] sm:$0xff]   ;;  %v1742_v39 = vld [vmem:[%s2009_s1 + $0x8] sm:$0xff]   ;;  %v1750_v45 = vld [vmem:[%s1837_s20 + $0x70] sm:$0xff]  }
  0x19   : > { %1608 = vmatpush3.bf16.msra.mxu0 %v1711_v6  ;;  %v1743_v40 = vld [vmem:[%s2009_s1] sm:$0xff]   ;;  %v1747_v42 = vld [vmem:[%s1837_s20 + $0x48] sm:$0xff]   ;;  %v1751_v46 = vld [vmem:[%s1837_s20 + $0x58] sm:$0xff]  }
  0x1a   : > { %1632 = vmatpush3.bf16.msra.mxu1 %v1712_v7  ;;  %1609 = vmatprep.subr.bf16.mxu0 %v1713_v8  ;;  %v1744_v41 = vld [vmem:[%s2009_s1] sm:$0xff]   ;;  %v1748_v43 = vld [vmem:[%s1837_s20 + $0x68] sm:$0xff]   ;;  %v1752_v47 = vld [vmem:[%s1837_s20 + $0x78] sm:$0xff]  }
  0x1b   : > { %1633 = vmatprep.subr.bf16.mxu1 %v1714_v9  ;;  %v1924_v49 = vld [vmem:[%s2010_s2] ss:$0 sm:$0xff] }
  0x1d   : > { %1610 = vmatpush3.bf16.msra.mxu0 %v1713_v8 }
  0x1e   : > { %1634 = vmatpush3.bf16.msra.mxu1 %v1714_v9  ;;  %1611 = vmatprep.subr.bf16.mxu0 %v1715_v10 }
  0x1f   : > { %1635 = vmatprep.subr.bf16.mxu1 %v1716_v11 }
  0x21   : > { %1612 = vmatpush3.bf16.msra.mxu0 %v1715_v10 }
  0x22   : > { %1636 = vmatpush3.bf16.msra.mxu1 %v1716_v11  ;;  %1613 = vmatprep.subr.bf16.mxu0 %v1717_v14 }
  0x23   : > { %1637 = vmatprep.subr.bf16.mxu1 %v1718_v15 }
  0x25   : > { %1614 = vmatpush3.bf16.msra.mxu0 %v1717_v14 }
  0x26   : > { %1638 = vmatpush3.bf16.msra.mxu1 %v1718_v15  ;;  %1615 = vmatprep.subr.bf16.mxu0 %v1719_v16 }
  0x27   : > { %1639 = vmatprep.subr.bf16.mxu1 %v1720_v17 }
  0x29   : > { %1616 = vmatpush3.bf16.msra.mxu0 %v1719_v16 }
  0x2a   : > { %1640 = vmatpush3.bf16.msra.mxu1 %v1720_v17  ;;  %1649 = vmatprep.subr.bf16.mxu0 %v1725_v19 }
  0x2b   : > { %1673 = vmatprep.subr.bf16.mxu1 %v1726_v20 }
  0x2c   : > { %1618 = vmatmul.mubr.bf16.vlgmr.msra.gmra.mxu0 %v1723_v18 }
  0x2d   : > { %1642 = vmatmul.mubr.bf16.vlgmr.msra.gmra.mxu1 %v1724_v21  ;;  %1650 = vmatpush3.bf16.msra.mxu0 %v1725_v19 }
  0x2e   : > { %1674 = vmatpush3.bf16.msra.mxu1 %v1726_v20  ;;  %1651 = vmatprep.subr.bf16.mxu0 %v1727_v22 }
  0x2f   : > { %1675 = vmatprep.subr.bf16.mxu1 %v1728_v23  ;;  %1621 = vmatprep.mubr.bf16.mxu0 %v1729_v24 }
  0x30   : > { %1645 = vmatprep.mubr.bf16.mxu1 %v1730_v25 }
  0x31   : > { %1652 = vmatpush3.bf16.msra.mxu0 %v1727_v22 }
  0x32   : > { %1676 = vmatpush3.bf16.msra.mxu1 %v1728_v23  ;;  %1653 = vmatprep.subr.bf16.mxu0 %v1733_v27 }
  0x33   : > { %1677 = vmatprep.subr.bf16.mxu1 %v1734_v28 }
  0x34   : > { %1622 = vmatmul.mubr.bf16.gmra.mxu0 %v1731_v26 }
  0x35   : > { %1646 = vmatmul.mubr.bf16.gmra.mxu1 %v1732_v29  ;;  %1654 = vmatpush3.bf16.msra.mxu0 %v1733_v27 }
  0x36   : > { %1678 = vmatpush3.bf16.msra.mxu1 %v1734_v28  ;;  %1655 = vmatprep.subr.bf16.mxu0 %v1735_v30 }
  0x37   : > { %1679 = vmatprep.subr.bf16.mxu1 %v1736_v31  ;;  %1665 = vmatprep.mubr.bf16.mxu0 %v1745_v32 }
  0x38   : > { %1689 = vmatprep.mubr.bf16.mxu1 %v1746_v33 }
  0x39   : > { %1656 = vmatpush3.bf16.msra.mxu0 %v1735_v30 }
  0x3a   : > { %1680 = vmatpush3.bf16.msra.mxu1 %v1736_v31  ;;  %1657 = vmatprep.subr.bf16.mxu0 %v1737_v34 }
  0x3b   : > { %1681 = vmatprep.subr.bf16.mxu1 %v1738_v35 }
  0x3d   : > { %1658 = vmatpush3.bf16.msra.mxu0 %v1737_v34 }
  0x3e   : > { %1682 = vmatpush3.bf16.msra.mxu1 %v1738_v35  ;;  %1659 = vmatprep.subr.bf16.mxu0 %v1739_v36 }
  0x3f   : > { %1683 = vmatprep.subr.bf16.mxu1 %v1740_v37 }
  0x41   : > { %1660 = vmatpush3.bf16.msra.mxu0 %v1739_v36 }
  0x42   : > { %1684 = vmatpush3.bf16.msra.mxu1 %v1740_v37  ;;  %1661 = vmatprep.subr.bf16.mxu0 %v1741_v38 }
  0x43   : > { %1685 = vmatprep.subr.bf16.mxu1 %v1742_v39 }
  0x45   : > { %1662 = vmatpush3.bf16.msra.mxu0 %v1741_v38 }
  0x46   : > { %1686 = vmatpush3.bf16.msra.mxu1 %v1742_v39  ;;  %1663 = vmatprep.subr.bf16.mxu0 %v1743_v40 }
  0x47   : > { %1687 = vmatprep.subr.bf16.mxu1 %v1744_v41 }
  0x49   : > { %1664 = vmatpush3.bf16.msra.mxu0 %v1743_v40 }
  0x4a   : > { %1688 = vmatpush3.bf16.msra.mxu1 %v1744_v41 }
  0x4c   : > { %1666 = vmatmul.mubr.bf16.vlgmr.msra.gmra.mxu0 %v1747_v42 }
  0x4d   : > { %1690 = vmatmul.mubr.bf16.vlgmr.msra.gmra.mxu1 %v1748_v43  ;;  %1669 = vmatprep.mubr.bf16.mxu0 %v1749_v44 }
  0x4e   : > { %1693 = vmatprep.mubr.bf16.mxu1 %v1750_v45 }
  0x54   : > { %1670 = vmatmul.mubr.bf16.gmra.mxu0 %v1751_v46 }
  0x55   : > { %1694 = vmatmul.mubr.bf16.gmra.mxu1 %v1752_v47 }
  0xec   : > { %v1619_v48 = vpop.f32.mrf.mxu0 }
  0xed   : > { %v1643_v50 = vpop.f32.mrf.mxu1  ;;  %v389_v53 = vadd.f32 %v1619_v48, %v1924_v49 }
  0xee   : > { %v380_v51 = vpop.f32.mrf.mxu0  ;;  %v626_v54 = vadd.f32 %v1643_v50, %v1924_v49 }
  0xef   : > { %v617_v52 = vpop.f32.mrf.mxu1  ;;  %v381_v56 = vadd.f32 %v1924_v49, %v380_v51  ;;  %v467_v1 = vmul.f32 %v389_v53, %v389_v53 }
  0xf0   : > { %v1620_v55 = vpop.f32.mrf.mxu0  ;;  %v618_v59 = vadd.f32 %v1924_v49, %v617_v52  ;;  %v705_v15 = vmul.f32 %v626_v54, %v626_v54 }
  0xf1   : > { %v392_v57 = vadd.f32 %v1620_v55, %v1924_v49  ;;  %v1644_v58 = vpop.f32.mrf.mxu1  ;;  %v465_v5 = vmul.f32 %v381_v56, %v381_v56 }
  0xf2   : > { %v629_v60 = vadd.f32 %v1644_v58, %v1924_v49  ;;  %v383_v61 = vpop.f32.mrf.mxu0  ;;  %v703_v10 = vmul.f32 %v618_v59, %v618_v59 }
  0xf3   : > { %v1466_v62 = vpack.c.bf16 %v392_v57, %v389_v53  ;;  %v384_v63 = vadd.f32 %v1924_v49, %v383_v61  ;;  %v620_v0 = vpop.f32.mrf.mxu1  ;;  %v468_v20 = vmul.f32 %v392_v57, %v392_v57 }
  0xf4   : > { %v1486_v2 = vpack.c.bf16 %v629_v60, %v626_v54  ;;  %v621_v3 = vadd.f32 %v1924_v49, %v620_v0  ;;  %v1623_v4 = vpop.f32.mrf.mxu0  ;;  %v706_v39 = vmul.f32 %v629_v60, %v629_v60 }
  0xf5   : > { %1538 = vst [vmem:[%s1936_s26 + $0x8] sm:$0xff] %v1466_v62   ;;  %v1461_v6 = vpack.c.bf16 %v384_v63, %v381_v56  ;;  %v451_v7 = vadd.f32 %v384_v63, %v381_v56  ;;  %v466_v8 = vmul.f32 %v384_v63, %v384_v63  ;;  %v1647_v9 = vpop.f32.mrf.mxu1  ;;  %v405_v23 = vadd.f32 %v1623_v4, %v1924_v49 }
  0xf6   : > { %1542 = vst [vmem:[%s1936_s26 + $0x28] sm:$0xff] %v1486_v2   ;;  %v1481_v11 = vpack.c.bf16 %v621_v3, %v618_v59  ;;  %v689_v12 = vadd.f32 %v621_v3, %v618_v59  ;;  %v704_v13 = vmul.f32 %v621_v3, %v621_v3  ;;  %v396_v14 = vpop.f32.mrf.mxu0  ;;  %v642_v26 = vadd.f32 %v1647_v9, %v1924_v49 }
  0xf7   : > { %1462 = vst [vmem:[%s1936_s26] sm:$0xff] %v1461_v6   ;;  %v452_v16 = vadd.f32 %v451_v7, %v389_v53  ;;  %v473_v17 = vadd.f32 %v466_v8, %v465_v5  ;;  %v397_v18 = vadd.f32 %v1924_v49, %v396_v14  ;;  %v633_v19 = vpop.f32.mrf.mxu1 }
  0xf8   : > { %1541 = vst [vmem:[%s1936_s26 + $0x20] sm:$0xff] %v1481_v11   ;;  %v690_v21 = vadd.f32 %v689_v12, %v626_v54  ;;  %v711_v22 = vadd.f32 %v704_v13, %v703_v10  ;;  %v1624_v24 = vpop.f32.mrf.mxu0  ;;  %v634_v27 = vadd.f32 %v1924_v49, %v633_v19  ;;  %v471_v54 = vmul.f32 %v405_v23, %v405_v23 }
  0xf9   : > { %v474_v25 = vadd.f32 %v473_v17, %v467_v1  ;;  %v408_v28 = vadd.f32 %v1624_v24, %v1924_v49  ;;  %v1648_v29 = vpop.f32.mrf.mxu1  ;;  %v453_v31 = vadd.f32 %v452_v16, %v392_v57  ;;  %v469_v35 = vmul.f32 %v397_v18, %v397_v18 }
  0xfa   : > { %v712_v30 = vadd.f32 %v711_v22, %v705_v15  ;;  %v691_v32 = vadd.f32 %v690_v21, %v629_v60  ;;  %v645_v33 = vadd.f32 %v1648_v29, %v1924_v49  ;;  %v399_v34 = vpop.f32.mrf.mxu0  ;;  %v707_v45 = vmul.f32 %v634_v27, %v634_v27 }
  0xfb   : > { %v475_v36 = vadd.f32 %v474_v25, %v468_v20  ;;  %v1476_v37 = vpack.c.bf16 %v408_v28, %v405_v23  ;;  %v636_v38 = vpop.f32.mrf.mxu1  ;;  %v400_v41 = vadd.f32 %v1924_v49, %v399_v34  ;;  %v454_v43 = vadd.f32 %v453_v31, %v397_v18 }
  0xfc   : > { %v1496_v40 = vpack.c.bf16 %v645_v33, %v642_v26  ;;  %v637_v42 = vadd.f32 %v1924_v49, %v636_v38  ;;  %v692_v44 = vadd.f32 %v691_v32, %v634_v27  ;;  %v713_v46 = vadd.f32 %v712_v30, %v706_v39 }
  0xfd   : > { %1540 = vst [vmem:[%s1936_s26 + $0x18] sm:$0xff] %v1476_v37   ;;  %v476_v47 = vadd.f32 %v475_v36, %v469_v35  ;;  %v1471_v48 = vpack.c.bf16 %v400_v41, %v397_v18  ;;  %v470_v50 = vmul.f32 %v400_v41, %v400_v41  ;;  %v455_v52 = vadd.f32 %v454_v43, %v400_v41 }
  0xfe   : > { %1544 = vst [vmem:[%s1936_s26 + $0x38] sm:$0xff] %v1496_v40   ;;  %v1491_v51 = vpack.c.bf16 %v637_v42, %v634_v27  ;;  %v693_v53 = vadd.f32 %v692_v44, %v637_v42  ;;  %v714_v55 = vadd.f32 %v713_v46, %v707_v45  ;;  %v708_v57 = vmul.f32 %v637_v42, %v637_v42 }
  0xff   : > { %1539 = vst [vmem:[%s1936_s26 + $0x10] sm:$0xff] %v1471_v48   ;;  %v477_v56 = vadd.f32 %v476_v47, %v470_v50  ;;  %v456_v58 = vadd.f32 %v455_v52, %v405_v23  ;;  %v709_v60 = vmul.f32 %v642_v26, %v642_v26  ;;  %v472_v61 = vmul.f32 %v408_v28, %v408_v28 }
 0x100   : > { %1543 = vst [vmem:[%s1936_s26 + $0x30] sm:$0xff] %v1491_v51   ;;  %v694_v59 = vadd.f32 %v693_v53, %v642_v26  ;;  %v715_v63 = vadd.f32 %v714_v55, %v708_v57  ;;  %v710_v2 = vmul.f32 %v645_v33, %v645_v33 }
 0x101   : > { %v478_v62 = vadd.f32 %v477_v56, %v471_v54  ;;  %v457_v0 = vadd.f32 %v456_v58, %v408_v28 }
 0x102   : > { %v695_v1 = vadd.f32 %v694_v59, %v645_v33  ;;  %v716_v4 = vadd.f32 %v715_v63, %v709_v60 }
 0x103   : > { %v479_v3 = vadd.f32 %v478_v62, %v472_v61  ;;  %v458_v7 = vrot.slane %v457_v0, 4 }
 0x104   : > { %v696_v8 = vrot.slane %v695_v1, 4  ;;  %v1957_v11 = vadd.f32 %v716_v4, %v710_v2 }
 0x105   : > { %v480_v10 = vrot.slane %v479_v3, 4  ;;  %v1963_v19 = vadd.f32 %v458_v7, %v457_v0 }
 0x106   : > { %v1965_v20 = vadd.f32 %v696_v8, %v695_v1  ;;  %v718_v25 = vrot.slane %v1957_v11, 4 }
 0x107   : > { %v1969_v24 = vadd.f32 %v480_v10, %v479_v3 }
 0x108   : > { %v719_v10 = vadd.f32 %v718_v25, %v1957_v11 }
 0x109   : > { %v482_v11 = vrot.slane %v1969_v24, 2 }
 0x10c   : > { %v1667_v5 = vpop.f32.mrf.mxu0 }
 0x10d   : > { %v1691_v6 = vpop.f32.mrf.mxu1  ;;  %v864_v13 = vadd.f32 %v1667_v5, %v1924_v49 }
 0x10e   : > { %v855_v9 = vpop.f32.mrf.mxu0  ;;  %v1102_v14 = vadd.f32 %v1691_v6, %v1924_v49 }
 0x10f   : > { %v1093_v12 = vpop.f32.mrf.mxu1  ;;  %v856_v16 = vadd.f32 %v1924_v49, %v855_v9  ;;  %v943_v29 = vmul.f32 %v864_v13, %v864_v13 }
 0x110   : > { %v1668_v15 = vpop.f32.mrf.mxu0  ;;  %v1094_v21 = vadd.f32 %v1924_v49, %v1093_v12  ;;  %v1181_v30 = vmul.f32 %v1102_v14, %v1102_v14 }
 0x111   : > { %v867_v17 = vadd.f32 %v1668_v15, %v1924_v49  ;;  %v1692_v18 = vpop.f32.mrf.mxu1  ;;  %v941_v34 = vmul.f32 %v856_v16, %v856_v16  ;;  %v460_v15 = vrot.slane %v1963_v19, 2 }
 0x112   : > { %v1105_v22 = vadd.f32 %v1692_v18, %v1924_v49  ;;  %v858_v23 = vpop.f32.mrf.mxu0  ;;  %v1179_v39 = vmul.f32 %v1094_v21, %v1094_v21 }
 0x113   : > { %v1506_v26 = vpack.c.bf16 %v867_v17, %v864_v13  ;;  %v859_v27 = vadd.f32 %v1924_v49, %v858_v23  ;;  %v1096_v28 = vpop.f32.mrf.mxu1  ;;  %v944_v44 = vmul.f32 %v867_v17, %v867_v17 }
 0x114   : > { %v1526_v31 = vpack.c.bf16 %v1105_v22, %v1102_v14  ;;  %v1097_v32 = vadd.f32 %v1924_v49, %v1096_v28  ;;  %v1671_v33 = vpop.f32.mrf.mxu0  ;;  %v1182_v50 = vmul.f32 %v1105_v22, %v1105_v22 }
 0x115   : > { %1546 = vst [vmem:[%s1936_s26 + $0x48] sm:$0xff] %v1506_v26   ;;  %v1501_v35 = vpack.c.bf16 %v859_v27, %v856_v16  ;;  %v927_v36 = vadd.f32 %v859_v27, %v856_v16  ;;  %v942_v37 = vmul.f32 %v859_v27, %v859_v27  ;;  %v1695_v38 = vpop.f32.mrf.mxu1  ;;  %v880_v56 = vadd.f32 %v1671_v33, %v1924_v49 }
 0x116   : > { %1550 = vst [vmem:[%s1936_s26 + $0x68] sm:$0xff] %v1526_v31   ;;  %v1521_v40 = vpack.c.bf16 %v1097_v32, %v1094_v21  ;;  %v1165_v41 = vadd.f32 %v1097_v32, %v1094_v21  ;;  %v1180_v42 = vmul.f32 %v1097_v32, %v1097_v32  ;;  %v871_v43 = vpop.f32.mrf.mxu0  ;;  %v1118_v61 = vadd.f32 %v1695_v38, %v1924_v49 }
 0x117   : > { %1545 = vst [vmem:[%s1936_s26 + $0x40] sm:$0xff] %v1501_v35   ;;  %v928_v45 = vadd.f32 %v927_v36, %v864_v13  ;;  %v949_v46 = vadd.f32 %v942_v37, %v941_v34  ;;  %v872_v47 = vadd.f32 %v1924_v49, %v871_v43  ;;  %v1109_v48 = vpop.f32.mrf.mxu1  ;;  %v698_v16 = vrot.slane %v1965_v20, 2 }
 0x118   : > { %1549 = vst [vmem:[%s1936_s26 + $0x60] sm:$0xff] %v1521_v40   ;;  %v1166_v51 = vadd.f32 %v1165_v41, %v1102_v14  ;;  %v1187_v52 = vadd.f32 %v1180_v42, %v1179_v39  ;;  %v1110_v53 = vadd.f32 %v1924_v49, %v1109_v48  ;;  %v1672_v54 = vpop.f32.mrf.mxu0  ;;  %v720_v27 = vrot.slane %v719_v10, 2 }
 0x119   : > { %v950_v55 = vadd.f32 %v949_v46, %v943_v29  ;;  %v929_v57 = vadd.f32 %v928_v45, %v867_v17  ;;  %v883_v58 = vadd.f32 %v1672_v54, %v1924_v49  ;;  %v1696_v59 = vpop.f32.mrf.mxu1  ;;  %v945_v2 = vmul.f32 %v872_v47, %v872_v47 }
 0x11a   : > { %v1188_v60 = vadd.f32 %v1187_v52, %v1181_v30  ;;  %v1167_v62 = vadd.f32 %v1166_v51, %v1105_v22  ;;  %v1121_v63 = vadd.f32 %v1696_v59, %v1924_v49  ;;  %v874_v0 = vpop.f32.mrf.mxu0  ;;  %v1183_v7 = vmul.f32 %v1110_v53, %v1110_v53 }
 0x11b   : > { %v930_v1 = vadd.f32 %v929_v57, %v872_v47  ;;  %v951_v3 = vadd.f32 %v950_v55, %v944_v44  ;;  %v1516_v4 = vpack.c.bf16 %v883_v58, %v880_v56  ;;  %v1112_v5 = vpop.f32.mrf.mxu1  ;;  %v875_v13 = vadd.f32 %v1924_v49, %v874_v0 }
 0x11c   : > { %v1168_v6 = vadd.f32 %v1167_v62, %v1110_v53  ;;  %v1189_v8 = vadd.f32 %v1188_v60, %v1182_v50  ;;  %v1536_v9 = vpack.c.bf16 %v1121_v63, %v1118_v61  ;;  %v1113_v14 = vadd.f32 %v1924_v49, %v1112_v5 }
 0x11d   : > { %v952_v12 = vadd.f32 %v951_v3, %v945_v2  ;;  %1548 = vst [vmem:[%s1936_s26 + $0x58] sm:$0xff] %v1516_v4   ;;  %v1511_v18 = vpack.c.bf16 %v875_v13, %v872_v47  ;;  %v931_v21 = vadd.f32 %v930_v1, %v875_v13  ;;  %v946_v22 = vmul.f32 %v875_v13, %v875_v13 }
 0x11e   : > { %v1190_v17 = vadd.f32 %v1189_v8, %v1183_v7  ;;  %1552 = vst [vmem:[%s1936_s26 + $0x78] sm:$0xff] %v1536_v9   ;;  %v1531_v23 = vpack.c.bf16 %v1113_v14, %v1110_v53  ;;  %v1169_v25 = vadd.f32 %v1168_v6, %v1113_v14  ;;  %v1184_v26 = vmul.f32 %v1113_v14, %v1113_v14 }
 0x11f   : > { %v947_v28 = vmul.f32 %v880_v56, %v880_v56  ;;  %1547 = vst [vmem:[%s1936_s26 + $0x50] sm:$0xff] %v1511_v18   ;;  %v932_v29 = vadd.f32 %v931_v21, %v880_v56  ;;  %v953_v49 = vadd.f32 %v952_v12, %v946_v22  ;;  %v461_v30 = vadd.f32 %v460_v15, %v1963_v19 }
 0x120   : > { %1551 = vst [vmem:[%s1936_s26 + $0x70] sm:$0xff] %v1531_v23   ;;  %v1185_v31 = vmul.f32 %v1118_v61, %v1118_v61  ;;  %v1170_v32 = vadd.f32 %v1169_v25, %v1118_v61  ;;  %v1191_v33 = vadd.f32 %v1190_v17, %v1184_v26  ;;  %v699_v34 = vadd.f32 %v698_v16, %v1965_v20 }
 0x121   : > { %v948_v35 = vmul.f32 %v883_v58, %v883_v58  ;;  %v933_v36 = vadd.f32 %v932_v29, %v883_v58  ;;  %v954_v37 = vadd.f32 %v953_v49, %v947_v28  ;;  %v1186_v38 = vmul.f32 %v1121_v63, %v1121_v63 }
 0x122   : > { %v1171_v39 = vadd.f32 %v1170_v32, %v1121_v63  ;;  %v1192_v40 = vadd.f32 %v1191_v33, %v1185_v31  ;;  %v483_v41 = vadd.f32 %v482_v11, %v1969_v24  ;;  %v721_v42 = vadd.f32 %v720_v27, %v719_v10 }
 0x123   : > { %v934_v43 = vrot.slane %v933_v36, 4  ;;  %v955_v44 = vadd.f32 %v954_v37, %v948_v35  ;;  %v462_v47 = vrot.slane %v461_v30, 1  ;;  %v700_v19 = vrot.slane %v699_v34, 1 }
 0x124   : > { %v1172_v45 = vrot.slane %v1171_v39, 4  ;;  %v1193_v46 = vadd.f32 %v1192_v40, %v1186_v38  ;;  %v484_v20 = vrot.slane %v483_v41, 1  ;;  %v722_v53 = vrot.slane %v721_v42, 1 }
 0x125   : > { %v935_v48 = vadd.f32 %v934_v43, %v933_v36  ;;  %v956_v50 = vrot.slane %v955_v44, 4  ;;  %v463_v58 = vadd.f32 %v462_v47, %v461_v30  ;;  %v701_v59 = vadd.f32 %v700_v19, %v699_v34 }
 0x126   : > { %v1173_v51 = vadd.f32 %v1172_v45, %v1171_v39  ;;  %v1194_v52 = vrot.slane %v1193_v46, 4  ;;  %v485_v63 = vadd.f32 %v484_v20, %v483_v41  ;;  %v723_v0 = vadd.f32 %v722_v53, %v721_v42 }
 0x127   : > { %v936_v54 = vrot.slane %v935_v48, 2  ;;  %v957_v55 = vadd.f32 %v956_v50, %v955_v44  ;;  %v702_v5 = vadd.f32 %v701_v59, %v463_v58 }
 0x128   : > { %v1174_v56 = vrot.slane %v1173_v51, 2  ;;  %v1195_v57 = vadd.f32 %v1194_v52, %v1193_v46  ;;  %v724_v9 = vadd.f32 %v723_v0, %v485_v63 }
 0x129   : > { %v937_v24 = vadd.f32 %v936_v54, %v935_v48  ;;  %v958_v60 = vrot.slane %v957_v55, 2 }
 0x12a   : > { %v1175_v61 = vadd.f32 %v1174_v56, %v1173_v51  ;;  %v1196_v62 = vrot.slane %v1195_v57, 2 }
 0x12b   : > { %v938_v1 = vrot.slane %v937_v24, 1  ;;  %v959_v2 = vadd.f32 %v958_v60, %v957_v55 }
 0x12c   : > { %v1176_v3 = vrot.slane %v1175_v61, 1  ;;  %v1197_v4 = vadd.f32 %v1196_v62, %v1195_v57 }
 0x12d   : > { %v939_v6 = vadd.f32 %v938_v1, %v937_v24  ;;  %v960_v7 = vrot.slane %v959_v2, 1 }
 0x12e   : > { %v1198_v8 = vrot.slane %v1197_v4, 1  ;;  %v1177_v13 = vadd.f32 %v1176_v3, %v1175_v61 }
 0x12f   : > { %v940_v10 = vadd.f32 %v939_v6, %v702_v5  ;;  %v961_v12 = vadd.f32 %v960_v7, %v959_v2 }
 0x130   : > { %v1199_v16 = vadd.f32 %v1198_v8, %v1197_v4 }
 0x131   : > { %v962_v14 = vadd.f32 %v961_v12, %v724_v9  ;;  %v1178_v15 = vadd.f32 %v1177_v13, %v940_v10 }
 0x133   : > { %v1200_v17 = vadd.f32 %v1199_v16, %v962_v14  ;;  %1201 = vst [vmem:[%s238_s28] sm:$0x1] %v1178_v15 }
 0x135   : > { %1202 = vst [vmem:[%s241_s6] sm:$0x1] %v1200_v17 }
 0x136 PF: > { %s16_s18 = sadd.s32 1, %s1759_s18  }
 0x137   : > { %p13_p4 = scmp.ge.s32.totalorder %s16_s18, 4  }
 0x139   :  { %15 = sbr.rel (!%p13_p4) target bundleno = 1 (0x1), region = 89 }

// kernel: conv_block_forward.3
= control target key start
LH: loop header
LB: loop body
LE: loop exit
PB: predicated region body
PF: predicated region fallthrough
CT: control target
= control target key end

     0   :  { %s8872_s24 = smov 0   ;;  %s10615_s0 = inlined_call_operand.vmem [shape: bf16[2,16,16,128], index: 0, kind: input, shape index: {}]   ;;  %s10616_s1 = inlined_call_operand.vmem [shape: f32[1,128], index: 1, kind: input, shape index: {}]   ;;  %s10617_s2 = inlined_call_operand.vmem [shape: f32[1,128], index: 2, kind: input, shape index: {}]   ;;  %s10618_s3 = inlined_call_operand.vmem [shape: bf16[3,384,128], index: 3, kind: input, shape index: {}]   ;;  %s10619_s4 = inlined_call_operand.vmem [shape: f32[1,128], index: 4, kind: input, shape index: {}]   ;;  %s10620_s5 = inlined_call_operand.vmem [shape: bf16[2,16,16,128], index: 5, kind: output, shape index: {0}]   ;;  %s10621_s6 = inlined_call_operand.vmem [shape: f32[2,1,128], index: 6, kind: output, shape index: {1}]   ;;  %s10622_s7 = inlined_call_operand.vmem [shape: f32[2,1,128], index: 7, kind: output, shape index: {2}]  }
   0x1 LB: > { %s6400_s25 = sadd.s32 4294967295, %s8829_s24   ;;  %p6404_p0 = scmp.ge.s32.totalorder %s8829_s24, 1  ;;  %s8829_s24 = sphi %s8872_s24, %s18_s24  }
   0x2   : > { %p242_p1 = scmp.lt.s32.totalorder %s8829_s24, 3 }
   0x4   : > { %p243_p2 = pnand %p6404_p0, %p242_p1 }
   0x6   : > { %246 = sbr.rel (%p243_p2) target bundleno = 644 (0x284), region = 40 }
   0xb   : > { %v8479_v0 = vld [vmem:[%s10618_s3 + $0x78] sm:$0xff]   ;;  %v8831_v2 = vmov 0   ;;  %v8482_v5 = vld [vmem:[%s10618_s3 + $0x70] sm:$0xff]   ;;  %v8485_v8 = vld [vmem:[%s10618_s3 + $0x68] sm:$0xff]   ;;  %p280_p3 = scmp.lt.s32.totalorder %s6400_s25, 1  ;;  %vm682_vm1 = vcmask 1047552  }
   0xc   : > { %v8480_v1 = vld [vmem:[%s10618_s3 + $0x38] sm:$0xff]   ;;  %701 = vst [vmem:[#allocation2] sm:$0xff] %v8831_v2  ;;  %v6477_v3 = vcombine.high %v8831_v2, %v8831_v2  ;;  %702 = vst [vmem:[#allocation2 + $0x8] sm:$0xf] %v8831_v2  ;;  %7558 = vmatprep.subr.bf16.mxu0 %v8479_v0  ;;  %v8483_v6 = vld [vmem:[%s10618_s3 + $0x30] sm:$0xff]   ;;  %v6476_v33 = vcombine.low %v8831_v2, %v8831_v2  ;;  %vm615_vm2 = vcmask 1040384  }
   0xd   : > { %704 = vst [vmem:[#allocation2 + $0x14] sm:$0xf] %v8831_v2  ;;  %707 = vst [vmem:[#allocation2 + $0x1a0] sm:$0xf] %v8831_v2  ;;  %v8481_v4 = vld [vmem:[%s10618_s3 + $0xb8] sm:$0xff]   ;;  %7559 = vmatpush3.bf16.msra.mxu0 %v8480_v1  ;;  %v8484_v7 = vld [vmem:[%s10618_s3 + $0xb0] sm:$0xff]  }
   0xe   : > { %709 = vst [vmem:[#allocation2 + $0x1ac] sm:$0xf] %v8831_v2  ;;  %1358 = vmatprep.mubr.bf16.mxu0 %v6477_v3  ;;  %8182 = vmatprep.subr.bf16.mxu1 %v8481_v4  ;;  %v8486_v9 = vld [vmem:[%s10618_s3 + $0x28] sm:$0xff]   ;;  %v8488_v11 = vld [vmem:[%s10618_s3 + $0x60] sm:$0xff]   ;;  %v8491_v14 = vld [vmem:[%s10618_s3 + $0x58] sm:$0xff]   ;;  %s10636_s25 = smov (!%p280_p3, %s6400_s25), 1 }
   0xf   : > { %8183 = vmatpush3.bf16.msra.mxu1 %v8481_v4  ;;  %7560 = vmatprep.subr.bf16.mxu0 %v8482_v5  ;;  %v8487_v10 = vld [vmem:[%s10618_s3 + $0xa8] sm:$0xff]   ;;  %v8489_v12 = vld [vmem:[%s10618_s3 + $0x20] sm:$0xff]   ;;  %v8493_v15 = vld [vmem:[%s10618_s3 + $0x98] sm:$0xff]   ;;  %s7350_s20 = sshll.u32 %s10636_s25, 7  ;;  %vm683_vm0 = vsmask.f32 7424  ;;  %s292_s9 = scalar_lea.vmem %s10621_s6, %s10636_s25 }
  0x10   : > { %8184 = vmatprep.subr.bf16.mxu1 %v8484_v7  ;;  %v8490_v13 = vld [vmem:[%s10618_s3 + $0xa0] sm:$0xff]   ;;  %v8492_v16 = vld [vmem:[%s10618_s3 + $0x18] sm:$0xff]   ;;  %v8494_v17 = vld [vmem:[%s10618_s3 + $0x50] sm:$0xff]   ;;  %s8965_s8 = scalar_lea.vmem %s10615_s0, %s7350_s20  ;;  %vm616_vm3 = vsmask.f32 256  ;;  %s10097_s10 = scalar_lea.vmem %s10620_s5, %s7350_s20 }
  0x11   : > { %7561 = vmatpush3.bf16.msra.mxu0 %v8483_v6  ;;  %v8496_v18 = vld [vmem:[%s10618_s3 + $0x90] sm:$0xff]   ;;  %v8497_v20 = vld [vmem:[%s10618_s3 + $0x48] sm:$0xff]   ;;  %v8500_v23 = vld [vmem:[%s10618_s3 + $0x40] sm:$0xff]  }
  0x12   : > { %7562 = vmatprep.subr.bf16.mxu0 %v8485_v8  ;;  %v8495_v19 = vld [vmem:[%s10618_s3 + $0x10] sm:$0xff]   ;;  %v8499_v21 = vld [vmem:[%s10618_s3 + $0x88] sm:$0xff]   ;;  %v8502_v25 = vld [vmem:[%s10618_s3 + $0x80] sm:$0xff]  }
  0x13   : > { %8185 = vmatpush3.bf16.msra.mxu1 %v8484_v7  ;;  %v8498_v22 = vld [vmem:[%s10618_s3 + $0x8] sm:$0xff]   ;;  %v8501_v26 = vld [vmem:[%s10618_s3] sm:$0xff]   ;;  %v8503_v29 = vld [vmem:[%s10618_s3 + $0x138] sm:$0xff]  }
  0x14   : > { %8186 = vmatprep.subr.bf16.mxu1 %v8487_v10  ;;  %v8504_v24 = vld [vmem:[#allocation2 + $0x8] ss:$12 sps:$4 sm:$0xff]   ;;  %v7385_v27 = vld [vmem:[%s8965_s8] sm:$0xff]   ;;  %v8994_v36 = vld [vmem:[%s10618_s3 + $0x178] sm:$0xff]  }
  0x15   : > { %7563 = vmatpush3.bf16.msra.mxu0 %v8486_v9  ;;  %8198 = vmatprep.mubr.bf16.mxu1 %v8504_v24  ;;  %v8977_v28 = vld [vmem:[%s10616_s1] ss:$0 sm:$0xff]  ;;  %v7386_v30 = vunpack.c.l.bf16 %v7385_v27  ;;  %v7387_v31 = vunpack.c.h.bf16 %v7385_v27  ;;  %v8505_v37 = vld [vmem:[%s10618_s3 + $0xf8] sm:$0xff]   ;;  %v8508_v40 = vld [vmem:[%s10618_s3 + $0x130] sm:$0xff]  }
  0x16   : > { %7564 = vmatprep.subr.bf16.mxu0 %v8488_v11  ;;  %v8985_v32 = vld [vmem:[%s10617_s2] ss:$0 sm:$0xff]  ;;  %v8509_v43 = vld [vmem:[%s10618_s3 + $0xf0] sm:$0xff]   ;;  %v8511_v45 = vld [vmem:[%s10618_s3 + $0x128] sm:$0xff]  }
  0x17   : > { %8187 = vmatpush3.bf16.msra.mxu1 %v8487_v10  ;;  %v368_v34 = vmul.f32 %v7386_v30, %v8977_v28  ;;  %v369_v35 = vmul.f32 %v7387_v31, %v8977_v28  ;;  %vm9016_vm4 = vmand %vm682_vm1, %vm683_vm0  ;;  %v8512_v49 = vld [vmem:[%s10618_s3 + $0xe8] sm:$0xff]   ;;  %v8514_v54 = vld [vmem:[%s10618_s3 + $0x120] sm:$0xff]  }
  0x18   : > { %8188 = vmatprep.subr.bf16.mxu1 %v8490_v13  ;;  %v7528_v50 = vld [vmem:[%s8965_s8 + $0x8] sm:$0xff]   ;;  %vm9024_vm5 = vmand %vm615_vm2, %vm616_vm3  ;;  %v7529_v57 = vld [vmem:[%s8965_s8 + $0x10] sm:$0xff]  }
  0x19   : > { %7565 = vmatpush3.bf16.msra.mxu0 %v8489_v12  ;;  %v407_v38 = vadd.f32 %v8985_v32, %v368_v34  ;;  %v408_v39 = vadd.f32 %v8985_v32, %v369_v35  ;;  %v7390_v55 = vunpack.c.l.bf16 %v7528_v50  ;;  %v7391_v56 = vunpack.c.h.bf16 %v7528_v50  ;;  %v8515_v60 = vld [vmem:[%s10618_s3 + $0xe0] sm:$0xff]   ;;  %v8517_v63 = vld [vmem:[%s10618_s3 + $0x118] sm:$0xff]   ;;  %v8777_v48 = vld [vmem:[%s10618_s3 + $0x108] sm:$0xff]  }
  0x1a   : > { %7566 = vmatprep.subr.bf16.mxu0 %v8491_v14  ;;  %v7394_v0 = vunpack.c.l.bf16 %v7529_v57  ;;  %v7395_v1 = vunpack.c.h.bf16 %v7529_v57  ;;  %v8519_v10 = vld [vmem:[%s10618_s3 + $0xd8] sm:$0xff]   ;;  %v8524_v57 = vld [vmem:[%s10618_s3 + $0x150] sm:$0xff]  }
  0x1b   : > { %8189 = vmatpush3.bf16.msra.mxu1 %v8490_v13  ;;  %v439_v41 = vmax.f32 %v407_v38, 0.0  ;;  %v440_v42 = vmax.f32 %v408_v39, 0.0  ;;  %v370_v61 = vmul.f32 %v7390_v55, %v8977_v28  ;;  %v371_v62 = vmul.f32 %v7391_v56, %v8977_v28  ;;  %v8528_v38 = vld [vmem:[%s10618_s3 + $0x100] sm:$0xff]   ;;  %v8521_v55 = vld [vmem:[%s10618_s3 + $0x158] sm:$0xff]  }
  0x1c   : > { %8190 = vmatprep.subr.bf16.mxu1 %v8493_v15  ;;  %v372_v11 = vmul.f32 %v7394_v0, %v8977_v28  ;;  %v373_v12 = vmul.f32 %v7395_v1, %v8977_v28 }
  0x1d   : > { %7567 = vmatpush3.bf16.msra.mxu0 %v8492_v16  ;;  %v9008_v44 = vpack.c.bf16 %v440_v42, %v439_v41  ;;  %v409_v4 = vadd.f32 %v8985_v32, %v370_v61  ;;  %v410_v5 = vadd.f32 %v8985_v32, %v371_v62  ;;  %v8522_v16 = vld [vmem:[%s10618_s3 + $0x110] sm:$0xff]   ;;  %v8513_v41 = vld [vmem:[%s10618_s3 + $0x168] sm:$0xff]  }
  0x1e   : > { %7568 = vmatprep.subr.bf16.mxu0 %v8494_v17  ;;  %v411_v14 = vadd.f32 %v8985_v32, %v372_v11 }
  0x1f   : > { %8191 = vmatpush3.bf16.msra.mxu1 %v8493_v15  ;;  %v488_v46 = vshrl.u32 %v9008_v44, 16  ;;  %v491_v47 = vshll.u32 %v9008_v44, 16  ;;  %v441_v8 = vmax.f32 %v409_v4, 0.0  ;;  %v442_v9 = vmax.f32 %v410_v5, 0.0 }
  0x20   : > { %8192 = vmatprep.subr.bf16.mxu1 %v8496_v18  ;;  %v412_v15 = vadd.f32 %v8985_v32, %v373_v12  ;;  %v8540_v12 = vld [vmem:[%s10618_s3 + $0x1a8] sm:$0xff]  }
  0x21   : > { %7569 = vmatpush3.bf16.msra.mxu0 %v8495_v19  ;;  %v634_v51 = vrot.slane %v491_v47, 1  ;;  %v490_v52 = vrot.slane %v488_v46, 7  ;;  %v9053_v13 = vpack.c.bf16 %v442_v9, %v441_v8  ;;  %v443_v19 = vmax.f32 %v411_v14, 0.0  ;;  %v8542_v14 = vld [vmem:[%s10618_s3 + $0x1e0] sm:$0xff]  }
  0x22   : > { %7570 = vmatprep.subr.bf16.mxu0 %v8497_v20  ;;  %v444_v20 = vmax.f32 %v412_v15, 0.0 }
  0x23   : > { %8193 = vmatpush3.bf16.msra.mxu1 %v8496_v18  ;;  %v635_v58 = vor.u32 %v634_v51, %v488_v46  ;;  %v493_v59 = vor.u32 %v491_v47, %v490_v52  ;;  %v495_v17 = vshrl.u32 %v9053_v13, 16  ;;  %v498_v18 = vshll.u32 %v9053_v13, 16 }
  0x24   : > { %8194 = vmatprep.subr.bf16.mxu1 %v8499_v21 }
  0x25   : > { %7571 = vmatpush3.bf16.msra.mxu0 %v8498_v22  ;;  %v685_v2 = vsel %vm9016_vm4, %v635_v58, 0  ;;  %v9044_v3 = vsel %vm9024_vm5, 0, %v493_v59  ;;  %v8510_v22 = vld [vmem:[%s10618_s3 + $0x170] sm:$0xff]   ;;  %v636_v24 = vrot.slane %v498_v18, 1  ;;  %v7530_v59 = vld [vmem:[%s8965_s8 + $0x18] sm:$0xff]  }
  0x26   : > { %7572 = vmatprep.subr.bf16.mxu0 %v8500_v23  ;;  %v6412_v6 = vcombine.low %v685_v2, %v685_v2  ;;  %v6414_v7 = vcombine.high %v685_v2, %v685_v2  ;;  %v497_v23 = vrot.slane %v495_v17, 7  ;;  %v7398_v61 = vunpack.c.l.bf16 %v7530_v59  ;;  %v8536_v2 = vld [vmem:[%s10618_s3 + $0x1f0] sm:$0xff]  }
  0x27   : > { %8195 = vmatpush3.bf16.msra.mxu1 %v8499_v21  ;;  %v8523_v21 = vld [vmem:[%s10618_s3 + $0xd0] sm:$0xff]   ;;  %v637_v30 = vor.u32 %v636_v24, %v495_v17  ;;  %v7399_v62 = vunpack.c.h.bf16 %v7530_v59  ;;  %v8543_v24 = vld [vmem:[%s10618_s3 + $0x1a0] sm:$0xff]  }
  0x28   : > { %8196 = vmatprep.subr.bf16.mxu1 %v8502_v25  ;;  %984 = vst [vmem:[#allocation2 + $0x20] sm:$0xf] %v6412_v6  ;;  %986 = vst [vmem:[#allocation2 + $0x2c] sm:$0xf] %v6414_v7  ;;  %v374_v0 = vmul.f32 %v7398_v61, %v8977_v28  ;;  %v8530_v6 = vld [vmem:[%s10618_s3 + $0x140] sm:$0xff]   ;;  %v8537_v7 = vld [vmem:[%s10618_s3 + $0x1b0] sm:$0xff]  }
  0x29   : > { %7573 = vmatpush3.bf16.msra.mxu0 %v8501_v26  ;;  %v8525_v26 = vld [vmem:[%s10618_s3 + $0x108] sm:$0xff]   ;;  %v686_v35 = vsel %vm9016_vm4, %v637_v30, 0  ;;  %v375_v1 = vmul.f32 %v7399_v62, %v8977_v28  ;;  %v8558_v62 = vld [vmem:[%s10618_s3 + $0x200] sm:$0xff]  }
  0x2a   : > { %7610 = vmatprep.subr.bf16.mxu0 %v8503_v29  ;;  %v500_v29 = vor.u32 %v498_v18, %v497_v23  ;;  %v6416_v39 = vcombine.low %v686_v35, %v686_v35  ;;  %v413_v4 = vadd.f32 %v8985_v32, %v374_v0  ;;  %v8538_v18 = vld [vmem:[%s10618_s3 + $0x230] sm:$0xff]   ;;  %v8567_v0 = vld [vmem:[%s10618_s3 + $0x68] sm:$0xff]  }
  0x2b   : > { %8197 = vmatpush3.bf16.msra.mxu1 %v8502_v25  ;;  %v9070_v25 = vpack.c.bf16 %v444_v20, %v443_v19  ;;  %v414_v5 = vadd.f32 %v8985_v32, %v375_v1 }
  0x2c   : > { %1359 = vmatmul.mubr.bf16.vlgmr.msra.gmra.mxu0 %v6476_v33  ;;  %8206 = vmatprep.subr.bf16.mxu1 %v8994_v36  ;;  %v8526_v33 = vld [vmem:[%s10618_s3 + $0xc8] sm:$0xff]   ;;  %v9081_v34 = vsel %vm9024_vm5, 0, %v500_v29  ;;  %988 = vst [vmem:[#allocation2 + $0x38] sm:$0xf] %v6416_v39  ;;  %v445_v8 = vmax.f32 %v413_v4, 0.0  ;;  %v8551_v39 = vld [vmem:[%s10618_s3 + $0x190] sm:$0xff]  }
  0x2d   : > { %7611 = vmatpush3.bf16.msra.mxu0 %v8505_v37  ;;  %1366 = vmatprep.mubr.bf16.mxu0 %v9008_v44  ;;  %v505_v31 = vshll.u32 %v9070_v25, 16  ;;  %v502_v37 = vshrl.u32 %v9070_v25, 16  ;;  %v446_v9 = vmax.f32 %v414_v5, 0.0 }
  0x2e   : > { %7612 = vmatprep.subr.bf16.mxu0 %v8508_v40  ;;  %v6418_v40 = vcombine.high %v686_v35, %v686_v35  ;;  %v8547_v35 = vld [vmem:[%s10618_s3 + $0x198] sm:$0xff]  }
  0x2f   : > { %v8506_v27 = vld [vmem:[#allocation2 + $0x20] ss:$12 sps:$4 sm:$0xff]   ;;  %v638_v42 = vrot.slane %v505_v31, 1  ;;  %v9144_v11 = vpack.c.bf16 %v446_v9, %v445_v8 }
  0x30   : > { %8199 = vmatmul.mubr.bf16.vlgmr.msra.gmra.mxu1 %v8506_v27  ;;  %990 = vst [vmem:[#allocation2 + $0x44] sm:$0xf] %v6418_v40  ;;  %v8532_v58 = vld [vmem:[#allocation2 + $0x20] ss:$12 sps:$4 sm:$0xff]   ;;  %v8549_v40 = vld [vmem:[%s10618_s3 + $0x218] sm:$0xff]  }
  0x31   : > { %7613 = vmatpush3.bf16.msra.mxu0 %v8509_v43  ;;  %8207 = vmatpush3.bf16.msra.mxu1 %v8994_v36  ;;  %v504_v43 = vrot.slane %v502_v37, 7  ;;  %v639_v46 = vor.u32 %v638_v42, %v502_v37  ;;  %v8531_v36 = vld [vmem:[%s10618_s3 + $0x1f8] sm:$0xff]   ;;  %v509_v15 = vshrl.u32 %v9144_v11, 16  ;;  %v8550_v37 = vld [vmem:[%s10618_s3 + $0x1d0] sm:$0xff]  }
  0x32   : > { %7614 = vmatprep.subr.bf16.mxu0 %v8511_v45  ;;  %8208 = vmatprep.subr.bf16.mxu1 %v8510_v22  ;;  %v8529_v45 = vld [vmem:[%s10618_s3 + $0xc0] sm:$0xff]  }
  0x33   : > { %v507_v47 = vor.u32 %v505_v31, %v504_v43  ;;  %v687_v50 = vsel %vm9016_vm4, %v639_v46, 0  ;;  %v511_v20 = vrot.slane %v509_v15, 7  ;;  %v8556_v46 = vld [vmem:[%s10618_s3 + $0x1c0] sm:$0xff]  }
  0x34   : > { %1367 = vmatmul.mubr.bf16.gmra.mxu0 %v9044_v3  ;;  %v6420_v52 = vcombine.low %v687_v50, %v687_v50 }
  0x35   : > { %7615 = vmatpush3.bf16.msra.mxu0 %v8512_v49  ;;  %8209 = vmatpush3.bf16.msra.mxu1 %v8510_v22  ;;  %v8516_v49 = vld [vmem:[%s10618_s3 + $0x160] sm:$0xff]   ;;  %v9108_v51 = vsel %vm9024_vm5, 0, %v507_v47 }
  0x36   : > { %7616 = vmatprep.subr.bf16.mxu0 %v8514_v54  ;;  %1374 = vmatprep.mubr.bf16.mxu0 %v9053_v13  ;;  %v6422_v54 = vcombine.high %v687_v50, %v687_v50  ;;  %992 = vst [vmem:[#allocation2 + $0x50] sm:$0xf] %v6420_v52  ;;  %v7531_v47 = vld [vmem:[%s8965_s8 + $0x20] sm:$0xff]  }
  0x37   : > { %8210 = vmatprep.subr.bf16.mxu1 %v8513_v41  ;;  %v8518_v56 = vld [vmem:[#allocation2 + $0x38] ss:$12 sps:$4 sm:$0xff]   ;;  %v7403_v50 = vunpack.c.h.bf16 %v7531_v47 }
  0x38   : > { %994 = vst [vmem:[#allocation2 + $0x5c] sm:$0xf] %v6422_v54  ;;  %8202 = vmatprep.mubr.bf16.mxu1 %v8518_v56  ;;  %v8534_v17 = vld [vmem:[#allocation2 + $0x38] ss:$12 sps:$4 sm:$0xff]  }
  0x39   : > { %7617 = vmatpush3.bf16.msra.mxu0 %v8515_v60  ;;  %8211 = vmatpush3.bf16.msra.mxu1 %v8513_v41  ;;  %v8553_v41 = vld [vmem:[%s10618_s3 + $0x1c8] sm:$0xff]   ;;  %v8560_v42 = vld [vmem:[#allocation2 + $0x38] ss:$12 sps:$4 sm:$0xff]   ;;  %v377_v56 = vmul.f32 %v7403_v50, %v8977_v28 }
  0x3a   : > { %7618 = vmatprep.subr.bf16.mxu0 %v8517_v63  ;;  %8212 = vmatprep.subr.bf16.mxu1 %v8516_v49  ;;  %v8527_v63 = vld [vmem:[%s10618_s3 + $0x148] sm:$0xff]   ;;  %v8557_v52 = vld [vmem:[%s10618_s3 + $0x180] sm:$0xff]   ;;  %v8559_v54 = vld [vmem:[%s10618_s3 + $0x78] sm:$0xff]  }
  0x3b   : > { %v416_v59 = vadd.f32 %v8985_v32, %v377_v56 }
  0x3c   : > { %1375 = vmatmul.mubr.bf16.gmra.mxu0 %v9081_v34 }
  0x3d   : > { %7619 = vmatpush3.bf16.msra.mxu0 %v8519_v10  ;;  %1382 = vmatprep.mubr.bf16.mxu0 %v9070_v25  ;;  %v8539_v10 = vld [vmem:[%s10618_s3 + $0x1e8] sm:$0xff]   ;;  %v448_v61 = vmax.f32 %v416_v59, 0.0 }
  0x3e   : > { %7620 = vmatprep.subr.bf16.mxu0 %v8522_v16  ;;  %8213 = vmatpush3.bf16.msra.mxu1 %v8516_v49  ;;  %v512_v16 = vshll.u32 %v9144_v11, 16  ;;  %v7402_v49 = vunpack.c.l.bf16 %v7531_v47 }
  0x3f   : > { %8214 = vmatprep.subr.bf16.mxu1 %v8521_v55  ;;  %v8520_v60 = vld [vmem:[#allocation2 + $0x50] ss:$12 sps:$4 sm:$0xff]  }
  0x40   : > { %8203 = vmatmul.mubr.bf16.gmra.mxu1 %v8520_v60  ;;  %v640_v19 = vrot.slane %v512_v16, 1  ;;  %v514_v23 = vor.u32 %v512_v16, %v511_v20  ;;  %v8564_v60 = vld [vmem:[%s10618_s3 + $0x70] sm:$0xff]  }
  0x41   : > { %7621 = vmatpush3.bf16.msra.mxu0 %v8523_v21  ;;  %8222 = vmatprep.mubr.bf16.mxu1 %v8532_v58  ;;  %v8546_v21 = vld [vmem:[#allocation2 + $0x50] ss:$12 sps:$4 sm:$0xff]  }
  0x42   : > { %7622 = vmatprep.subr.bf16.mxu0 %v8525_v26  ;;  %8215 = vmatpush3.bf16.msra.mxu1 %v8521_v55  ;;  %v641_v22 = vor.u32 %v640_v19, %v509_v15  ;;  %v8545_v26 = vld [vmem:[%s10618_s3 + $0x1d8] sm:$0xff]   ;;  %v9172_v29 = vsel %vm9024_vm5, 0, %v514_v23  ;;  %v376_v55 = vmul.f32 %v7402_v49, %v8977_v28  ;;  %v8572_v19 = vld [vmem:[%s10618_s3 + $0xa0] sm:$0xff]   ;;  %v8578_v20 = vld [vmem:[%s10618_s3 + $0x50] sm:$0xff]  }
  0x43   : > { %8216 = vmatprep.subr.bf16.mxu1 %v8524_v57  ;;  %v8561_v58 = vld [vmem:[%s10618_s3 + $0x38] sm:$0xff]   ;;  %v8581_v23 = vld [vmem:[%s10618_s3 + $0x48] sm:$0xff]  }
  0x44   : > { %1383 = vmatmul.mubr.bf16.gmra.mxu0 %v9108_v51  ;;  %v688_v27 = vsel %vm9016_vm4, %v641_v22, 0  ;;  %v7532_v22 = vld [vmem:[%s8965_s8 + $0x28] sm:$0xff]  }
  0x45   : > { %7623 = vmatpush3.bf16.msra.mxu0 %v8526_v33  ;;  %1769 = vmatprep.mubr.bf16.mxu0 %v9008_v44  ;;  %v8533_v44 = vld [vmem:[%s10618_s3 + $0x1b8] sm:$0xff]   ;;  %v6424_v30 = vcombine.low %v688_v27, %v688_v27  ;;  %v6426_v31 = vcombine.high %v688_v27, %v688_v27  ;;  %v8541_v33 = vld [vmem:[%s10618_s3 + $0x228] sm:$0xff]  }
  0x46   : > { %7624 = vmatprep.subr.bf16.mxu0 %v8528_v38  ;;  %8217 = vmatpush3.bf16.msra.mxu1 %v8524_v57  ;;  %v8544_v38 = vld [vmem:[%s10618_s3 + $0x220] sm:$0xff]   ;;  %v8555_v57 = vld [vmem:[%s10618_s3 + $0x208] sm:$0xff]  }
  0x47   : > { %8218 = vmatprep.subr.bf16.mxu1 %v8527_v63  ;;  %996 = vst [vmem:[#allocation2 + $0x68] sm:$0xf] %v6424_v30  ;;  %998 = vst [vmem:[#allocation2 + $0x74] sm:$0xf] %v6426_v31  ;;  %v9293_v31 = vld [vmem:[%s10616_s1] ss:$0 sm:$0xff] }
  0x49   : > { %7625 = vmatpush3.bf16.msra.mxu0 %v8529_v45  ;;  %v8554_v45 = vld [vmem:[%s10618_s3 + $0x188] sm:$0xff]  }
  0x4a   : > { %7662 = vmatprep.subr.bf16.mxu0 %v8531_v36  ;;  %8219 = vmatpush3.bf16.msra.mxu1 %v8527_v63  ;;  %v8552_v36 = vld [vmem:[%s10618_s3 + $0x210] sm:$0xff]  }
  0x4b   : > { %8220 = vmatprep.subr.bf16.mxu1 %v8530_v6 }
  0x4c   : > { %1770 = vmatmul.mubr.bf16.vlgmr.msra.gmra.mxu0 %v9044_v3  ;;  %v8535_v3 = vld [vmem:[%s10618_s3 + $0x238] sm:$0xff]  }
  0x4d   : > { %7663 = vmatpush3.bf16.msra.mxu0 %v8533_v44  ;;  %1777 = vmatprep.mubr.bf16.mxu0 %v9053_v13 }
  0x4e   : > { %7664 = vmatprep.subr.bf16.mxu0 %v8536_v2  ;;  %8221 = vmatpush3.bf16.msra.mxu1 %v8530_v6  ;;  %v8548_v43 = vld [vmem:[#allocation2 + $0x68] ss:$12 sps:$4 sm:$0xff]   ;;  %v8563_v2 = vld [vmem:[%s10618_s3 + $0xb8] sm:$0xff]   ;;  %v8570_v6 = vld [vmem:[%s10618_s3 + $0x60] sm:$0xff]  }
  0x4f   : > { %8230 = vmatprep.subr.bf16.mxu1 %v8535_v3  ;;  %v8574_v9 = vld [vmem:[#allocation2 + $0x68] ss:$12 sps:$4 sm:$0xff]  }
  0x50   : > { %v8588_v27 = vld [vmem:[#allocation2 + $0x68] ss:$12 sps:$4 sm:$0xff]  }
  0x51   : > { %7665 = vmatpush3.bf16.msra.mxu0 %v8537_v7  ;;  %8223 = vmatmul.mubr.bf16.vlgmr.msra.gmra.mxu1 %v8534_v17  ;;  %v8569_v17 = vld [vmem:[%s10618_s3 + $0xa8] sm:$0xff]  }
  0x52   : > { %7666 = vmatprep.subr.bf16.mxu0 %v8539_v10  ;;  %8231 = vmatpush3.bf16.msra.mxu1 %v8535_v3  ;;  %v8566_v10 = vld [vmem:[%s10618_s3 + $0xb0] sm:$0xff]   ;;  %v8571_v3 = vld [vmem:[%s10618_s3 + $0x20] sm:$0xff]  }
  0x53   : > { %8226 = vmatprep.mubr.bf16.mxu1 %v8546_v21  ;;  %8232 = vmatprep.subr.bf16.mxu1 %v8538_v18  ;;  %v8579_v21 = vld [vmem:[%s10618_s3 + $0x10] sm:$0xff]  }
  0x54   : > { %1778 = vmatmul.mubr.bf16.gmra.mxu0 %v9081_v34 }
  0x55   : > { %7667 = vmatpush3.bf16.msra.mxu0 %v8540_v12  ;;  %1785 = vmatprep.mubr.bf16.mxu0 %v9070_v25 }
  0x56   : > { %7668 = vmatprep.subr.bf16.mxu0 %v8542_v14  ;;  %8233 = vmatpush3.bf16.msra.mxu1 %v8538_v18  ;;  %v8575_v18 = vld [vmem:[%s10618_s3 + $0x18] sm:$0xff]  }
  0x57   : > { %8234 = vmatprep.subr.bf16.mxu1 %v8541_v33 }
  0x59   : > { %7669 = vmatpush3.bf16.msra.mxu0 %v8543_v24  ;;  %8227 = vmatmul.mubr.bf16.gmra.mxu1 %v8548_v43  ;;  %v7406_v24 = vunpack.c.l.bf16 %v7532_v22 }
  0x5a   : > { %7670 = vmatprep.subr.bf16.mxu0 %v8545_v26  ;;  %8235 = vmatpush3.bf16.msra.mxu1 %v8541_v33  ;;  %v7407_v26 = vunpack.c.h.bf16 %v7532_v22 }
  0x5b   : > { %8236 = vmatprep.subr.bf16.mxu1 %v8544_v38  ;;  %8246 = vmatprep.mubr.bf16.mxu1 %v8560_v42  ;;  %v378_v33 = vmul.f32 %v9293_v31, %v7406_v24  ;;  %v8582_v42 = vld [vmem:[%s10618_s3 + $0x8] sm:$0xff]   ;;  %v8599_v24 = vld [vmem:[%s10618_s3 + $0xe0] sm:$0xff]  }
  0x5c   : > { %1786 = vmatmul.mubr.bf16.gmra.mxu0 %v9108_v51 }
  0x5d   : > { %7671 = vmatpush3.bf16.msra.mxu0 %v8547_v35  ;;  %1793 = vmatprep.mubr.bf16.mxu0 %v9144_v11  ;;  %v379_v35 = vmul.f32 %v9293_v31, %v7407_v26  ;;  %v8601_v26 = vld [vmem:[%s10618_s3 + $0x118] sm:$0xff]  }
  0x5e   : > { %7672 = vmatprep.subr.bf16.mxu0 %v8550_v37  ;;  %8237 = vmatpush3.bf16.msra.mxu1 %v8544_v38  ;;  %v8577_v37 = vld [vmem:[%s10618_s3 + $0x98] sm:$0xff]   ;;  %v9303_v38 = vld [vmem:[%s10617_s2] ss:$0 sm:$0xff] }
  0x5f   : > { %8238 = vmatprep.subr.bf16.mxu1 %v8549_v40 }
  0x61   : > { %7673 = vmatpush3.bf16.msra.mxu0 %v8551_v39  ;;  %v417_v39 = vadd.f32 %v9303_v38, %v378_v33  ;;  %v8603_v33 = vld [vmem:[%s10618_s3 + $0xd8] sm:$0xff]  }
  0x62   : > { %7674 = vmatprep.subr.bf16.mxu0 %v8553_v41  ;;  %8239 = vmatpush3.bf16.msra.mxu1 %v8549_v40  ;;  %v418_v40 = vadd.f32 %v9303_v38, %v379_v35  ;;  %v7533_v41 = vld [vmem:[%s8965_s8 + $0x30] sm:$0xff]  }
  0x63   : > { %8240 = vmatprep.subr.bf16.mxu1 %v8552_v36  ;;  %v7410_v43 = vunpack.c.l.bf16 %v7533_v41  ;;  %v449_v47 = vmax.f32 %v417_v39, 0.0  ;;  %v8606_v35 = vld [vmem:[%s10618_s3 + $0x110] sm:$0xff]  }
  0x64   : > { %1794 = vmatmul.mubr.bf16.gmra.mxu0 %v9172_v29 }
  0x65   : > { %7675 = vmatpush3.bf16.msra.mxu0 %v8554_v45  ;;  %2181 = vmatprep.mubr.bf16.mxu0 %v9053_v13  ;;  %v415_v13 = vadd.f32 %v8985_v32, %v376_v55  ;;  %v8565_v32 = vld [vmem:[%s10618_s3 + $0x30] sm:$0xff]   ;;  %v7411_v45 = vunpack.c.h.bf16 %v7533_v41  ;;  %v380_v49 = vmul.f32 %v9293_v31, %v7410_v43  ;;  %v8585_v55 = vld [vmem:[%s10618_s3] sm:$0xff]   ;;  %v7534_v43 = vld [vmem:[%s8965_s8 + $0x38] sm:$0xff]  }
  0x66   : > { %7676 = vmatprep.subr.bf16.mxu0 %v8556_v46  ;;  %8241 = vmatpush3.bf16.msra.mxu1 %v8552_v36  ;;  %v8584_v46 = vld [vmem:[%s10618_s3 + $0x40] sm:$0xff]   ;;  %v450_v36 = vmax.f32 %v418_v40, 0.0  ;;  %v8607_v41 = vld [vmem:[%s10618_s3 + $0xd0] sm:$0xff]  }
  0x67   : > { %v447_v28 = vmax.f32 %v415_v13, 0.0  ;;  %8242 = vmatprep.subr.bf16.mxu1 %v8555_v57  ;;  %v381_v50 = vmul.f32 %v9293_v31, %v7411_v45  ;;  %v419_v56 = vadd.f32 %v9303_v38, %v380_v49  ;;  %v7414_v45 = vunpack.c.l.bf16 %v7534_v43 }
  0x69   : > { %7677 = vmatpush3.bf16.msra.mxu0 %v8557_v52  ;;  %v9232_v63 = vpack.c.bf16 %v448_v61, %v447_v28  ;;  %v8580_v52 = vld [vmem:[%s10618_s3 + $0x90] sm:$0xff]   ;;  %v8589_v61 = vld [vmem:[%s10618_s3 + $0xf8] sm:$0xff]   ;;  %v382_v49 = vmul.f32 %v9293_v31, %v7414_v45 }
  0x6a   : > { %7714 = vmatprep.subr.bf16.mxu0 %v8559_v54  ;;  %8243 = vmatpush3.bf16.msra.mxu1 %v8555_v57  ;;  %v9320_v54 = vpack.c.bf16 %v450_v36, %v449_v47  ;;  %v420_v57 = vadd.f32 %v9303_v38, %v381_v50  ;;  %v8605_v47 = vld [vmem:[%s10618_s3 + $0x158] sm:$0xff]   ;;  %v8610_v36 = vld [vmem:[%s10618_s3 + $0xc8] sm:$0xff]  }
  0x6b   : > { %v516_v1 = vshrl.u32 %v9232_v63, 16  ;;  %v519_v44 = vshll.u32 %v9232_v63, 16  ;;  %8244 = vmatprep.subr.bf16.mxu1 %v8558_v62  ;;  %v8633_v45 = vld [vmem:[%s10618_s3 + $0x218] sm:$0xff]  }
  0x6c   : > { %2182 = vmatmul.mubr.bf16.vlgmr.msra.gmra.mxu0 %v9081_v34  ;;  %v8562_v34 = vld [vmem:[#allocation2 + $0x50] ss:$12 sps:$4 sm:$0xff]   ;;  %v523_v13 = vshrl.u32 %v9320_v54, 16  ;;  %v526_v59 = vshll.u32 %v9320_v54, 16  ;;  %v452_v28 = vmax.f32 %v420_v57, 0.0 }
  0x6d   : > { %7715 = vmatpush3.bf16.msra.mxu0 %v8561_v58  ;;  %2189 = vmatprep.mubr.bf16.mxu0 %v9070_v25  ;;  %v642_v4 = vrot.slane %v519_v44, 1  ;;  %v518_v5 = vrot.slane %v516_v1, 7  ;;  %v8568_v25 = vld [vmem:[%s10618_s3 + $0x28] sm:$0xff]   ;;  %v8587_v58 = vld [vmem:[%s10618_s3 + $0x138] sm:$0xff]   ;;  %v8608_v57 = vld [vmem:[%s10618_s3 + $0x150] sm:$0xff]  }
  0x6e   : > { %7716 = vmatprep.subr.bf16.mxu0 %v8564_v60  ;;  %8245 = vmatpush3.bf16.msra.mxu1 %v8558_v62  ;;  %v451_v60 = vmax.f32 %v419_v56, 0.0  ;;  %v525_v62 = vrot.slane %v523_v13, 7 }
  0x6f   : > { %v643_v7 = vor.u32 %v642_v4, %v516_v1  ;;  %v521_v8 = vor.u32 %v519_v44, %v518_v5  ;;  %8254 = vmatprep.subr.bf16.mxu1 %v8563_v2  ;;  %v8592_v1 = vld [vmem:[%s10618_s3 + $0x130] sm:$0xff]  }
  0x70   : > { %v528_v44 = vor.u32 %v526_v59, %v525_v62 }
  0x71   : > { %7717 = vmatpush3.bf16.msra.mxu0 %v8565_v32  ;;  %v689_v12 = vsel %vm9016_vm4, %v643_v7, 0  ;;  %v9263_v14 = vsel %vm9024_vm5, 0, %v521_v8  ;;  %8247 = vmatmul.mubr.bf16.vlgmr.msra.gmra.mxu1 %v8562_v34  ;;  %v644_v32 = vrot.slane %v526_v59, 1  ;;  %v8593_v7 = vld [vmem:[%s10618_s3 + $0xf0] sm:$0xff]  }
  0x72   : > { %7718 = vmatprep.subr.bf16.mxu0 %v8567_v0  ;;  %v6428_v15 = vcombine.low %v689_v12, %v689_v12  ;;  %v6430_v16 = vcombine.high %v689_v12, %v689_v12  ;;  %8255 = vmatpush3.bf16.msra.mxu1 %v8563_v2  ;;  %v9339_v0 = vpack.c.bf16 %v452_v28, %v451_v60  ;;  %v8586_v2 = vld [vmem:[%s10618_s3 + $0x80] sm:$0xff]  }
  0x73   : > { %8250 = vmatprep.mubr.bf16.mxu1 %v8574_v9  ;;  %8256 = vmatprep.subr.bf16.mxu1 %v8566_v10  ;;  %v645_v34 = vor.u32 %v644_v32, %v523_v13  ;;  %v8615_v13 = vld [vmem:[%s10618_s3 + $0x1f8] sm:$0xff]   ;;  %v8620_v32 = vld [vmem:[%s10618_s3 + $0x1f0] sm:$0xff]  }
  0x74   : > { %2190 = vmatmul.mubr.bf16.gmra.mxu0 %v9108_v51  ;;  %v8573_v51 = vld [vmem:[%s10618_s3 + $0x58] sm:$0xff]   ;;  %1000 = vst [vmem:[#allocation2 + $0x80] sm:$0xf] %v6428_v15  ;;  %1002 = vst [vmem:[#allocation2 + $0x8c] sm:$0xf] %v6430_v16  ;;  %v530_v4 = vshrl.u32 %v9339_v0, 16 }
  0x75   : > { %7719 = vmatpush3.bf16.msra.mxu0 %v8568_v25  ;;  %2197 = vmatprep.mubr.bf16.mxu0 %v9144_v11  ;;  %v533_v5 = vshll.u32 %v9339_v0, 16  ;;  %v9352_v25 = vsel %vm9024_vm5, 0, %v528_v44 }
  0x76   : > { %7720 = vmatprep.subr.bf16.mxu0 %v8570_v6  ;;  %8257 = vmatpush3.bf16.msra.mxu1 %v8566_v10  ;;  %v690_v6 = vsel %vm9016_vm4, %v645_v34, 0  ;;  %v8595_v10 = vld [vmem:[%s10618_s3 + $0x128] sm:$0xff]   ;;  %v532_v12 = vrot.slane %v530_v4, 7  ;;  %v8614_v34 = vld [vmem:[%s10618_s3 + $0x140] sm:$0xff]  }
  0x77   : > { %8258 = vmatprep.subr.bf16.mxu1 %v8569_v17  ;;  %v6432_v8 = vcombine.low %v690_v6, %v690_v6  ;;  %v646_v9 = vrot.slane %v533_v5, 1 }
  0x79   : > { %7721 = vmatpush3.bf16.msra.mxu0 %v8571_v3  ;;  %v6434_v3 = vcombine.high %v690_v6, %v690_v6  ;;  %1004 = vst [vmem:[#allocation2 + $0x98] sm:$0xf] %v6432_v8  ;;  %v647_v15 = vor.u32 %v646_v9, %v530_v4  ;;  %v8623_v6 = vld [vmem:[%s10618_s3 + $0x1e8] sm:$0xff]  }
  0x7a   : > { %7722 = vmatprep.subr.bf16.mxu0 %v8573_v51  ;;  %8259 = vmatpush3.bf16.msra.mxu1 %v8569_v17  ;;  %v535_v51 = vor.u32 %v533_v5, %v532_v12  ;;  %v8596_v17 = vld [vmem:[%s10618_s3 + $0xe8] sm:$0xff]  }
  0x7b   : > { %v8576_v30 = vld [vmem:[#allocation2 + $0x80] ss:$12 sps:$4 sm:$0xff]   ;;  %8260 = vmatprep.subr.bf16.mxu1 %v8572_v19  ;;  %1006 = vst [vmem:[#allocation2 + $0xa4] sm:$0xf] %v6434_v3 }
  0x7c   : > { %2198 = vmatmul.mubr.bf16.gmra.mxu0 %v9172_v29  ;;  %8251 = vmatmul.mubr.bf16.gmra.mxu1 %v8576_v30  ;;  %v8590_v16 = vld [vmem:[#allocation2 + $0x80] ss:$12 sps:$4 sm:$0xff]   ;;  %v9376_v22 = vsel %vm9024_vm5, 0, %v535_v51 }
  0x7d   : > { %7723 = vmatpush3.bf16.msra.mxu0 %v8575_v18  ;;  %2205 = vmatprep.mubr.bf16.mxu0 %v9232_v63  ;;  %v691_v18 = vsel %vm9016_vm4, %v647_v15, 0  ;;  %v8597_v30 = vld [vmem:[%s10618_s3 + $0x168] sm:$0xff]   ;;  %v8626_v3 = vld [vmem:[%s10618_s3 + $0x1e0] sm:$0xff]  }
  0x7e   : > { %7724 = vmatprep.subr.bf16.mxu0 %v8578_v20  ;;  %8270 = vmatprep.mubr.bf16.mxu1 %v8588_v27  ;;  %v6436_v20 = vcombine.low %v691_v18, %v691_v18  ;;  %v8616_v39 = vld [vmem:[#allocation2 + $0x80] ss:$12 sps:$4 sm:$0xff]  }
  0x7f   : > { %8261 = vmatpush3.bf16.msra.mxu1 %v8572_v19  ;;  %v8598_v19 = vld [vmem:[%s10618_s3 + $0x120] sm:$0xff]  }
  0x80   : > { %8262 = vmatprep.subr.bf16.mxu1 %v8577_v37  ;;  %1008 = vst [vmem:[#allocation2 + $0xb0] sm:$0xf] %v6436_v20  ;;  %v8627_v51 = vld [vmem:[%s10618_s3 + $0x1a0] sm:$0xff]  }
  0x81   : > { %7725 = vmatpush3.bf16.msra.mxu0 %v8579_v21  ;;  %v6438_v21 = vcombine.high %v691_v18, %v691_v18  ;;  %v8625_v18 = vld [vmem:[%s10618_s3 + $0x228] sm:$0xff]   ;;  %v7535_v20 = vld [vmem:[%s8965_s8 + $0x40] sm:$0xff]  }
  0x82   : > { %7726 = vmatprep.subr.bf16.mxu0 %v8581_v23  ;;  %v8594_v23 = vld [vmem:[%s10618_s3 + $0x170] sm:$0xff]   ;;  %v8602_v27 = vld [vmem:[#allocation2 + $0x98] ss:$12 sps:$4 sm:$0xff]  }
  0x83   : > { %8263 = vmatpush3.bf16.msra.mxu1 %v8577_v37  ;;  %1010 = vst [vmem:[#allocation2 + $0xbc] sm:$0xf] %v6438_v21  ;;  %v8600_v37 = vld [vmem:[%s10618_s3 + $0x160] sm:$0xff]   ;;  %v8634_v21 = vld [vmem:[%s10618_s3 + $0x1d0] sm:$0xff]  }
  0x84   : > { %2206 = vmatmul.mubr.bf16.gmra.mxu0 %v9263_v14  ;;  %8264 = vmatprep.subr.bf16.mxu1 %v8580_v52  ;;  %v8618_v12 = vld [vmem:[#allocation2 + $0x98] ss:$12 sps:$4 sm:$0xff]  }
  0x85   : > { %7727 = vmatpush3.bf16.msra.mxu0 %v8582_v42  ;;  %2668 = vmatprep.mubr.bf16.mxu0 %v9144_v11  ;;  %v8583_v11 = vld [vmem:[%s10618_s3 + $0x88] sm:$0xff]  }
  0x86   : > { %7728 = vmatprep.subr.bf16.mxu0 %v8584_v46  ;;  %v8609_v42 = vld [vmem:[%s10618_s3 + $0x108] sm:$0xff]   ;;  %v7415_v46 = vunpack.c.h.bf16 %v7534_v43 }
  0x87   : > { %8265 = vmatpush3.bf16.msra.mxu1 %v8580_v52  ;;  %v8612_v52 = vld [vmem:[%s10618_s3 + $0x100] sm:$0xff]  }
  0x88   : > { %8266 = vmatprep.subr.bf16.mxu1 %v8583_v11  ;;  %v383_v50 = vmul.f32 %v9293_v31, %v7415_v46  ;;  %v8638_v46 = vld [vmem:[%s10618_s3 + $0x188] sm:$0xff]  }
  0x89   : > { %7729 = vmatpush3.bf16.msra.mxu0 %v8585_v55  ;;  %v421_v55 = vadd.f32 %v9303_v38, %v382_v49  ;;  %v8636_v49 = vld [vmem:[%s10618_s3 + $0x210] sm:$0xff]  }
  0x8a   : > { %7766 = vmatprep.subr.bf16.mxu0 %v8587_v58  ;;  %v8604_v40 = vld [vmem:[#allocation2 + $0xb0] ss:$12 sps:$4 sm:$0xff]   ;;  %v422_v56 = vadd.f32 %v9303_v38, %v383_v50  ;;  %v8613_v58 = vld [vmem:[%s10618_s3 + $0xc0] sm:$0xff]  }
  0x8b   : > { %8267 = vmatpush3.bf16.msra.mxu1 %v8583_v11  ;;  %v453_v59 = vmax.f32 %v421_v55, 0.0  ;;  %v8611_v11 = vld [vmem:[%s10618_s3 + $0x148] sm:$0xff]   ;;  %v8630_v15 = vld [vmem:[#allocation2 + $0xb0] ss:$12 sps:$4 sm:$0xff]   ;;  %v8641_v55 = vld [vmem:[%s10618_s3 + $0x180] sm:$0xff]  }
  0x8c   : > { %2669 = vmatmul.mubr.bf16.vlgmr.msra.gmra.mxu0 %v9172_v29  ;;  %v8591_v29 = vld [vmem:[%s10618_s3 + $0x178] sm:$0xff]   ;;  %8268 = vmatprep.subr.bf16.mxu1 %v8586_v2  ;;  %v454_v60 = vmax.f32 %v422_v56, 0.0 }
  0x8d   : > { %7767 = vmatpush3.bf16.msra.mxu0 %v8589_v61  ;;  %2676 = vmatprep.mubr.bf16.mxu0 %v9232_v63  ;;  %v8643_v56 = vld [vmem:[%s10618_s3 + $0x78] sm:$0xff]  }
  0x8e   : > { %7768 = vmatprep.subr.bf16.mxu0 %v8592_v1  ;;  %v9434_v28 = vpack.c.bf16 %v454_v60, %v453_v59  ;;  %v8639_v60 = vld [vmem:[%s10618_s3 + $0x208] sm:$0xff]  }
  0x8f   : > { %8269 = vmatpush3.bf16.msra.mxu1 %v8586_v2  ;;  %v8621_v2 = vld [vmem:[%s10618_s3 + $0x1b0] sm:$0xff]  }
  0x90   : > { %8278 = vmatprep.subr.bf16.mxu1 %v8591_v29  ;;  %v537_v61 = vshrl.u32 %v9434_v28, 16  ;;  %v540_v62 = vshll.u32 %v9434_v28, 16 }
  0x91   : > { %7769 = vmatpush3.bf16.msra.mxu0 %v8593_v7  ;;  %v8619_v7 = vld [vmem:[%s10618_s3 + $0x238] sm:$0xff]  }
  0x92   : > { %7770 = vmatprep.subr.bf16.mxu0 %v8595_v10  ;;  %8271 = vmatmul.mubr.bf16.vlgmr.msra.gmra.mxu1 %v8590_v16  ;;  %v648_v1 = vrot.slane %v540_v62, 1  ;;  %v539_v44 = vrot.slane %v537_v61, 7  ;;  %v8622_v16 = vld [vmem:[%s10618_s3 + $0x230] sm:$0xff]  }
  0x93   : > { %8279 = vmatpush3.bf16.msra.mxu1 %v8591_v29  ;;  %8274 = vmatprep.mubr.bf16.mxu1 %v8602_v27  ;;  %v8644_v27 = vld [vmem:[#allocation2 + $0x98] ss:$12 sps:$4 sm:$0xff]  }
  0x94   : > { %2677 = vmatmul.mubr.bf16.gmra.mxu0 %v9263_v14  ;;  %8280 = vmatprep.subr.bf16.mxu1 %v8594_v23  ;;  %v649_v4 = vor.u32 %v648_v1, %v537_v61  ;;  %v542_v5 = vor.u32 %v540_v62, %v539_v44  ;;  %v8642_v1 = vld [vmem:[%s10618_s3 + $0x200] sm:$0xff]   ;;  %v8649_v44 = vld [vmem:[%s10618_s3 + $0x30] sm:$0xff]  }
  0x95   : > { %7771 = vmatpush3.bf16.msra.mxu0 %v8596_v17  ;;  %2684 = vmatprep.mubr.bf16.mxu0 %v9320_v54  ;;  %v8629_v17 = vld [vmem:[%s10618_s3 + $0x1d8] sm:$0xff]  }
  0x96   : > { %7772 = vmatprep.subr.bf16.mxu0 %v8598_v19  ;;  %v692_v8 = vsel %vm9016_vm4, %v649_v4, 0  ;;  %v9468_v9 = vsel %vm9024_vm5, 0, %v542_v5  ;;  %v8631_v19 = vld [vmem:[%s10618_s3 + $0x198] sm:$0xff]   ;;  %v8652_v4 = vld [vmem:[%s10618_s3 + $0x28] sm:$0xff]  }
  0x97   : > { %8281 = vmatpush3.bf16.msra.mxu1 %v8594_v23  ;;  %v6440_v29 = vcombine.low %v692_v8, %v692_v8  ;;  %v6442_v10 = vcombine.high %v692_v8, %v692_v8  ;;  %v7418_v23 = vunpack.c.l.bf16 %v7535_v20  ;;  %v7536_v5 = vld [vmem:[%s8965_s8 + $0x48] sm:$0xff]   ;;  %v8650_v8 = vld [vmem:[%s10618_s3 + $0xb0] sm:$0xff]  }
  0x98   : > { %8282 = vmatprep.subr.bf16.mxu1 %v8597_v30 }
  0x99   : > { %7773 = vmatpush3.bf16.msra.mxu0 %v8599_v24  ;;  %1012 = vst [vmem:[#allocation2 + $0xc8] sm:$0xf] %v6440_v29  ;;  %1014 = vst [vmem:[#allocation2 + $0xd4] sm:$0xf] %v6442_v10  ;;  %v7419_v24 = vunpack.c.h.bf16 %v7535_v20  ;;  %v8655_v29 = vld [vmem:[%s10618_s3 + $0x20] sm:$0xff]  }
  0x9a   : > { %7774 = vmatprep.subr.bf16.mxu0 %v8601_v26  ;;  %8275 = vmatmul.mubr.bf16.gmra.mxu1 %v8604_v40 }
  0x9b   : > { %8283 = vmatpush3.bf16.msra.mxu1 %v8597_v30  ;;  %8294 = vmatprep.mubr.bf16.mxu1 %v8616_v39  ;;  %v384_v30 = vmul.f32 %v9293_v31, %v7418_v23 }
  0x9c   : > { %2685 = vmatmul.mubr.bf16.gmra.mxu0 %v9352_v25  ;;  %8284 = vmatprep.subr.bf16.mxu1 %v8600_v37 }
  0x9d   : > { %7775 = vmatpush3.bf16.msra.mxu0 %v8603_v33  ;;  %2692 = vmatprep.mubr.bf16.mxu0 %v9339_v0  ;;  %v385_v33 = vmul.f32 %v9293_v31, %v7419_v24  ;;  %v423_v39 = vadd.f32 %v9303_v38, %v384_v30 }
  0x9e   : > { %7776 = vmatprep.subr.bf16.mxu0 %v8606_v35  ;;  %v8628_v35 = vld [vmem:[%s10618_s3 + $0x220] sm:$0xff]  }
  0x9f   : > { %8285 = vmatpush3.bf16.msra.mxu1 %v8600_v37  ;;  %v8635_v37 = vld [vmem:[%s10618_s3 + $0x190] sm:$0xff]   ;;  %v424_v40 = vadd.f32 %v9303_v38, %v385_v33 }
  0xa0   : > { %8286 = vmatprep.subr.bf16.mxu1 %v8605_v47  ;;  %v8632_v26 = vld [vmem:[#allocation2 + $0xc8] ss:$12 sps:$4 sm:$0xff]  }
  0xa1   : > { %7777 = vmatpush3.bf16.msra.mxu0 %v8607_v41  ;;  %v8637_v41 = vld [vmem:[%s10618_s3 + $0x1c8] sm:$0xff]   ;;  %v456_v43 = vmax.f32 %v424_v40, 0.0 }
  0xa2   : > { %7778 = vmatprep.subr.bf16.mxu0 %v8609_v42  ;;  %v455_v42 = vmax.f32 %v423_v39, 0.0  ;;  %v8672_v30 = vld [vmem:[#allocation2 + $0xc8] ss:$12 sps:$4 sm:$0xff]  }
  0xa3   : > { %8287 = vmatpush3.bf16.msra.mxu1 %v8605_v47  ;;  %v8665_v40 = vld [vmem:[%s10618_s3 + $0x48] sm:$0xff]  }
  0xa4   : > { %2693 = vmatmul.mubr.bf16.gmra.mxu0 %v9376_v22  ;;  %8288 = vmatprep.subr.bf16.mxu1 %v8608_v57  ;;  %v9515_v47 = vpack.c.bf16 %v456_v43, %v455_v42 }
  0xa5   : > { %7779 = vmatpush3.bf16.msra.mxu0 %v8610_v36  ;;  %3079 = vmatprep.mubr.bf16.mxu0 %v9232_v63  ;;  %v8617_v63 = vld [vmem:[%s10618_s3 + $0x1b8] sm:$0xff]   ;;  %v8640_v36 = vld [vmem:[%s10618_s3 + $0x1c0] sm:$0xff]  }
  0xa6   : > { %7780 = vmatprep.subr.bf16.mxu0 %v8612_v52  ;;  %v544_v50 = vshrl.u32 %v9515_v47, 16  ;;  %v547_v52 = vshll.u32 %v9515_v47, 16 }
  0xa7   : > { %8289 = vmatpush3.bf16.msra.mxu1 %v8608_v57 }
  0xa8   : > { %8290 = vmatprep.subr.bf16.mxu1 %v8611_v11  ;;  %v650_v57 = vrot.slane %v547_v52, 1 }
  0xa9   : > { %7781 = vmatpush3.bf16.msra.mxu0 %v8613_v58  ;;  %v546_v58 = vrot.slane %v544_v50, 7 }
  0xaa   : > { %7818 = vmatprep.subr.bf16.mxu0 %v8615_v13  ;;  %v651_v13 = vor.u32 %v650_v57, %v544_v50  ;;  %v8668_v57 = vld [vmem:[%s10618_s3 + $0x40] sm:$0xff]  }
  0xab   : > { %8291 = vmatpush3.bf16.msra.mxu1 %v8611_v11  ;;  %v549_v59 = vor.u32 %v547_v52, %v546_v58  ;;  %v8648_v11 = vld [vmem:[%s10618_s3 + $0x70] sm:$0xff]   ;;  %v8666_v52 = vld [vmem:[%s10618_s3 + $0x8] sm:$0xff]  }
  0xac   : > { %3080 = vmatmul.mubr.bf16.vlgmr.msra.gmra.mxu0 %v9263_v14  ;;  %v8624_v14 = vld [vmem:[%s10618_s3 + $0x1a8] sm:$0xff]   ;;  %8292 = vmatprep.subr.bf16.mxu1 %v8614_v34 }
  0xad   : > { %7819 = vmatpush3.bf16.msra.mxu0 %v8617_v63  ;;  %3087 = vmatprep.mubr.bf16.mxu0 %v9320_v54  ;;  %v693_v63 = vsel %vm9016_vm4, %v651_v13, 0  ;;  %v9546_v61 = vsel %vm9024_vm5, 0, %v549_v59 }
  0xae   : > { %7820 = vmatprep.subr.bf16.mxu0 %v8620_v32  ;;  %v6444_v62 = vcombine.low %v693_v63, %v693_v63  ;;  %v6446_v32 = vcombine.high %v693_v63, %v693_v63  ;;  %v8664_v63 = vld [vmem:[%s10618_s3 + $0x90] sm:$0xff]  }
  0xaf   : > { %8293 = vmatpush3.bf16.msra.mxu1 %v8614_v34  ;;  %v8651_v34 = vld [vmem:[%s10618_s3 + $0x68] sm:$0xff]  }
  0xb0   : > { %8302 = vmatprep.subr.bf16.mxu1 %v8619_v7  ;;  %1016 = vst [vmem:[#allocation2 + $0xe0] sm:$0xf] %v6444_v62  ;;  %1018 = vst [vmem:[#allocation2 + $0xec] sm:$0xf] %v6446_v32  ;;  %v8669_v62 = vld [vmem:[%s10618_s3] sm:$0xff]  }
  0xb1   : > { %7821 = vmatpush3.bf16.msra.mxu0 %v8621_v2  ;;  %v8646_v2 = vld [vmem:[#allocation2 + $0xb0] ss:$12 sps:$4 sm:$0xff]  }
  0xb2   : > { %7822 = vmatprep.subr.bf16.mxu0 %v8623_v6  ;;  %8295 = vmatmul.mubr.bf16.vlgmr.msra.gmra.mxu1 %v8618_v12  ;;  %v8658_v6 = vld [vmem:[#allocation2 + $0xc8] ss:$12 sps:$4 sm:$0xff]  }
  0xb3   : > { %8303 = vmatpush3.bf16.msra.mxu1 %v8619_v7  ;;  %8298 = vmatprep.mubr.bf16.mxu1 %v8630_v15  ;;  %v7422_v7 = vunpack.c.l.bf16 %v7536_v5  ;;  %v8653_v12 = vld [vmem:[%s10618_s3 + $0xa8] sm:$0xff]   ;;  %v8659_v15 = vld [vmem:[%s10618_s3 + $0x18] sm:$0xff]  }
  0xb4   : > { %3088 = vmatmul.mubr.bf16.gmra.mxu0 %v9352_v25  ;;  %8304 = vmatprep.subr.bf16.mxu1 %v8622_v16 }
  0xb5   : > { %7823 = vmatpush3.bf16.msra.mxu0 %v8624_v14  ;;  %3095 = vmatprep.mubr.bf16.mxu0 %v9339_v0  ;;  %v7423_v14 = vunpack.c.h.bf16 %v7536_v5  ;;  %v386_v10 = vmul.f32 %v9293_v31, %v7422_v7 }
  0xb6   : > { %7824 = vmatprep.subr.bf16.mxu0 %v8626_v3 }
  0xb7   : > { %8305 = vmatpush3.bf16.msra.mxu1 %v8622_v16  ;;  %v387_v3 = vmul.f32 %v9293_v31, %v7423_v14  ;;  %v425_v16 = vadd.f32 %v9303_v38, %v386_v10  ;;  %v8673_v14 = vld [vmem:[%s10618_s3 + $0xf8] sm:$0xff]  }
  0xb8   : > { %8306 = vmatprep.subr.bf16.mxu1 %v8625_v18 }
  0xb9   : > { %7825 = vmatpush3.bf16.msra.mxu0 %v8627_v51  ;;  %v426_v51 = vadd.f32 %v9303_v38, %v387_v3  ;;  %v457_v23 = vmax.f32 %v425_v16, 0.0  ;;  %v8676_v3 = vld [vmem:[%s10618_s3 + $0x130] sm:$0xff]   ;;  %v8675_v16 = vld [vmem:[%s10618_s3 + $0x178] sm:$0xff]  }
  0xba   : > { %7826 = vmatprep.subr.bf16.mxu0 %v8629_v17  ;;  %8299 = vmatmul.mubr.bf16.gmra.mxu1 %v8632_v26  ;;  %v7537_v17 = vld [vmem:[%s8965_s8 + $0x50] sm:$0xff]  }
  0xbb   : > { %8307 = vmatpush3.bf16.msra.mxu1 %v8625_v18  ;;  %8318 = vmatprep.mubr.bf16.mxu1 %v8644_v27  ;;  %v8662_v18 = vld [vmem:[%s10618_s3 + $0x50] sm:$0xff]   ;;  %v7427_v20 = vunpack.c.h.bf16 %v7537_v17  ;;  %v458_v24 = vmax.f32 %v426_v51, 0.0 }
  0xbc   : > { %3096 = vmatmul.mubr.bf16.gmra.mxu0 %v9376_v22  ;;  %8308 = vmatprep.subr.bf16.mxu1 %v8628_v35 }
  0xbd   : > { %7827 = vmatpush3.bf16.msra.mxu0 %v8631_v19  ;;  %3103 = vmatprep.mubr.bf16.mxu0 %v9434_v28  ;;  %v7426_v19 = vunpack.c.l.bf16 %v7537_v17  ;;  %v389_v27 = vmul.f32 %v9293_v31, %v7427_v20  ;;  %v9596_v33 = vpack.c.bf16 %v458_v24, %v457_v23  ;;  %v8682_v17 = vld [vmem:[%s10618_s3 + $0x120] sm:$0xff]  }
  0xbe   : > { %7828 = vmatprep.subr.bf16.mxu0 %v8634_v21  ;;  %v8660_v21 = vld [vmem:[#allocation2 + $0xe0] ss:$12 sps:$4 sm:$0xff]  }
  0xbf   : > { %8309 = vmatpush3.bf16.msra.mxu1 %v8628_v35  ;;  %v388_v26 = vmul.f32 %v9293_v31, %v7426_v19  ;;  %v8656_v35 = vld [vmem:[%s10618_s3 + $0xa0] sm:$0xff]   ;;  %v428_v39 = vadd.f32 %v9303_v38, %v389_v27  ;;  %v8663_v31 = vld [vmem:[%s10618_s3 + $0x10] sm:$0xff]   ;;  %v554_v42 = vshll.u32 %v9596_v33, 16  ;;  %v7538_v27 = vld [vmem:[%s8965_s8 + $0x58] sm:$0xff]  }
  0xc0   : > { %8310 = vmatprep.subr.bf16.mxu1 %v8633_v45  ;;  %v8678_v19 = vld [vmem:[%s10618_s3 + $0x170] sm:$0xff]  }
  0xc1   : > { %7829 = vmatpush3.bf16.msra.mxu0 %v8635_v37  ;;  %v427_v37 = vadd.f32 %v9303_v38, %v388_v26  ;;  %v8661_v38 = vld [vmem:[%s10618_s3 + $0x98] sm:$0xff]   ;;  %v8683_v26 = vld [vmem:[%s10618_s3 + $0xe0] sm:$0xff]  }
  0xc2   : > { %7830 = vmatprep.subr.bf16.mxu0 %v8637_v41  ;;  %v551_v41 = vshrl.u32 %v9596_v33, 16 }
  0xc3   : > { %8311 = vmatpush3.bf16.msra.mxu1 %v8633_v45  ;;  %v459_v43 = vmax.f32 %v427_v37, 0.0  ;;  %v460_v45 = vmax.f32 %v428_v39, 0.0  ;;  %v7431_v37 = vunpack.c.h.bf16 %v7538_v27  ;;  %v8681_v39 = vld [vmem:[%s10618_s3 + $0x168] sm:$0xff]  }
  0xc4   : > { %3104 = vmatmul.mubr.bf16.gmra.mxu0 %v9468_v9  ;;  %8312 = vmatprep.subr.bf16.mxu1 %v8636_v49 }
  0xc5   : > { %7831 = vmatpush3.bf16.msra.mxu0 %v8638_v46  ;;  %3490 = vmatprep.mubr.bf16.mxu0 %v9320_v54  ;;  %v8645_v54 = vld [vmem:[%s10618_s3 + $0x38] sm:$0xff]   ;;  %v553_v46 = vrot.slane %v551_v41, 7  ;;  %v9616_v50 = vpack.c.bf16 %v460_v45, %v459_v43  ;;  %v8690_v45 = vld [vmem:[%s10618_s3 + $0x110] sm:$0xff]  }
  0xc6   : > { %7832 = vmatprep.subr.bf16.mxu0 %v8640_v36  ;;  %v652_v36 = vrot.slane %v554_v42, 1 }
  0xc7   : > { %8313 = vmatpush3.bf16.msra.mxu1 %v8636_v49  ;;  %v558_v13 = vshrl.u32 %v9616_v50, 16  ;;  %v561_v59 = vshll.u32 %v9616_v50, 16 }
  0xc8   : > { %8314 = vmatprep.subr.bf16.mxu1 %v8639_v60 }
  0xc9   : > { %7833 = vmatpush3.bf16.msra.mxu0 %v8641_v55  ;;  %v556_v55 = vor.u32 %v554_v42, %v553_v46  ;;  %v9719_v46 = vld [vmem:[%s10617_s2] ss:$0 sm:$0xff] }
  0xca   : > { %7870 = vmatprep.subr.bf16.mxu0 %v8643_v56  ;;  %v653_v56 = vor.u32 %v652_v36, %v551_v41  ;;  %v9709_v41 = vld [vmem:[%s10616_s1] ss:$0 sm:$0xff] }
  0xcb   : > { %8315 = vmatpush3.bf16.msra.mxu1 %v8639_v60  ;;  %v391_v43 = vmul.f32 %v9709_v41, %v7431_v37  ;;  %v8698_v37 = vld [vmem:[%s10618_s3 + $0x140] sm:$0xff]  }
  0xcc   : > { %3491 = vmatmul.mubr.bf16.vlgmr.msra.gmra.mxu0 %v9352_v25  ;;  %8316 = vmatprep.subr.bf16.mxu1 %v8642_v1  ;;  %v8647_v25 = vld [vmem:[%s10618_s3 + $0xb8] sm:$0xff]  }
  0xcd   : > { %7871 = vmatpush3.bf16.msra.mxu0 %v8645_v54  ;;  %3498 = vmatprep.mubr.bf16.mxu0 %v9339_v0  ;;  %v8654_v0 = vld [vmem:[%s10618_s3 + $0x60] sm:$0xff]   ;;  %v9630_v54 = vsel %vm9024_vm5, 0, %v556_v55 }
  0xce   : > { %7872 = vmatprep.subr.bf16.mxu0 %v8648_v11  ;;  %v694_v11 = vsel %vm9016_vm4, %v653_v56, 0  ;;  %v8684_v55 = vld [vmem:[%s10618_s3 + $0x160] sm:$0xff]  }
  0xcf   : > { %8317 = vmatpush3.bf16.msra.mxu1 %v8642_v1  ;;  %v6448_v1 = vcombine.low %v694_v11, %v694_v11 }
  0xd0   : > { %8326 = vmatprep.subr.bf16.mxu1 %v8647_v25 }
  0xd1   : > { %7873 = vmatpush3.bf16.msra.mxu0 %v8649_v44  ;;  %v654_v44 = vrot.slane %v561_v59, 1  ;;  %1020 = vst [vmem:[#allocation2 + $0xf8] sm:$0xf] %v6448_v1  ;;  %v8689_v1 = vld [vmem:[%s10618_s3 + $0x158] sm:$0xff]  }
  0xd2   : > { %7874 = vmatprep.subr.bf16.mxu0 %v8651_v34  ;;  %8319 = vmatmul.mubr.bf16.vlgmr.msra.gmra.mxu1 %v8646_v2  ;;  %v8671_v34 = vld [vmem:[%s10618_s3 + $0x138] sm:$0xff]   ;;  %v6450_v2 = vcombine.high %v694_v11, %v694_v11 }
  0xd3   : > { %8327 = vmatpush3.bf16.msra.mxu1 %v8647_v25  ;;  %8322 = vmatprep.mubr.bf16.mxu1 %v8658_v6  ;;  %v560_v25 = vrot.slane %v558_v13, 7 }
  0xd4   : > { %3499 = vmatmul.mubr.bf16.gmra.mxu0 %v9376_v22  ;;  %v8657_v22 = vld [vmem:[%s10618_s3 + $0x58] sm:$0xff]   ;;  %8328 = vmatprep.subr.bf16.mxu1 %v8650_v8  ;;  %1022 = vst [vmem:[#allocation2 + $0x104] sm:$0xf] %v6450_v2 }
  0xd5   : > { %7875 = vmatpush3.bf16.msra.mxu0 %v8652_v4  ;;  %3506 = vmatprep.mubr.bf16.mxu0 %v9434_v28  ;;  %v563_v6 = vor.u32 %v561_v59, %v560_v25 }
  0xd6   : > { %7876 = vmatprep.subr.bf16.mxu0 %v8654_v0  ;;  %v655_v0 = vor.u32 %v654_v44, %v558_v13 }
  0xd7   : > { %8329 = vmatpush3.bf16.msra.mxu1 %v8650_v8  ;;  %v9657_v10 = vsel %vm9024_vm5, 0, %v563_v6 }
  0xd8   : > { %8330 = vmatprep.subr.bf16.mxu1 %v8653_v12  ;;  %v695_v7 = vsel %vm9016_vm4, %v655_v0, 0 }
  0xd9   : > { %7877 = vmatpush3.bf16.msra.mxu0 %v8655_v29  ;;  %v6452_v8 = vcombine.low %v695_v7, %v695_v7  ;;  %v6454_v29 = vcombine.high %v695_v7, %v695_v7 }
  0xda   : > { %7878 = vmatprep.subr.bf16.mxu0 %v8657_v22  ;;  %8323 = vmatmul.mubr.bf16.gmra.mxu1 %v8660_v21  ;;  %v8677_v22 = vld [vmem:[%s10618_s3 + $0xf0] sm:$0xff]  }
  0xdb   : > { %8331 = vmatpush3.bf16.msra.mxu1 %v8653_v12  ;;  %8342 = vmatprep.mubr.bf16.mxu1 %v8672_v30  ;;  %v8670_v12 = vld [vmem:[%s10618_s3 + $0x80] sm:$0xff]   ;;  %1024 = vst [vmem:[#allocation2 + $0x110] sm:$0xf] %v6452_v8  ;;  %1026 = vst [vmem:[#allocation2 + $0x11c] sm:$0xf] %v6454_v29  ;;  %v8685_v30 = vld [vmem:[%s10618_s3 + $0x118] sm:$0xff]  }
  0xdc   : > { %3507 = vmatmul.mubr.bf16.gmra.mxu0 %v9468_v9  ;;  %8332 = vmatprep.subr.bf16.mxu1 %v8656_v35  ;;  %v8686_v23 = vld [vmem:[#allocation2 + $0xf8] ss:$12 sps:$4 sm:$0xff]  }
  0xdd   : > { %7879 = vmatpush3.bf16.msra.mxu0 %v8659_v15  ;;  %3514 = vmatprep.mubr.bf16.mxu0 %v9515_v47  ;;  %v8679_v15 = vld [vmem:[%s10618_s3 + $0x128] sm:$0xff]  }
  0xde   : > { %7880 = vmatprep.subr.bf16.mxu0 %v8662_v18  ;;  %v8674_v18 = vld [vmem:[#allocation2 + $0xe0] ss:$12 sps:$4 sm:$0xff]  }
  0xdf   : > { %8333 = vmatpush3.bf16.msra.mxu1 %v8656_v35  ;;  %v7430_v35 = vunpack.c.l.bf16 %v7538_v27 }
  0xe0   : > { %8334 = vmatprep.subr.bf16.mxu1 %v8661_v38 }
  0xe1   : > { %7881 = vmatpush3.bf16.msra.mxu0 %v8663_v31  ;;  %v390_v42 = vmul.f32 %v9709_v41, %v7430_v35 }
  0xe2   : > { %7882 = vmatprep.subr.bf16.mxu0 %v8665_v40  ;;  %v8687_v40 = vld [vmem:[%s10618_s3 + $0xd8] sm:$0xff]  }
  0xe3   : > { %8335 = vmatpush3.bf16.msra.mxu1 %v8661_v38  ;;  %v8688_v38 = vld [vmem:[#allocation2 + $0x110] ss:$12 sps:$4 sm:$0xff]   ;;  %v429_v36 = vadd.f32 %v9719_v46, %v390_v42 }
  0xe4   : > { %3515 = vmatmul.mubr.bf16.gmra.mxu0 %v9546_v61  ;;  %8336 = vmatprep.subr.bf16.mxu1 %v8664_v63 }
  0xe5   : > { %7883 = vmatpush3.bf16.msra.mxu0 %v8666_v52  ;;  %3978 = vmatprep.mubr.bf16.mxu0 %v9434_v28  ;;  %v8667_v28 = vld [vmem:[%s10618_s3 + $0x88] sm:$0xff]  }
  0xe6   : > { %7884 = vmatprep.subr.bf16.mxu0 %v8668_v57  ;;  %v8700_v52 = vld [vmem:[#allocation2 + $0xe0] ss:$12 sps:$4 sm:$0xff]   ;;  %v8691_v57 = vld [vmem:[%s10618_s3 + $0xd0] sm:$0xff]  }
  0xe7   : > { %8337 = vmatpush3.bf16.msra.mxu1 %v8664_v63  ;;  %v8693_v63 = vld [vmem:[%s10618_s3 + $0x108] sm:$0xff]  }
  0xe8   : > { %8338 = vmatprep.subr.bf16.mxu1 %v8667_v28 }
  0xe9   : > { %7885 = vmatpush3.bf16.msra.mxu0 %v8669_v62 }
  0xea   : > { %7922 = vmatprep.subr.bf16.mxu0 %v8671_v34  ;;  %v8694_v34 = vld [vmem:[%s10618_s3 + $0xc8] sm:$0xff]  }
  0xeb   : > { %8339 = vmatpush3.bf16.msra.mxu1 %v8667_v28 }
  0xec   : > { %v7574_v49 = vpop.f32.mrf.mxu0  ;;  %3979 = vmatmul.mubr.bf16.vlgmr.msra.gmra.mxu0 %v9468_v9  ;;  %8340 = vmatprep.subr.bf16.mxu1 %v8670_v12  ;;  %v8680_v9 = vld [vmem:[%s10618_s3 + $0xe8] sm:$0xff]  }
  0xed   : > { %7923 = vmatpush3.bf16.msra.mxu0 %v8673_v14  ;;  %3986 = vmatprep.mubr.bf16.mxu0 %v9515_v47  ;;  %v8692_v14 = vld [vmem:[%s10618_s3 + $0x150] sm:$0xff]  }
  0xee   : > { %v7575_v58 = vpop.f32.mrf.mxu0  ;;  %7924 = vmatprep.subr.bf16.mxu0 %v8676_v3 }
  0xef   : > { %v9626_v60 = vadd.f32 %v7575_v58, %v7574_v49  ;;  %8341 = vmatpush3.bf16.msra.mxu1 %v8670_v12  ;;  %v430_v49 = vadd.f32 %v9719_v46, %v391_v43  ;;  %v461_v58 = vmax.f32 %v429_v36, 0.0  ;;  %v8697_v12 = vld [vmem:[%s10618_s3 + $0xc0] sm:$0xff]   ;;  %v8707_v43 = vld [vmem:[%s10618_s3 + $0x1e8] sm:$0xff]  }
  0xf0   : > { %v7577_v32 = vpop.f32.mrf.mxu0  ;;  %8350 = vmatprep.subr.bf16.mxu1 %v8675_v16  ;;  %v9731_v59 = vpop.f32.mrf.mxu1 }
  0xf1   : > { %7925 = vmatpush3.bf16.msra.mxu0 %v8677_v22  ;;  %v462_v13 = vmax.f32 %v430_v49, 0.0  ;;  %v8708_v49 = vld [vmem:[%s10618_s3 + $0x1a8] sm:$0xff]  }
  0xf2   : > { %v7578_v4 = vpop.f32.mrf.mxu0  ;;  %7926 = vmatprep.subr.bf16.mxu0 %v8679_v15  ;;  %8343 = vmatmul.mubr.bf16.vlgmr.msra.gmra.mxu1 %v8674_v18  ;;  %v9753_v0 = vpop.f32.mrf.mxu1 }
  0xf3   : > { %v9645_v5 = vadd.f32 %v7578_v4, %v7577_v32  ;;  %8351 = vmatpush3.bf16.msra.mxu1 %v8675_v16  ;;  %8346 = vmatprep.mubr.bf16.mxu1 %v8686_v23  ;;  %v9736_v62 = vpack.c.bf16 %v462_v13, %v461_v58  ;;  %v8696_v4 = vld [vmem:[%s10618_s3 + $0x100] sm:$0xff]   ;;  %v8699_v16 = vld [vmem:[%s10618_s3 + $0x1f8] sm:$0xff]   ;;  %v8706_v13 = vld [vmem:[%s10618_s3 + $0x230] sm:$0xff]  }
  0xf4   : > { %v7580_v51 = vpop.f32.mrf.mxu0  ;;  %3987 = vmatmul.mubr.bf16.gmra.mxu0 %v9546_v61  ;;  %8352 = vmatprep.subr.bf16.mxu1 %v8678_v19  ;;  %v9765_v22 = vpop.f32.mrf.mxu1  ;;  %v8701_v23 = vld [vmem:[%s10618_s3 + $0x1b8] sm:$0xff]  }
  0xf5   : > { %7927 = vmatpush3.bf16.msra.mxu0 %v8680_v9  ;;  %3994 = vmatprep.mubr.bf16.mxu0 %v9596_v33  ;;  %v565_v2 = vshrl.u32 %v9736_v62, 16  ;;  %v568_v25 = vshll.u32 %v9736_v62, 16 }
  0xf6   : > { %v7581_v20 = vpop.f32.mrf.mxu0  ;;  %7928 = vmatprep.subr.bf16.mxu0 %v8682_v17 }
  0xf7   : > { %v9685_v21 = vadd.f32 %v7581_v20, %v7580_v51  ;;  %8353 = vmatpush3.bf16.msra.mxu1 %v8678_v19  ;;  %v656_v28 = vrot.slane %v568_v25, 1  ;;  %v567_v7 = vrot.slane %v565_v2, 7  ;;  %v8695_v19 = vld [vmem:[%s10618_s3 + $0x148] sm:$0xff]  }
  0xf8   : > { %v9688_v24 = vpop.f32.mrf.mxu0  ;;  %8354 = vmatprep.subr.bf16.mxu1 %v8681_v39 }
  0xf9   : > { %7929 = vmatpush3.bf16.msra.mxu0 %v8683_v26  ;;  %v657_v29 = vor.u32 %v656_v28, %v565_v2  ;;  %v570_v3 = vor.u32 %v568_v25, %v567_v7  ;;  %v9786_v26 = vpop.f32.mrf.mxu1  ;;  %v8711_v25 = vld [vmem:[%s10618_s3 + $0x1a0] sm:$0xff]   ;;  %v8713_v7 = vld [vmem:[%s10618_s3 + $0x1d8] sm:$0xff]  }
  0xfa   : > { %v9701_v31 = vpop.f32.mrf.mxu0  ;;  %7930 = vmatprep.subr.bf16.mxu0 %v8685_v30  ;;  %8347 = vmatmul.mubr.bf16.gmra.mxu1 %v8688_v38  ;;  %v8704_v30 = vld [vmem:[%s10618_s3 + $0x1f0] sm:$0xff]  }
  0xfb   : > { %8355 = vmatpush3.bf16.msra.mxu1 %v8681_v39  ;;  %8366 = vmatprep.mubr.bf16.mxu1 %v8700_v52  ;;  %v696_v51 = vsel %vm9016_vm4, %v657_v29, 0  ;;  %v9774_v9 = vsel %vm9024_vm5, 0, %v570_v3 }
  0xfc   : > { %v7586_v56 = vpop.f32.mrf.mxu0  ;;  %3995 = vmatmul.mubr.bf16.gmra.mxu0 %v9630_v54  ;;  %8356 = vmatprep.subr.bf16.mxu1 %v8684_v55  ;;  %v6456_v18 = vcombine.low %v696_v51, %v696_v51 }
  0xfd   : > { %7931 = vmatpush3.bf16.msra.mxu0 %v8687_v40  ;;  %4002 = vmatprep.mubr.bf16.mxu0 %v9616_v50  ;;  %v8705_v40 = vld [vmem:[%s10618_s3 + $0x1b0] sm:$0xff]  }
  0xfe   : > { %v7587_v11 = vpop.f32.mrf.mxu0  ;;  %7932 = vmatprep.subr.bf16.mxu0 %v8690_v45  ;;  %1028 = vst [vmem:[#allocation2 + $0x128] sm:$0xf] %v6456_v18  ;;  %v8703_v45 = vld [vmem:[%s10618_s3 + $0x238] sm:$0xff]  }
  0xff   : > { %v9738_v32 = vadd.f32 %v7587_v11, %v7586_v56  ;;  %8357 = vmatpush3.bf16.msra.mxu1 %v8684_v55  ;;  %v8710_v56 = vld [vmem:[%s10618_s3 + $0x1e0] sm:$0xff]  }
 0x100   : > { %v9743_v44 = vpop.f32.mrf.mxu0  ;;  %8358 = vmatprep.subr.bf16.mxu1 %v8689_v1  ;;  %v9793_v35 = vpop.f32.mrf.mxu1 }
 0x101   : > { %7933 = vmatpush3.bf16.msra.mxu0 %v8691_v57  ;;  %v8702_v57 = vld [vmem:[#allocation2 + $0xf8] ss:$12 sps:$4 sm:$0xff]  }
 0x102   : > { %v9755_v6 = vpop.f32.mrf.mxu0  ;;  %7934 = vmatprep.subr.bf16.mxu0 %v8693_v63  ;;  %v9814_v38 = vpop.f32.mrf.mxu1 }
 0x103   : > { %8359 = vmatpush3.bf16.msra.mxu1 %v8689_v1  ;;  %v8714_v1 = vld [vmem:[#allocation2 + $0x110] ss:$12 sps:$4 sm:$0xff]  }
 0x104   : > { %v7592_v8 = vpop.f32.mrf.mxu0  ;;  %4003 = vmatmul.mubr.bf16.gmra.mxu0 %v9657_v10  ;;  %8360 = vmatprep.subr.bf16.mxu1 %v8692_v14 }
 0x105   : > { %7935 = vmatpush3.bf16.msra.mxu0 %v8694_v34  ;;  %4389 = vmatprep.mubr.bf16.mxu0 %v9515_v47  ;;  %v6458_v47 = vcombine.high %v696_v51, %v696_v51  ;;  %v9831_v34 = vpop.f32.mrf.mxu1  ;;  %v8718_v51 = vld [vmem:[%s10618_s3 + $0x1d0] sm:$0xff]  }
 0x106   : > { %v7593_v15 = vpop.f32.mrf.mxu0  ;;  %7936 = vmatprep.subr.bf16.mxu0 %v8696_v4 }
 0x107   : > { %v9776_v17 = vadd.f32 %v7593_v15, %v7592_v8  ;;  %1030 = vst [vmem:[#allocation2 + $0x134] sm:$0xf] %v6458_v47  ;;  %8361 = vmatpush3.bf16.msra.mxu1 %v8692_v14  ;;  %v8709_v8 = vld [vmem:[%s10618_s3 + $0x228] sm:$0xff]   ;;  %v9853_v15 = vpop.f32.mrf.mxu1  ;;  %v8728_v47 = vld [vmem:[#allocation2 + $0xf8] ss:$12 sps:$4 sm:$0xff]  }
 0x108   : > { %v9781_v20 = vpop.f32.mrf.mxu0  ;;  %8362 = vmatprep.subr.bf16.mxu1 %v8695_v19 }
 0x109   : > { %7937 = vmatpush3.bf16.msra.mxu0 %v8697_v12  ;;  %v8715_v12 = vld [vmem:[%s10618_s3 + $0x198] sm:$0xff]  }
 0x10a   : > { %v9788_v27 = vpop.f32.mrf.mxu0  ;;  %7974 = vmatprep.subr.bf16.mxu0 %v8699_v16 }
 0x10b   : > { %8363 = vmatpush3.bf16.msra.mxu1 %v8695_v19 }
 0x10c   : > { %v9798_v39 = vpop.f32.mrf.mxu0  ;;  %4390 = vmatmul.mubr.bf16.vlgmr.msra.gmra.mxu0 %v9546_v61  ;;  %v7539_v61 = vld [vmem:[%s8965_s8 + $0x60] sm:$0xff]   ;;  %8364 = vmatprep.subr.bf16.mxu1 %v8698_v37 }
 0x10d   : > { %7975 = vmatpush3.bf16.msra.mxu0 %v8701_v23  ;;  %4397 = vmatprep.mubr.bf16.mxu0 %v9596_v33  ;;  %v7434_v52 = vunpack.c.l.bf16 %v7539_v61  ;;  %v7435_v55 = vunpack.c.h.bf16 %v7539_v61  ;;  %v8719_v61 = vld [vmem:[%s10618_s3 + $0x190] sm:$0xff]  }
 0x10e   : > { %v9805_v42 = vpop.f32.mrf.mxu0  ;;  %7976 = vmatprep.subr.bf16.mxu0 %v8704_v30  ;;  %v8716_v30 = vld [vmem:[#allocation2 + $0x128] ss:$12 sps:$4 sm:$0xff]  }
 0x10f   : > { %v392_v11 = vmul.f32 %v9709_v41, %v7434_v52  ;;  %v393_v63 = vmul.f32 %v9709_v41, %v7435_v55  ;;  %8365 = vmatpush3.bf16.msra.mxu1 %v8698_v37 }
 0x110   : > { %v9816_v36 = vpop.f32.mrf.mxu0  ;;  %8374 = vmatprep.subr.bf16.mxu1 %v8703_v45 }
 0x111   : > { %7977 = vmatpush3.bf16.msra.mxu0 %v8705_v40  ;;  %v431_v4 = vadd.f32 %v9719_v46, %v392_v11  ;;  %v432_v28 = vadd.f32 %v9719_v46, %v393_v63  ;;  %v9862_v19 = vpop.f32.mrf.mxu1  ;;  %v8717_v63 = vld [vmem:[%s10618_s3 + $0x218] sm:$0xff]  }
 0x112   : > { %v9824_v58 = vpop.f32.mrf.mxu0  ;;  %7978 = vmatprep.subr.bf16.mxu0 %v8707_v43  ;;  %8367 = vmatmul.mubr.bf16.vlgmr.msra.gmra.mxu1 %v8702_v57  ;;  %v8712_v43 = vld [vmem:[%s10618_s3 + $0x220] sm:$0xff]   ;;  %v8721_v57 = vld [vmem:[%s10618_s3 + $0x1c8] sm:$0xff]  }
 0x113   : > { %v463_v29 = vmax.f32 %v431_v4, 0.0  ;;  %v464_v3 = vmax.f32 %v432_v28, 0.0  ;;  %8375 = vmatpush3.bf16.msra.mxu1 %v8703_v45  ;;  %8370 = vmatprep.mubr.bf16.mxu1 %v8714_v1  ;;  %v9878_v55 = vpop.f32.mrf.mxu1 }
 0x114   : > { %v9833_v2 = vpop.f32.mrf.mxu0  ;;  %4398 = vmatmul.mubr.bf16.gmra.mxu0 %v9630_v54  ;;  %8376 = vmatprep.subr.bf16.mxu1 %v8706_v13 }
 0x115   : > { %7979 = vmatpush3.bf16.msra.mxu0 %v8708_v49  ;;  %4405 = vmatprep.mubr.bf16.mxu0 %v9616_v50  ;;  %v9860_v18 = vpack.c.bf16 %v464_v3, %v463_v29  ;;  %v9899_v29 = vpop.f32.mrf.mxu1 }
 0x116   : > { %v9845_v14 = vpop.f32.mrf.mxu0  ;;  %7980 = vmatprep.subr.bf16.mxu0 %v8710_v56 }
 0x117   : > { %v572_v37 = vshrl.u32 %v9860_v18, 16  ;;  %v575_v40 = vshll.u32 %v9860_v18, 16  ;;  %8377 = vmatpush3.bf16.msra.mxu1 %v8706_v13 }
 0x118   : > { %v9855_v16 = vpop.f32.mrf.mxu0  ;;  %8378 = vmatprep.subr.bf16.mxu1 %v8709_v8 }
 0x119   : > { %7981 = vmatpush3.bf16.msra.mxu0 %v8711_v25  ;;  %v658_v49 = vrot.slane %v575_v40, 1  ;;  %v574_v52 = vrot.slane %v572_v37, 7  ;;  %v8722_v25 = vld [vmem:[%s10618_s3 + $0x188] sm:$0xff]  }
 0x11a   : > { %v9864_v23 = vpop.f32.mrf.mxu0  ;;  %7982 = vmatprep.subr.bf16.mxu0 %v8713_v7  ;;  %8371 = vmatmul.mubr.bf16.gmra.mxu1 %v8716_v30  ;;  %v7585_v30 = vadd.f32 %v9701_v31, %v9688_v24  ;;  %v9928_v24 = vld [vmem:[%s10619_s4] ss:$0 sm:$0xff]  ;;  %v1426_v31 = vadd.f32 %v9626_v60, %v9753_v0  ;;  %v8729_v60 = vld [vmem:[%s10618_s3 + $0x38] sm:$0xff]   ;;  %v7540_v0 = vld [vmem:[%s8965_s8 + $0x68] sm:$0xff]  }
 0x11b   : > { %v659_v13 = vor.u32 %v658_v49, %v572_v37  ;;  %v577_v11 = vor.u32 %v575_v40, %v574_v52  ;;  %8379 = vmatpush3.bf16.msra.mxu1 %v8709_v8  ;;  %8390 = vmatprep.mubr.bf16.mxu1 %v8728_v47  ;;  %v8725_v37 = vld [vmem:[%s10618_s3 + $0x180] sm:$0xff]   ;;  %v9918_v40 = vpop.f32.mrf.mxu1  ;;  %v8723_v52 = vld [vmem:[%s10618_s3 + $0x208] sm:$0xff]  }
 0x11c   : > { %v9871_v45 = vpop.f32.mrf.mxu0  ;;  %4406 = vmatmul.mubr.bf16.gmra.mxu0 %v9657_v10  ;;  %8380 = vmatprep.subr.bf16.mxu1 %v8712_v43 }
 0x11d   : > { %7983 = vmatpush3.bf16.msra.mxu0 %v8715_v12  ;;  %4413 = vmatprep.mubr.bf16.mxu0 %v9736_v62  ;;  %v697_v4 = vsel %vm9016_vm4, %v659_v13, 0  ;;  %v9897_v28 = vsel %vm9024_vm5, 0, %v577_v11  ;;  %v8724_v12 = vld [vmem:[%s10618_s3 + $0x1c0] sm:$0xff]   ;;  %v9934_v49 = vpop.f32.mrf.mxu1  ;;  %v1437_v13 = vadd.f32 %v9765_v22, %v7585_v30  ;;  %v7591_v22 = vadd.f32 %v9755_v6, %v9743_v44 }
 0x11e   : > { %v9880_v56 = vpop.f32.mrf.mxu0  ;;  %7984 = vmatprep.subr.bf16.mxu0 %v8718_v51  ;;  %v6460_v7 = vcombine.low %v697_v4, %v697_v4  ;;  %v6462_v8 = vcombine.high %v697_v4, %v697_v4  ;;  %v8720_v51 = vld [vmem:[%s10618_s3 + $0x210] sm:$0xff]   ;;  %v8726_v30 = vld [vmem:[%s10618_s3 + $0x200] sm:$0xff]  }
 0x11f   : > { %8381 = vmatpush3.bf16.msra.mxu1 %v8712_v43 }
 0x120   : > { %v9888_v1 = vpop.f32.mrf.mxu0  ;;  %1032 = vst [vmem:[#allocation2 + $0x140] sm:$0xf] %v6460_v7  ;;  %1034 = vst [vmem:[#allocation2 + $0x14c] sm:$0xf] %v6462_v8  ;;  %8382 = vmatprep.subr.bf16.mxu1 %v8717_v63  ;;  %v7628_v7 = vadd.f32 %v9805_v42, %v9798_v39  ;;  %v1429_v8 = vadd.f32 %v9645_v5, %v9786_v26  ;;  %v9972_v39 = vadd.f32 %v9928_v24, %v1437_v13  ;;  %v8733_v42 = vld [vmem:[%s10618_s3 + $0x30] sm:$0xff]  }
 0x121   : > { %7985 = vmatpush3.bf16.msra.mxu0 %v8719_v61  ;;  %v8727_v61 = vld [vmem:[%s10618_s3 + $0x78] sm:$0xff]   ;;  %v7631_v5 = vadd.f32 %v9824_v58, %v9816_v36  ;;  %v7634_v26 = vadd.f32 %v9845_v14, %v9833_v2  ;;  %v1442_v14 = vadd.f32 %v9738_v32, %v9814_v38  ;;  %v7637_v13 = vadd.f32 %v9864_v23, %v9855_v16 }
 0x122   : > { %v9901_v3 = vpop.f32.mrf.mxu0  ;;  %7986 = vmatprep.subr.bf16.mxu0 %v8721_v57  ;;  %v10006_v16 = vadd.f32 %v9793_v35, %v9776_v17  ;;  %v10010_v23 = vadd.f32 %v9788_v27, %v9781_v20  ;;  %v8738_v17 = vld [vmem:[%s10618_s3 + $0x60] sm:$0xff]  }
 0x123   : > { %8383 = vmatpush3.bf16.msra.mxu1 %v8717_v63  ;;  %v7439_v63 = vunpack.c.h.bf16 %v7540_v0 }
 0x124   : > { %v9909_v47 = vpop.f32.mrf.mxu0  ;;  %4414 = vmatmul.mubr.bf16.gmra.mxu0 %v9774_v9  ;;  %8384 = vmatprep.subr.bf16.mxu1 %v8720_v51 }
 0x125   : > { %7987 = vmatpush3.bf16.msra.mxu0 %v8722_v25  ;;  %4800 = vmatprep.mubr.bf16.mxu0 %v9596_v33  ;;  %v1434_v33 = vadd.f32 %v9731_v59, %v9685_v21  ;;  %v8732_v21 = vld [vmem:[%s10618_s3 + $0x70] sm:$0xff]   ;;  %v7438_v59 = vunpack.c.l.bf16 %v7540_v0  ;;  %v1456_v25 = vadd.f32 %v9928_v24, %v1426_v31  ;;  %v395_v6 = vmul.f32 %v9709_v41, %v7439_v63 }
 0x126   : > { %v9920_v43 = vpop.f32.mrf.mxu0  ;;  %7988 = vmatprep.subr.bf16.mxu0 %v8724_v12  ;;  %v9961_v12 = vpop.f32.mrf.mxu1 }
 0x127   : > { %v9953_v4 = vadd.f32 %v9928_v24, %v1434_v33  ;;  %8385 = vmatpush3.bf16.msra.mxu1 %v8720_v51  ;;  %v394_v44 = vmul.f32 %v9709_v41, %v7438_v59  ;;  %v434_v36 = vadd.f32 %v9719_v46, %v395_v6  ;;  %v1445_v33 = vadd.f32 %v7591_v22, %v9853_v15  ;;  %v8736_v22 = vld [vmem:[%s10618_s3 + $0x28] sm:$0xff]  }
 0x128   : > { %v9939_v57 = vpop.f32.mrf.mxu0  ;;  %8386 = vmatprep.subr.bf16.mxu1 %v8723_v52  ;;  %v9997_v0 = vpop.f32.mrf.mxu1  ;;  %v8742_v6 = vld [vmem:[#allocation2 + $0x128] ss:$12 sps:$4 sm:$0xff]  }
 0x129   : > { %7989 = vmatpush3.bf16.msra.mxu0 %v8725_v37  ;;  %v433_v31 = vadd.f32 %v9719_v46, %v394_v44  ;;  %v466_v32 = vmax.f32 %v434_v36, 0.0 }
 0x12a   : > { %v9946_v11 = vpop.f32.mrf.mxu0  ;;  %8026 = vmatprep.subr.bf16.mxu0 %v8727_v61  ;;  %v8735_v61 = vld [vmem:[%s10618_s3 + $0x68] sm:$0xff]  }
 0x12b   : > { %8387 = vmatpush3.bf16.msra.mxu1 %v8723_v52  ;;  %v465_v63 = vmax.f32 %v433_v31, 0.0  ;;  %v1845_v52 = vadd.f32 %v9862_v19, %v7634_v26  ;;  %v10025_v19 = vadd.f32 %v9928_v24, %v1442_v14  ;;  %v8734_v26 = vld [vmem:[%s10618_s3 + $0xb0] sm:$0xff]   ;;  %v7640_v31 = vadd.f32 %v9880_v56, %v9871_v45  ;;  %v8737_v14 = vld [vmem:[%s10618_s3 + $0xa8] sm:$0xff]  }
 0x12c   : > { %v9966_v37 = vpop.f32.mrf.mxu0  ;;  %4801 = vmatmul.mubr.bf16.vlgmr.msra.gmra.mxu0 %v9630_v54  ;;  %v7541_v54 = vld [vmem:[%s8965_s8 + $0x70] sm:$0xff]   ;;  %8388 = vmatprep.subr.bf16.mxu1 %v8726_v30 }
 0x12d   : > { %8027 = vmatpush3.bf16.msra.mxu0 %v8729_v60  ;;  %4808 = vmatprep.mubr.bf16.mxu0 %v9616_v50  ;;  %v7442_v58 = vunpack.c.l.bf16 %v7541_v54  ;;  %v7443_v2 = vunpack.c.h.bf16 %v7541_v54  ;;  %v1837_v50 = vadd.f32 %v7628_v7, %v9878_v55  ;;  %v8731_v60 = vld [vmem:[%s10618_s3 + $0xb8] sm:$0xff]   ;;  %v1457_v55 = vadd.f32 %v9928_v24, %v1429_v8 }
 0x12e   : > { %v7679_v51 = vpop.f32.mrf.mxu0  ;;  %8028 = vmatprep.subr.bf16.mxu0 %v8732_v21  ;;  %v8730_v21 = vld [vmem:[#allocation2 + $0x110] ss:$12 sps:$4 sm:$0xff]   ;;  %v1840_v7 = vadd.f32 %v7631_v5, %v9918_v40  ;;  %v10020_v35 = vpack.c.bf16 %v466_v32, %v465_v63  ;;  %v10028_v8 = vadd.f32 %v9928_v24, %v1445_v33  ;;  %v1848_v40 = vadd.f32 %v9899_v29, %v7637_v13  ;;  %v10031_v5 = vpop.f32.mrf.mxu1  ;;  %v8744_v32 = vld [vmem:[#allocation2 + $0x140] ss:$12 sps:$4 sm:$0xff]  }
 0x12f   : > { %v396_v38 = vmul.f32 %v9709_v41, %v7442_v58  ;;  %v397_v15 = vmul.f32 %v9709_v41, %v7443_v2  ;;  %v1867_v44 = vadd.f32 %v1837_v50, %v1456_v25  ;;  %8389 = vmatpush3.bf16.msra.mxu1 %v8726_v30  ;;  %v7680_v36 = vadd.f32 %v7679_v51, %v9966_v37  ;;  %v8743_v13 = vld [vmem:[%s10618_s3 + $0x18] sm:$0xff]  }
 0x130   : > { %v9999_v59 = vpop.f32.mrf.mxu0  ;;  %8398 = vmatprep.subr.bf16.mxu1 %v8731_v60  ;;  %v579_v25 = vshrl.u32 %v10020_v35, 16  ;;  %v582_v29 = vshll.u32 %v10020_v35, 16  ;;  %v1870_v51 = vadd.f32 %v1848_v40, %v9972_v39  ;;  %v7643_v33 = vadd.f32 %v9901_v3, %v9888_v1 }
 0x131   : > { %8029 = vmatpush3.bf16.msra.mxu0 %v8733_v42  ;;  %v435_v20 = vadd.f32 %v9719_v46, %v396_v38  ;;  %v436_v27 = vadd.f32 %v9719_v46, %v397_v15  ;;  %v8739_v46 = vld [vmem:[%s10618_s3 + $0x20] sm:$0xff]   ;;  %v8248_v58 = vpop.f32.mrf.mxu1  ;;  %v8746_v38 = vld [vmem:[%s10618_s3 + $0x50] sm:$0xff]   ;;  %v1853_v1 = vadd.f32 %v7640_v31, %v9961_v12 }
 0x132   : > { %v7682_v41 = vpop.f32.mrf.mxu0  ;;  %8030 = vmatprep.subr.bf16.mxu0 %v8735_v61  ;;  %v1869_v61 = vadd.f32 %v1845_v52, %v9953_v4  ;;  %8391 = vmatmul.mubr.bf16.vlgmr.msra.gmra.mxu1 %v8730_v21  ;;  %v8741_v4 = vld [vmem:[%s10618_s3 + $0x58] sm:$0xff]   ;;  %v581_v45 = vrot.slane %v579_v25, 7  ;;  %v660_v56 = vrot.slane %v582_v29, 1 }
 0x133   : > { %v467_v30 = vmax.f32 %v435_v20, 0.0  ;;  %v468_v54 = vmax.f32 %v436_v27, 0.0  ;;  %8399 = vmatpush3.bf16.msra.mxu1 %v8731_v60  ;;  %8394 = vmatprep.mubr.bf16.mxu1 %v8742_v6  ;;  %v2248_v21 = vpop.f32.mrf.mxu1  ;;  %v7683_v60 = vadd.f32 %v7682_v41, %v9999_v59  ;;  %v8756_v59 = vld [vmem:[#allocation2 + $0x128] ss:$12 sps:$4 sm:$0xff]   ;;  %v1871_v31 = vadd.f32 %v1853_v1, %v10025_v19 }
 0x134   : > { %v7684_v42 = vpop.f32.mrf.mxu0  ;;  %4809 = vmatmul.mubr.bf16.gmra.mxu0 %v9657_v10  ;;  %v10047_v10 = vadd.f32 %v1840_v7, %v1457_v55  ;;  %8400 = vmatprep.subr.bf16.mxu1 %v8734_v26  ;;  %v584_v15 = vor.u32 %v582_v29, %v581_v45  ;;  %v661_v39 = vor.u32 %v660_v56, %v579_v25  ;;  %v8749_v19 = vld [vmem:[%s10618_s3 + $0x48] sm:$0xff]  }
 0x135   : > { %8031 = vmatpush3.bf16.msra.mxu0 %v8736_v22  ;;  %4816 = vmatprep.mubr.bf16.mxu0 %v9736_v62  ;;  %v10055_v37 = vpack.c.bf16 %v468_v54, %v467_v30  ;;  %v2249_v3 = vadd.f32 %v7680_v36, %v2248_v21  ;;  %v8249_v22 = vpop.f32.mrf.mxu1 }
 0x136   : > { %v7685_v2 = vpop.f32.mrf.mxu0  ;;  %8032 = vmatprep.subr.bf16.mxu0 %v8738_v17  ;;  %v10071_v17 = vsel %vm9024_vm5, 0, %v584_v15  ;;  %v698_v20 = vsel %vm9016_vm4, %v661_v39, 0 }
 0x137   : > { %v7686_v50 = vadd.f32 %v7685_v2, %v7684_v42  ;;  %v589_v55 = vshll.u32 %v10055_v37, 16  ;;  %v586_v27 = vshrl.u32 %v10055_v37, 16  ;;  %v2279_v6 = vadd.f32 %v2249_v3, %v1867_v44  ;;  %8401 = vmatpush3.bf16.msra.mxu1 %v8734_v26  ;;  %v2251_v41 = vpop.f32.mrf.mxu1  ;;  %v8747_v26 = vld [vmem:[%s10618_s3 + $0x10] sm:$0xff]   ;;  %v8752_v3 = vld [vmem:[%s10618_s3 + $0x40] sm:$0xff]  }
 0x138   : > { %v7687_v63 = vpop.f32.mrf.mxu0  ;;  %8402 = vmatprep.subr.bf16.mxu1 %v8737_v14  ;;  %v6464_v29 = vcombine.low %v698_v20, %v698_v20  ;;  %v6466_v30 = vcombine.high %v698_v20, %v698_v20  ;;  %v2252_v36 = vadd.f32 %v7683_v60, %v2251_v41 }
 0x139   : > { %v2257_v52 = vadd.f32 %v8248_v58, %v7686_v50  ;;  %8033 = vmatpush3.bf16.msra.mxu0 %v8739_v46  ;;  %v662_v40 = vrot.slane %v589_v55, 1  ;;  %v8740_v46 = vld [vmem:[%s10618_s3 + $0xa0] sm:$0xff]   ;;  %v588_v54 = vrot.slane %v586_v27, 7  ;;  %v7646_v58 = vadd.f32 %v9920_v43, %v9909_v47 }
 0x13a   : > { %v7688_v7 = vpop.f32.mrf.mxu0  ;;  %8034 = vmatprep.subr.bf16.mxu0 %v8741_v4  ;;  %8395 = vmatmul.mubr.bf16.gmra.mxu1 %v8744_v32  ;;  %1036 = vst [vmem:[#allocation2 + $0x158] sm:$0xf] %v6464_v29  ;;  %1038 = vst [vmem:[#allocation2 + $0x164] sm:$0xf] %v6466_v30  ;;  %v2280_v45 = vadd.f32 %v2252_v36, %v10047_v10  ;;  %v8745_v10 = vld [vmem:[%s10618_s3 + $0x98] sm:$0xff]  }
 0x13b   : > { %v2281_v12 = vadd.f32 %v2257_v52, %v1869_v61  ;;  %v7689_v42 = vadd.f32 %v7688_v7, %v7687_v63  ;;  %v1856_v61 = vadd.f32 %v7643_v33, %v10031_v5  ;;  %v663_v4 = vor.u32 %v662_v40, %v586_v27  ;;  %8403 = vmatpush3.bf16.msra.mxu1 %v8737_v14 }
 0x13c   : > { %v7690_v25 = vpop.f32.mrf.mxu0  ;;  %4817 = vmatmul.mubr.bf16.gmra.mxu0 %v9774_v9  ;;  %v2341_v5 = vmul.f32 %v2279_v6, %v2279_v6  ;;  %8404 = vmatprep.subr.bf16.mxu1 %v8740_v46  ;;  %v10099_v43 = vpop.f32.mrf.mxu1  ;;  %v591_v33 = vor.u32 %v589_v55, %v588_v54  ;;  %v2327_v21 = vadd.f32 %v2280_v45, %v2279_v6 }
 0x13d   : > { %v2260_v44 = vadd.f32 %v8249_v22, %v7689_v42  ;;  %8035 = vmatpush3.bf16.msra.mxu0 %v8743_v13  ;;  %4824 = vmatprep.mubr.bf16.mxu0 %v9860_v18  ;;  %v2343_v47 = vmul.f32 %v2281_v12, %v2281_v12  ;;  %v7451_v13 = vpack.c.bf16 %v2280_v45, %v2279_v6  ;;  %v8748_v42 = vld [vmem:[%s10618_s3 + $0x90] sm:$0xff]  }
 0x13e   : > { %v7691_v2 = vpop.f32.mrf.mxu0  ;;  %8036 = vmatprep.subr.bf16.mxu0 %v8746_v38  ;;  %8414 = vmatprep.mubr.bf16.mxu1 %v8756_v59  ;;  %v2342_v63 = vmul.f32 %v2280_v45, %v2280_v45  ;;  %v8750_v38 = vld [vmem:[%s10618_s3 + $0x8] sm:$0xff]   ;;  %v2264_v39 = vpop.f32.mrf.mxu1  ;;  %v10114_v52 = vsel %vm9024_vm5, 0, %v591_v33  ;;  %v2328_v7 = vadd.f32 %v2327_v21, %v2281_v12  ;;  %v7649_v40 = vadd.f32 %v9946_v11, %v9939_v57 }
 0x13f   : > { %v2282_v56 = vadd.f32 %v2260_v44, %v1870_v51  ;;  %v7692_v50 = vadd.f32 %v7691_v2, %v7690_v25  ;;  %v699_v51 = vsel %vm9016_vm4, %v663_v4, 0  ;;  %7452 = vst [vmem:[%s10097_s10] sm:$0xff] %v7451_v13   ;;  %8405 = vmatpush3.bf16.msra.mxu1 %v8740_v46  ;;  %v8753_v46 = vld [vmem:[%s10618_s3] sm:$0xff]   ;;  %v1453_v57 = vadd.f32 %v9831_v34, %v10010_v23 }
 0x140   : > { %v7693_v14 = vpop.f32.mrf.mxu0  ;;  %v6468_v60 = vcombine.low %v699_v51, %v699_v51  ;;  %v6470_v55 = vcombine.high %v699_v51, %v699_v51  ;;  %v2349_v22 = vadd.f32 %v2342_v63, %v2341_v5  ;;  %8406 = vmatprep.subr.bf16.mxu1 %v8745_v10  ;;  %v8253_v6 = vpop.f32.mrf.mxu1  ;;  %v1872_v11 = vadd.f32 %v1856_v61, %v10028_v8 }
 0x141   : > { %v7456_v32 = vpack.c.bf16 %v2282_v56, %v2281_v12  ;;  %8037 = vmatpush3.bf16.msra.mxu0 %v8747_v26  ;;  %v2344_v15 = vmul.f32 %v2282_v56, %v2282_v56  ;;  %v2265_v20 = vadd.f32 %v7692_v50, %v2264_v39  ;;  %v2329_v25 = vadd.f32 %v2328_v7, %v2282_v56  ;;  %v8760_v50 = vld [vmem:[%s10618_s3 + $0x130] sm:$0xff]  }
 0x142   : > { %v7694_v1 = vpop.f32.mrf.mxu0  ;;  %8038 = vmatprep.subr.bf16.mxu0 %v8749_v19  ;;  %1040 = vst [vmem:[#allocation2 + $0x170] sm:$0xf] %v6468_v60  ;;  %1042 = vst [vmem:[#allocation2 + $0x17c] sm:$0xf] %v6470_v55  ;;  %v2350_v41 = vadd.f32 %v2349_v22, %v2343_v47  ;;  %v1861_v29 = vadd.f32 %v9934_v49, %v7646_v58  ;;  %v2267_v30 = vpop.f32.mrf.mxu1  ;;  %v8751_v49 = vld [vmem:[%s10618_s3 + $0x88] sm:$0xff]   ;;  %v1864_v8 = vadd.f32 %v9997_v0, %v7649_v40  ;;  %v8757_v19 = vld [vmem:[%s10618_s3 + $0xf8] sm:$0xff]  }
 0x143   : > { %7543 = vst [vmem:[%s10097_s10 + $0x8] sm:$0xff] %v7456_v32   ;;  %v7695_v27 = vadd.f32 %v7694_v1, %v7693_v14  ;;  %v2283_v12 = vadd.f32 %v2265_v20, %v1871_v31  ;;  %v8755_v31 = vld [vmem:[%s10618_s3 + $0x138] sm:$0xff]   ;;  %8407 = vmatpush3.bf16.msra.mxu1 %v8745_v10  ;;  %v1463_v4 = vadd.f32 %v9928_v24, %v1453_v57  ;;  %v8766_v57 = vld [vmem:[%s10618_s3 + $0x120] sm:$0xff]  }
 0x144   : > { %v7696_v59 = vpop.f32.mrf.mxu0  ;;  %4825 = vmatmul.mubr.bf16.gmra.mxu0 %v9897_v28  ;;  %v2351_v26 = vadd.f32 %v2350_v41, %v2344_v15  ;;  %8408 = vmatprep.subr.bf16.mxu1 %v8748_v42  ;;  %v7542_v0 = vld [vmem:[%s8965_s8 + $0x78] sm:$0xff]   ;;  %s295_s8 = scalar_lea.vmem %s10622_s7, %s10636_s25 }
 0x145   : > { %8039 = vmatpush3.bf16.msra.mxu0 %v8750_v38  ;;  %5288 = vmatprep.mubr.bf16.mxu0 %v9736_v62  ;;  %v2330_v36 = vadd.f32 %v2329_v25, %v2283_v12  ;;  %v2345_v44 = vmul.f32 %v2283_v12, %v2283_v12  ;;  %v2268_v2 = vadd.f32 %v7695_v27, %v2267_v30  ;;  %v7446_v33 = vunpack.c.l.bf16 %v7542_v0  ;;  %v8761_v38 = vld [vmem:[%s10618_s3 + $0xf0] sm:$0xff]   ;;  %v8759_v20 = vld [vmem:[%s10618_s3 + $0x178] sm:$0xff]  }
 0x146   : > { %v7697_v54 = vpop.f32.mrf.mxu0  ;;  %8040 = vmatprep.subr.bf16.mxu0 %v8752_v3  ;;  %v1462_v62 = vadd.f32 %v9928_v24, %v10006_v16  ;;  %v8754_v24 = vld [vmem:[%s10618_s3 + $0x80] sm:$0xff]   ;;  %v7447_v13 = vunpack.c.h.bf16 %v7542_v0  ;;  %v1874_v21 = vadd.f32 %v1864_v8, %v1463_v4  ;;  %v8762_v30 = vld [vmem:[%s10618_s3 + $0x170] sm:$0xff]  }
 0x147   : > { %v7698_v34 = vadd.f32 %v7697_v54, %v7696_v59  ;;  %v2352_v61 = vadd.f32 %v2351_v26, %v2345_v44  ;;  %v2284_v58 = vadd.f32 %v2268_v2, %v1872_v11  ;;  %8409 = vmatpush3.bf16.msra.mxu1 %v8748_v42  ;;  %v8819_v3 = vld [vmem:[%s10616_s1] ss:$0 sm:$0xff]  ;;  %v8770_v26 = vld [vmem:[#allocation2 + $0x158] ss:$12 sps:$4 sm:$0xff]  }
 0x148   : > { %v7699_v23 = vpop.f32.mrf.mxu0  ;;  %v1873_v16 = vadd.f32 %v1861_v29, %v1462_v62  ;;  %8410 = vmatprep.subr.bf16.mxu1 %v8751_v49  ;;  %v398_v60 = vmul.f32 %v8819_v3, %v7446_v33  ;;  %v399_v55 = vmul.f32 %v8819_v3, %v7447_v13  ;;  %v8820_v42 = vld [vmem:[%s10617_s2] ss:$0 sm:$0xff]  ;;  %v8775_v13 = vld [vmem:[%s10618_s3 + $0xd0] sm:$0xff]  }
 0x149   : > { %8041 = vmatpush3.bf16.msra.mxu0 %v8753_v46  ;;  %v2273_v45 = vadd.f32 %v10099_v43, %v7698_v34  ;;  %v7461_v5 = vpack.c.bf16 %v2284_v58, %v2283_v12  ;;  %v2331_v47 = vadd.f32 %v2330_v36, %v2284_v58  ;;  %v2346_v10 = vmul.f32 %v2284_v58, %v2284_v58  ;;  %v8758_v11 = vld [vmem:[#allocation2 + $0x140] ss:$12 sps:$4 sm:$0xff]  }
 0x14a   : > { %v7700_v56 = vpop.f32.mrf.mxu0  ;;  %8078 = vmatprep.subr.bf16.mxu0 %v8755_v31  ;;  %v437_v59 = vadd.f32 %v8820_v42, %v398_v60  ;;  %v438_v41 = vadd.f32 %v8820_v42, %v399_v55  ;;  %v8767_v34 = vld [vmem:[%s10618_s3 + $0xe0] sm:$0xff]   ;;  %v8776_v55 = vld [vmem:[%s10618_s3 + $0x150] sm:$0xff]  }
 0x14b   : > { %v7701_v14 = vadd.f32 %v7700_v56, %v7699_v23  ;;  %v2285_v51 = vadd.f32 %v2273_v45, %v1873_v16  ;;  %7544 = vst [vmem:[%s10097_s10 + $0x10] sm:$0xff] %v7461_v5   ;;  %v2353_v63 = vadd.f32 %v2352_v61, %v2346_v10  ;;  %8411 = vmatpush3.bf16.msra.mxu1 %v8751_v49  ;;  %v8769_v23 = vld [vmem:[%s10618_s3 + $0x118] sm:$0xff]   ;;  %v8780_v60 = vld [vmem:[%s10618_s3 + $0x100] sm:$0xff]  }
 0x14c   : > { %v7730_v43 = vpop.f32.mrf.mxu0  ;;  %5289 = vmatmul.mubr.bf16.vlgmr.msra.gmra.mxu0 %v9774_v9  ;;  %v8763_v9 = vld [vmem:[%s10618_s3 + $0x128] sm:$0xff]   ;;  %8412 = vmatprep.subr.bf16.mxu1 %v8754_v24  ;;  %v469_v54 = vmax.f32 %v437_v59, 0.0  ;;  %v470_v31 = vmax.f32 %v438_v41, 0.0  ;;  %v8771_v56 = vld [vmem:[%s10618_s3 + $0xd8] sm:$0xff]  }
 0x14d   : > { %v2276_v32 = vadd.f32 %v8253_v6, %v7701_v14  ;;  %8079 = vmatpush3.bf16.msra.mxu0 %v8757_v19  ;;  %5296 = vmatprep.mubr.bf16.mxu0 %v9860_v18  ;;  %v2332_v15 = vadd.f32 %v2331_v47, %v2285_v51  ;;  %v2347_v39 = vmul.f32 %v2285_v51, %v2285_v51  ;;  %v8764_v6 = vld [vmem:[%s10618_s3 + $0xe8] sm:$0xff]   ;;  %v8772_v5 = vld [vmem:[#allocation2 + $0x170] ss:$12 sps:$4 sm:$0xff]  }
 0x14e   : > { %v7731_v1 = vpop.f32.mrf.mxu0  ;;  %8080 = vmatprep.subr.bf16.mxu0 %v8760_v50  ;;  %v10190_v62 = vpack.c.bf16 %v470_v31, %v469_v54  ;;  %v8765_v19 = vld [vmem:[%s10618_s3 + $0x168] sm:$0xff]   ;;  %v8774_v50 = vld [vmem:[%s10618_s3 + $0x110] sm:$0xff]  }
 0x14f   : > { %v2286_v22 = vadd.f32 %v2276_v32, %v1874_v21  ;;  %v10165_v7 = vadd.f32 %v7731_v1, %v7730_v43  ;;  %v2354_v27 = vadd.f32 %v2353_v63, %v2347_v39  ;;  %8413 = vmatpush3.bf16.msra.mxu1 %v8754_v24  ;;  %v8784_v14 = vld [vmem:[#allocation2 + $0x140] ss:$12 sps:$4 sm:$0xff]   ;;  %v8789_v54 = vld [vmem:[%s10618_s3 + $0x1b0] sm:$0xff]  }
 0x150   : > { %v7733_v40 = vpop.f32.mrf.mxu0  ;;  %8422 = vmatprep.subr.bf16.mxu1 %v8759_v20  ;;  %v593_v8 = vshrl.u32 %v10190_v62, 16  ;;  %v596_v61 = vshll.u32 %v10190_v62, 16  ;;  %v8778_v1 = vld [vmem:[%s10618_s3 + $0xc8] sm:$0xff]  }
 0x151   : > { %v7466_v12 = vpack.c.bf16 %v2286_v22, %v2285_v51  ;;  %v10176_v25 = vadd.f32 %v2332_v15, %v2286_v22  ;;  %v2348_v46 = vmul.f32 %v2286_v22, %v2286_v22  ;;  %8081 = vmatpush3.bf16.msra.mxu0 %v8761_v38  ;;  %v8768_v51 = vld [vmem:[%s10618_s3 + $0x160] sm:$0xff]   ;;  %v8773_v15 = vld [vmem:[%s10618_s3 + $0x158] sm:$0xff]   ;;  %v8779_v59 = vld [vmem:[%s10618_s3 + $0x148] sm:$0xff]  }
 0x152   : > { %v7734_v29 = vpop.f32.mrf.mxu0  ;;  %8082 = vmatprep.subr.bf16.mxu0 %v8763_v9  ;;  %8415 = vmatmul.mubr.bf16.vlgmr.msra.gmra.mxu1 %v8758_v11  ;;  %v664_v16 = vrot.slane %v596_v61, 1  ;;  %v595_v45 = vrot.slane %v593_v8, 7  ;;  %v10230_v63 = vpop.f32.mrf.mxu1 }
 0x153   : > { %7545 = vst [vmem:[%s10097_s10 + $0x18] sm:$0xff] %v7466_v12   ;;  %v10185_v36 = vadd.f32 %v2354_v27, %v2348_v46  ;;  %v10187_v44 = vadd.f32 %v7734_v29, %v7733_v40  ;;  %8423 = vmatpush3.bf16.msra.mxu1 %v8759_v20  ;;  %8418 = vmatprep.mubr.bf16.mxu1 %v8770_v26  ;;  %v8781_v20 = vld [vmem:[%s10618_s3 + $0xc0] sm:$0xff]   ;;  %v8791_v26 = vld [vmem:[%s10618_s3 + $0x1e8] sm:$0xff]  }
 0x154   : > { %v7736_v2 = vpop.f32.mrf.mxu0  ;;  %5297 = vmatmul.mubr.bf16.gmra.mxu0 %v9897_v28  ;;  %8424 = vmatprep.subr.bf16.mxu1 %v8762_v30  ;;  %v665_v47 = vor.u32 %v664_v16, %v593_v8  ;;  %v598_v10 = vor.u32 %v596_v61, %v595_v45  ;;  %v10245_v9 = vpop.f32.mrf.mxu1  ;;  %v8782_v29 = vld [vmem:[%s10618_s3 + $0x140] sm:$0xff]   ;;  %v8790_v45 = vld [vmem:[%s10618_s3 + $0x230] sm:$0xff]  }
 0x155   : > { %8083 = vmatpush3.bf16.msra.mxu0 %v8764_v6  ;;  %5304 = vmatprep.mubr.bf16.mxu0 %v10020_v35  ;;  %v8783_v6 = vld [vmem:[%s10618_s3 + $0x1f8] sm:$0xff]   ;;  %v8794_v61 = vld [vmem:[%s10618_s3 + $0x1e0] sm:$0xff]  }
 0x156   : > { %v7737_v49 = vpop.f32.mrf.mxu0  ;;  %8084 = vmatprep.subr.bf16.mxu0 %v8766_v57  ;;  %v700_v43 = vsel %vm9016_vm4, %v665_v47, 0  ;;  %v10224_v33 = vsel %vm9024_vm5, 0, %v598_v10  ;;  %v10260_v27 = vpop.f32.mrf.mxu1  ;;  %v8788_v57 = vld [vmem:[%s10618_s3 + $0x1f0] sm:$0xff]   ;;  %v8797_v47 = vld [vmem:[%s10618_s3 + $0x1d8] sm:$0xff]  }
 0x157   : > { %v10201_v58 = vadd.f32 %v7737_v49, %v7736_v2  ;;  %8425 = vmatpush3.bf16.msra.mxu1 %v8762_v30  ;;  %v6472_v21 = vcombine.low %v700_v43, %v700_v43  ;;  %v6474_v53 = vcombine.high %v700_v43, %v700_v43  ;;  %v8792_v49 = vld [vmem:[%s10618_s3 + $0x1a8] sm:$0xff]  }
 0x158   : > { %v10206_v4 = vpop.f32.mrf.mxu0  ;;  %8426 = vmatprep.subr.bf16.mxu1 %v8765_v19  ;;  %v10275_v12 = vpop.f32.mrf.mxu1 }
 0x159   : > { %8085 = vmatpush3.bf16.msra.mxu0 %v8767_v34  ;;  %1044 = vst [vmem:[#allocation2 + $0x188] sm:$0xf] %v6472_v21  ;;  %1046 = vst [vmem:[#allocation2 + $0x194] sm:$0xf] %v6474_v53  ;;  %v8796_v53 = vld [vmem:[%s10618_s3 + $0x220] sm:$0xff]  }
 0x15a   : > { %v10214_v0 = vpop.f32.mrf.mxu0  ;;  %8086 = vmatprep.subr.bf16.mxu0 %v8769_v23  ;;  %8419 = vmatmul.mubr.bf16.gmra.mxu1 %v8772_v5  ;;  %v10282_v11 = vpop.f32.mrf.mxu1  ;;  %v8786_v23 = vld [vmem:[#allocation2 + $0x158] ss:$12 sps:$4 sm:$0xff]  }
 0x15b   : > { %8427 = vmatpush3.bf16.msra.mxu1 %v8765_v19  ;;  %8438 = vmatprep.mubr.bf16.mxu1 %v8784_v14  ;;  %v8798_v19 = vld [vmem:[#allocation2 + $0x170] ss:$12 sps:$4 sm:$0xff]   ;;  %v8793_v14 = vld [vmem:[%s10618_s3 + $0x228] sm:$0xff]  }
 0x15c   : > { %v7742_v24 = vpop.f32.mrf.mxu0  ;;  %5305 = vmatmul.mubr.bf16.gmra.mxu0 %v10071_v17  ;;  %8428 = vmatprep.subr.bf16.mxu1 %v8768_v51  ;;  %v10299_v2 = vpop.f32.mrf.mxu1 }
 0x15d   : > { %8087 = vmatpush3.bf16.msra.mxu0 %v8771_v56  ;;  %5312 = vmatprep.mubr.bf16.mxu0 %v10055_v37 }
 0x15e   : > { %v7743_v32 = vpop.f32.mrf.mxu0  ;;  %8088 = vmatprep.subr.bf16.mxu0 %v8774_v50  ;;  %v10314_v16 = vpop.f32.mrf.mxu1  ;;  %v8795_v50 = vld [vmem:[%s10618_s3 + $0x1a0] sm:$0xff]  }
 0x15f   : > { %v10235_v38 = vadd.f32 %v7743_v32, %v7742_v24  ;;  %8429 = vmatpush3.bf16.msra.mxu1 %v8768_v51  ;;  %v8799_v24 = vld [vmem:[%s10618_s3 + $0x198] sm:$0xff]   ;;  %v8802_v32 = vld [vmem:[%s10618_s3 + $0x1d0] sm:$0xff]  }
 0x160   : > { %v10240_v39 = vpop.f32.mrf.mxu0  ;;  %8430 = vmatprep.subr.bf16.mxu1 %v8773_v15  ;;  %v10331_v10 = vpop.f32.mrf.mxu1  ;;  %v8800_v21 = vld [vmem:[#allocation2 + $0x188] ss:$12 sps:$4 sm:$0xff]  }
 0x161   : > { %8089 = vmatpush3.bf16.msra.mxu0 %v8775_v13 }
 0x162   : > { %v10247_v3 = vpop.f32.mrf.mxu0  ;;  %8090 = vmatprep.subr.bf16.mxu0 %v8777_v48  ;;  %v8811_v48 = vld [vmem:[#allocation2 + $0x158] ss:$12 sps:$4 sm:$0xff]  }
 0x163   : > { %8431 = vmatpush3.bf16.msra.mxu1 %v8773_v15 }
 0x164   : > { %v7748_v22 = vpop.f32.mrf.mxu0  ;;  %5313 = vmatmul.mubr.bf16.gmra.mxu0 %v10114_v52  ;;  %8432 = vmatprep.subr.bf16.mxu1 %v8776_v55 }
 0x165   : > { %8091 = vmatpush3.bf16.msra.mxu0 %v8778_v1  ;;  %5699 = vmatprep.mubr.bf16.mxu0 %v9860_v18  ;;  %v8785_v18 = vld [vmem:[%s10618_s3 + $0x1b8] sm:$0xff]   ;;  %v8803_v1 = vld [vmem:[%s10618_s3 + $0x190] sm:$0xff]  }
 0x166   : > { %v7749_v40 = vpop.f32.mrf.mxu0  ;;  %8092 = vmatprep.subr.bf16.mxu0 %v8780_v60 }
 0x167   : > { %v10265_v42 = vadd.f32 %v7749_v40, %v7748_v22  ;;  %8433 = vmatpush3.bf16.msra.mxu1 %v8776_v55  ;;  %v8805_v22 = vld [vmem:[%s10618_s3 + $0x1c8] sm:$0xff]  }
 0x168   : > { %v10270_v41 = vpop.f32.mrf.mxu0  ;;  %8434 = vmatprep.subr.bf16.mxu1 %v8779_v59 }
 0x169   : > { %8093 = vmatpush3.bf16.msra.mxu0 %v8781_v20  ;;  %v8801_v20 = vld [vmem:[%s10618_s3 + $0x218] sm:$0xff]  }
 0x16a   : > { %v10277_v46 = vpop.f32.mrf.mxu0  ;;  %8130 = vmatprep.subr.bf16.mxu0 %v8783_v6  ;;  %v8806_v6 = vld [vmem:[%s10618_s3 + $0x188] sm:$0xff]  }
 0x16b   : > { %8435 = vmatpush3.bf16.msra.mxu1 %v8779_v59 }
 0x16c   : > { %v10287_v30 = vpop.f32.mrf.mxu0  ;;  %5700 = vmatmul.mubr.bf16.vlgmr.msra.gmra.mxu0 %v9897_v28  ;;  %8436 = vmatprep.subr.bf16.mxu1 %v8782_v29  ;;  %v8787_v28 = vld [vmem:[%s10618_s3 + $0x238] sm:$0xff]  }
 0x16d   : > { %8131 = vmatpush3.bf16.msra.mxu0 %v8785_v18  ;;  %5707 = vmatprep.mubr.bf16.mxu0 %v10020_v35 }
 0x16e   : > { %v10294_v31 = vpop.f32.mrf.mxu0  ;;  %8132 = vmatprep.subr.bf16.mxu0 %v8788_v57  ;;  %v8808_v57 = vld [vmem:[%s10618_s3 + $0x1c0] sm:$0xff]  }
 0x16f   : > { %8437 = vmatpush3.bf16.msra.mxu1 %v8782_v29  ;;  %v8804_v29 = vld [vmem:[%s10618_s3 + $0x210] sm:$0xff]  }
 0x170   : > { %v10304_v34 = vpop.f32.mrf.mxu0  ;;  %8446 = vmatprep.subr.bf16.mxu1 %v8787_v28 }
 0x171   : > { %8133 = vmatpush3.bf16.msra.mxu0 %v8789_v54 }
 0x172   : > { %v10309_v8 = vpop.f32.mrf.mxu0  ;;  %8134 = vmatprep.subr.bf16.mxu0 %v8791_v26  ;;  %8439 = vmatmul.mubr.bf16.vlgmr.msra.gmra.mxu1 %v8786_v23  ;;  %v10341_v43 = vpop.f32.mrf.mxu1  ;;  %v8809_v26 = vld [vmem:[%s10618_s3 + $0x180] sm:$0xff]  }
 0x173   : > { %8447 = vmatpush3.bf16.msra.mxu1 %v8787_v28  ;;  %8442 = vmatprep.mubr.bf16.mxu1 %v8798_v19 }
 0x174   : > { %v10319_v56 = vpop.f32.mrf.mxu0  ;;  %5708 = vmatmul.mubr.bf16.gmra.mxu0 %v10071_v17  ;;  %8448 = vmatprep.subr.bf16.mxu1 %v8790_v45  ;;  %v3146_v60 = vpop.f32.mrf.mxu1 }
 0x175   : > { %8135 = vmatpush3.bf16.msra.mxu0 %v8792_v49  ;;  %5715 = vmatprep.mubr.bf16.mxu0 %v10055_v37 }
 0x176   : > { %v10326_v5 = vpop.f32.mrf.mxu0  ;;  %8136 = vmatprep.subr.bf16.mxu0 %v8794_v61  ;;  %v10371_v59 = vpop.f32.mrf.mxu1  ;;  %v8807_v61 = vld [vmem:[%s10618_s3 + $0x208] sm:$0xff]  }
 0x177   : > { %8449 = vmatpush3.bf16.msra.mxu1 %v8790_v45 }
 0x178   : > { %v10336_v51 = vpop.f32.mrf.mxu0  ;;  %8450 = vmatprep.subr.bf16.mxu1 %v8793_v14  ;;  %v3149_v28 = vpop.f32.mrf.mxu1 }
 0x179   : > { %8137 = vmatpush3.bf16.msra.mxu0 %v8795_v50 }
 0x17a   : > { %v10343_v13 = vpop.f32.mrf.mxu0  ;;  %8138 = vmatprep.subr.bf16.mxu0 %v8797_v47  ;;  %8443 = vmatmul.mubr.bf16.gmra.mxu1 %v8800_v21  ;;  %v10390_v23 = vpop.f32.mrf.mxu1 }
 0x17b   : > { %8451 = vmatpush3.bf16.msra.mxu1 %v8793_v14  ;;  %8462 = vmatprep.mubr.bf16.mxu1 %v8811_v48  ;;  %v7790_v48 = vadd.f32 %v10326_v5, %v10319_v56  ;;  %v7793_v56 = vadd.f32 %v10343_v13, %v10336_v51 }
 0x17c   : > { %v10351_v15 = vpop.f32.mrf.mxu0  ;;  %5716 = vmatmul.mubr.bf16.gmra.mxu0 %v10114_v52  ;;  %8452 = vmatprep.subr.bf16.mxu1 %v8796_v53  ;;  %v10399_v50 = vpop.f32.mrf.mxu1 }
 0x17d   : > { %8139 = vmatpush3.bf16.msra.mxu0 %v8799_v24  ;;  %5723 = vmatprep.mubr.bf16.mxu0 %v10190_v62 }
 0x17e   : > { %v10358_v55 = vpop.f32.mrf.mxu0  ;;  %8140 = vmatprep.subr.bf16.mxu0 %v8802_v32  ;;  %v10406_v24 = vpop.f32.mrf.mxu1  ;;  %v7784_v32 = vadd.f32 %v10294_v31, %v10287_v30 }
 0x17f   : > { %8453 = vmatpush3.bf16.msra.mxu1 %v8796_v53  ;;  %v8812_v53 = vld [vmem:[#allocation2 + $0x170] ss:$12 sps:$4 sm:$0xff]  }
 0x180   : > { %v10366_v40 = vpop.f32.mrf.mxu0  ;;  %8454 = vmatprep.subr.bf16.mxu1 %v8801_v20  ;;  %v3165_v30 = vpop.f32.mrf.mxu1 }
 0x181   : > { %8141 = vmatpush3.bf16.msra.mxu0 %v8803_v1 }
 0x182   : > { %v10373_v18 = vpop.f32.mrf.mxu0  ;;  %8142 = vmatprep.subr.bf16.mxu0 %v8805_v22  ;;  %v7741_v22 = vadd.f32 %v10214_v0, %v10206_v4  ;;  %v3147_v4 = vadd.f32 %v7784_v32, %v3146_v60  ;;  %v3155_v0 = vadd.f32 %v10341_v43, %v7790_v48  ;;  %v3158_v60 = vadd.f32 %v10371_v59, %v7793_v56  ;;  %v8814_v48 = vld [vmem:[#allocation2 + $0x1a0] ss:$12 sps:$4 sm:$0xff]  }
 0x183   : > { %8455 = vmatpush3.bf16.msra.mxu1 %v8801_v20  ;;  %v2744_v20 = vadd.f32 %v10230_v63, %v10201_v58  ;;  %v2739_v58 = vadd.f32 %v10187_v44, %v10275_v12  ;;  %v7747_v44 = vadd.f32 %v10247_v3, %v10240_v39  ;;  %v2752_v3 = vadd.f32 %v10235_v38, %v10299_v2 }
 0x184   : > { %v10381_v54 = vpop.f32.mrf.mxu0  ;;  %5724 = vmatmul.mubr.bf16.gmra.mxu0 %v10224_v33  ;;  %8456 = vmatprep.subr.bf16.mxu1 %v8804_v29  ;;  %v2747_v63 = vadd.f32 %v10260_v27, %v7741_v22 }
 0x185   : > { %8143 = vmatpush3.bf16.msra.mxu0 %v8806_v6  ;;  %6110 = vmatprep.mubr.bf16.mxu0 %v10020_v35  ;;  %v8810_v35 = vld [vmem:[%s10618_s3 + $0x200] sm:$0xff]   ;;  %v7787_v6 = vadd.f32 %v10309_v8, %v10304_v34  ;;  %v2755_v59 = vadd.f32 %v7747_v44, %v10331_v10 }
 0x186   : > { %v10388_v49 = vpop.f32.mrf.mxu0  ;;  %8144 = vmatprep.subr.bf16.mxu0 %v8808_v57 }
 0x187   : > { %8457 = vmatpush3.bf16.msra.mxu1 %v8804_v29  ;;  %v3150_v27 = vadd.f32 %v7787_v6, %v3149_v28 }
 0x188   : > { %v10395_v19 = vpop.f32.mrf.mxu0  ;;  %8458 = vmatprep.subr.bf16.mxu1 %v8807_v61 }
 0x189   : > { %8145 = vmatpush3.bf16.msra.mxu0 %v8809_v26 }
 0x18a   : > { %v10397_v45 = vpop.f32.mrf.mxu0 }
 0x18b   : > { %8459 = vmatpush3.bf16.msra.mxu1 %v8807_v61 }
 0x18c   : > { %v7834_v47 = vpop.f32.mrf.mxu0  ;;  %6111 = vmatmul.mubr.bf16.vlgmr.msra.gmra.mxu0 %v10071_v17  ;;  %8460 = vmatprep.subr.bf16.mxu1 %v8810_v35  ;;  %v8813_v17 = vld [vmem:[#allocation2 + $0x188] ss:$12 sps:$4 sm:$0xff]  }
 0x18d   : > { %6118 = vmatprep.mubr.bf16.mxu0 %v10055_v37  ;;  %v2736_v37 = vadd.f32 %v10165_v7, %v10245_v9 }
 0x18e   : > { %v7835_v14 = vpop.f32.mrf.mxu0 }
 0x18f   : > { %8461 = vmatpush3.bf16.msra.mxu1 %v8810_v35  ;;  %v7836_v5 = vadd.f32 %v7835_v14, %v7834_v47  ;;  %v7796_v47 = vadd.f32 %v10358_v55, %v10351_v15 }
 0x190   : > { %v7837_v21 = vpop.f32.mrf.mxu0 }
 0x192   : > { %v7838_v1 = vpop.f32.mrf.mxu0  ;;  %v8320_v7 = vpop.f32.mrf.mxu1  ;;  %8463 = vmatmul.mubr.bf16.vlgmr.msra.gmra.mxu1 %v8812_v53 }
 0x193   : > { %8466 = vmatprep.mubr.bf16.mxu1 %v8813_v17  ;;  %v7839_v29 = vadd.f32 %v7838_v1, %v7837_v21  ;;  %v7799_v21 = vadd.f32 %v10373_v18, %v10366_v40 }
 0x194   : > { %v7840_v31 = vpop.f32.mrf.mxu0  ;;  %6119 = vmatmul.mubr.bf16.gmra.mxu0 %v10114_v52  ;;  %v10428_v52 = vld [vmem:[#allocation2] sm:$0xff]  ;;  %v3557_v12 = vpop.f32.mrf.mxu1 }
 0x195   : > { %6126 = vmatprep.mubr.bf16.mxu0 %v10190_v62  ;;  %v7306_v8 = vcombine.high %v10428_v52, %v10428_v52  ;;  %v10435_v62 = vld [vmem:[%s10619_s4] ss:$0 sm:$0xff]  ;;  %v3558_v57 = vadd.f32 %v7836_v5, %v3557_v12  ;;  %v7305_v10 = vcombine.low %v10428_v52, %v10428_v52  ;;  %v7753_v52 = vadd.f32 %v10277_v46, %v10270_v41 }
 0x196   : > { %v7841_v9 = vpop.f32.mrf.mxu0  ;;  %v2766_v51 = vadd.f32 %v10435_v62, %v2736_v37  ;;  %v2768_v43 = vadd.f32 %v10435_v62, %v2744_v20  ;;  %v8321_v14 = vpop.f32.mrf.mxu1  ;;  %v2767_v53 = vadd.f32 %v10435_v62, %v2739_v58  ;;  %v2769_v39 = vadd.f32 %v10435_v62, %v2747_v63 }
 0x197   : > { %v7842_v34 = vadd.f32 %v7841_v9, %v7840_v31  ;;  %v3163_v31 = vadd.f32 %v7796_v47, %v10399_v50  ;;  %v2770_v40 = vadd.f32 %v10435_v62, %v2752_v3 }
 0x198   : > { %v7843_v13 = vpop.f32.mrf.mxu0  ;;  %v3177_v61 = vadd.f32 %v3147_v4, %v2766_v51  ;;  %v3179_v35 = vadd.f32 %v3155_v0, %v2768_v43  ;;  %v3560_v22 = vpop.f32.mrf.mxu1  ;;  %v3178_v55 = vadd.f32 %v3150_v27, %v2767_v53  ;;  %v3180_v37 = vadd.f32 %v3158_v60, %v2769_v39 }
 0x199   : > { %v3566_v26 = vadd.f32 %v8320_v7, %v7842_v34  ;;  %v3561_v20 = vadd.f32 %v7839_v29, %v3560_v22  ;;  %v3166_v4 = vadd.f32 %v7799_v21, %v3165_v30  ;;  %v3181_v51 = vadd.f32 %v3163_v31, %v2770_v40 }
 0x19a   : > { %v7844_v32 = vpop.f32.mrf.mxu0  ;;  %v3588_v1 = vadd.f32 %v3558_v57, %v3177_v61  ;;  %8467 = vmatmul.mubr.bf16.gmra.mxu1 %v8814_v48  ;;  %v8324_v2 = vpop.f32.mrf.mxu1  ;;  %v7802_v43 = vadd.f32 %v10388_v49, %v10381_v54  ;;  %v2760_v29 = vadd.f32 %v10282_v11, %v10265_v42 }
 0x19b   : > { %v7845_v28 = vadd.f32 %v7844_v32, %v7843_v13  ;;  %v3590_v17 = vadd.f32 %v3566_v26, %v3179_v35  ;;  %v3589_v18 = vadd.f32 %v3561_v20, %v3178_v55  ;;  %v7805_v26 = vadd.f32 %v10397_v45, %v10395_v19 }
 0x19c   : > { %v7846_v15 = vpop.f32.mrf.mxu0  ;;  %6127 = vmatmul.mubr.bf16.gmra.mxu0 %v10224_v33  ;;  %v2771_v33 = vadd.f32 %v10435_v62, %v2755_v59  ;;  %v3651_v0 = vmul.f32 %v3588_v1, %v3588_v1  ;;  %v3573_v50 = vpop.f32.mrf.mxu1  ;;  %v3171_v32 = vadd.f32 %v10390_v23, %v7802_v43  ;;  %v2334_v19 = vrot.slane %v10176_v25, 4 }
 0x19d   : > { %v3569_v6 = vadd.f32 %v8321_v14, %v7845_v28  ;;  %6134 = vmatprep.mubr.bf16.mxu0 %v7306_v8  ;;  %v3653_v7 = vmul.f32 %v3590_v17, %v3590_v17  ;;  %v7471_v58 = vpack.c.bf16 %v3589_v18, %v3588_v1  ;;  %v3637_v63 = vadd.f32 %v3589_v18, %v3588_v1 }
 0x19e   : > { %v7847_v38 = vpop.f32.mrf.mxu0  ;;  %v3652_v34 = vmul.f32 %v3589_v18, %v3589_v18  ;;  %v8325_v12 = vpop.f32.mrf.mxu1  ;;  %v3182_v54 = vadd.f32 %v3166_v4, %v2771_v33  ;;  %v2763_v14 = vadd.f32 %v10314_v16, %v7753_v52  ;;  %v2772_v45 = vadd.f32 %v10435_v62, %v2760_v29 }
 0x19f   : > { %v3591_v56 = vadd.f32 %v3569_v6, %v3180_v37  ;;  %v7848_v5 = vadd.f32 %v7847_v38, %v7846_v15  ;;  %7546 = vst [vmem:[%s10097_s10 + $0x20] sm:$0xff] %v7471_v58   ;;  %v3638_v13 = vadd.f32 %v3637_v63, %v3590_v17  ;;  %v3174_v28 = vadd.f32 %v10406_v24, %v7805_v26 }
 0x1a0   : > { %v7849_v9 = vpop.f32.mrf.mxu0  ;;  %v3659_v30 = vadd.f32 %v3652_v34, %v3651_v0  ;;  %v3576_v61 = vpop.f32.mrf.mxu1  ;;  %v2356_v55 = vrot.slane %v10185_v36, 4  ;;  %v2773_v37 = vadd.f32 %v10435_v62, %v2763_v14 }
 0x1a1   : > { %v7476_v8 = vpack.c.bf16 %v3591_v56, %v3590_v17  ;;  %v3574_v44 = vadd.f32 %v7848_v5, %v3573_v50  ;;  %v3654_v60 = vmul.f32 %v3591_v56, %v3591_v56  ;;  %v3639_v35 = vadd.f32 %v3638_v13, %v3591_v56 }
 0x1a2   : > { %v7850_v27 = vpop.f32.mrf.mxu0  ;;  %v3660_v49 = vadd.f32 %v3659_v30, %v3653_v7  ;;  %v3183_v17 = vadd.f32 %v3171_v32, %v2772_v45  ;;  %v3184_v24 = vadd.f32 %v3174_v28, %v2773_v37 }
 0x1a3   : > { %7547 = vst [vmem:[%s10097_s10 + $0x28] sm:$0xff] %v7476_v8   ;;  %v7851_v57 = vadd.f32 %v7850_v27, %v7849_v9  ;;  %v3592_v41 = vadd.f32 %v3574_v44, %v3181_v51 }
 0x1a4   : > { %v7852_v46 = vpop.f32.mrf.mxu0  ;;  %6135 = vmatmul.mubr.bf16.gmra.mxu0 %v7305_v10  ;;  %v3661_v3 = vadd.f32 %v3660_v49, %v3654_v60  ;;  %v2335_v10 = vadd.f32 %v2334_v19, %v10176_v25 }
 0x1a5   : > { %v3577_v47 = vadd.f32 %v7851_v57, %v3576_v61  ;;  %v3655_v48 = vmul.f32 %v3592_v41, %v3592_v41  ;;  %v3640_v39 = vadd.f32 %v3639_v35, %v3592_v41 }
 0x1a6   : > { %v7853_v53 = vpop.f32.mrf.mxu0  ;;  %v2336_v9 = vrot.slane %v2335_v10, 2 }
 0x1a7   : > { %v3593_v42 = vadd.f32 %v3577_v47, %v3182_v54  ;;  %v7854_v11 = vadd.f32 %v7853_v53, %v7852_v46  ;;  %v3662_v21 = vadd.f32 %v3661_v3, %v3655_v48 }
 0x1a8   : > { %v7855_v59 = vpop.f32.mrf.mxu0  ;;  %v2337_v44 = vadd.f32 %v2336_v9, %v2335_v10 }
 0x1a9   : > { %v7481_v1 = vpack.c.bf16 %v3593_v42, %v3592_v41  ;;  %v3641_v22 = vadd.f32 %v3640_v39, %v3593_v42  ;;  %v3656_v16 = vmul.f32 %v3593_v42, %v3593_v42  ;;  %v3582_v23 = vadd.f32 %v8324_v2, %v7854_v11 }
 0x1aa   : > { %v7856_v15 = vpop.f32.mrf.mxu0  ;;  %v2357_v2 = vadd.f32 %v2356_v55, %v10185_v36  ;;  %v2338_v26 = vrot.slane %v2337_v44, 1 }
 0x1ab   : > { %7548 = vst [vmem:[%s10097_s10 + $0x30] sm:$0xff] %v7481_v1   ;;  %v3663_v20 = vadd.f32 %v3662_v21, %v3656_v16  ;;  %v7857_v6 = vadd.f32 %v7856_v15, %v7855_v59  ;;  %v3594_v31 = vadd.f32 %v3582_v23, %v3183_v17 }
 0x1ac   : > { %v7886_v38 = vpop.f32.mrf.mxu0  ;;  %v2358_v8 = vrot.slane %v2357_v2, 2  ;;  %v2339_v14 = vadd.f32 %v2338_v26, %v2337_v44 }
 0x1ad   : > { %v3585_v40 = vadd.f32 %v8325_v12, %v7857_v6  ;;  %v3642_v18 = vadd.f32 %v3641_v22, %v3594_v31  ;;  %v3657_v56 = vmul.f32 %v3594_v31, %v3594_v31 }
 0x1ae   : > { %v7887_v5 = vpop.f32.mrf.mxu0  ;;  %v2359_v30 = vadd.f32 %v2358_v8, %v2357_v2 }
 0x1af   : > { %v3595_v33 = vadd.f32 %v3585_v40, %v3184_v24  ;;  %v10477_v4 = vadd.f32 %v7887_v5, %v7886_v38  ;;  %v3664_v0 = vadd.f32 %v3663_v20, %v3657_v56 }
 0x1b0   : > { %v7889_v7 = vpop.f32.mrf.mxu0  ;;  %v2360_v54 = vrot.slane %v2359_v30, 1 }
 0x1b1   : > { %v7486_v50 = vpack.c.bf16 %v3595_v33, %v3594_v31  ;;  %v3643_v58 = vadd.f32 %v3642_v18, %v3595_v33  ;;  %v3658_v63 = vmul.f32 %v3595_v33, %v3595_v33 }
 0x1b2   : > { %v7890_v34 = vpop.f32.mrf.mxu0  ;;  %v8344_v53 = vpop.f32.mrf.mxu1  ;;  %v2361_v3 = vadd.f32 %v2360_v54, %v2359_v30 }
 0x1b3   : > { %7549 = vst [vmem:[%s10097_s10 + $0x38] sm:$0xff] %v7486_v50   ;;  %v3644_v25 = vrot.slane %v3643_v58, 4  ;;  %v3665_v52 = vadd.f32 %v3664_v0, %v3658_v63  ;;  %v10480_v51 = vadd.f32 %v7890_v34, %v7889_v7 }
 0x1b4   : > { %v7892_v43 = vpop.f32.mrf.mxu0  ;;  %v4045_v59 = vpop.f32.mrf.mxu1 }
 0x1b5   : > { %v3645_v27 = vadd.f32 %v3644_v25, %v3643_v58  ;;  %v3666_v36 = vrot.slane %v3665_v52, 4  ;;  %v4046_v54 = vadd.f32 %v10477_v4, %v4045_v59 }
 0x1b6   : > { %v7893_v12 = vpop.f32.mrf.mxu0  ;;  %v8345_v22 = vpop.f32.mrf.mxu1 }
 0x1b7   : > { %v3646_v13 = vrot.slane %v3645_v27, 2  ;;  %v3667_v60 = vadd.f32 %v3666_v36, %v3665_v52  ;;  %v10482_v57 = vadd.f32 %v7893_v12, %v7892_v43 }
 0x1b8   : > { %v7895_v29 = vpop.f32.mrf.mxu0  ;;  %v4048_v15 = vpop.f32.mrf.mxu1 }
 0x1b9   : > { %v3647_v41 = vadd.f32 %v3646_v13, %v3645_v27  ;;  %v3668_v46 = vrot.slane %v3667_v60, 2 }
 0x1ba   : > { %v7896_v61 = vpop.f32.mrf.mxu0  ;;  %v10496_v37 = vpop.f32.mrf.mxu1 }
 0x1bb   : > { %v3648_v49 = vrot.slane %v3647_v41, 1  ;;  %v3669_v35 = vadd.f32 %v3668_v46, %v3667_v60  ;;  %v7897_v46 = vadd.f32 %v7896_v61, %v7895_v29 }
 0x1bc   : > { %v7898_v47 = vpop.f32.mrf.mxu0  ;;  %v4061_v31 = vpop.f32.mrf.mxu1 }
 0x1bd   : > { %v3649_v32 = vadd.f32 %v3648_v49, %v3647_v41  ;;  %v3670_v48 = vrot.slane %v3669_v35, 1  ;;  %v4054_v49 = vadd.f32 %v8344_v53, %v10482_v57 }
 0x1be   : > { %v7899_v39 = vpop.f32.mrf.mxu0  ;;  %v10498_v24 = vpop.f32.mrf.mxu1 }
 0x1bf   : > { %v10484_v42 = vadd.f32 %v3649_v32, %v2339_v14  ;;  %v3671_v11 = vadd.f32 %v3670_v48, %v3669_v35  ;;  %v10486_v19 = vadd.f32 %v7899_v39, %v7898_v47  ;;  %v4078_v29 = vadd.f32 %v10435_v62, %v4054_v49 }
 0x1c0   : > { %v7901_v45 = vpop.f32.mrf.mxu0  ;;  %v4064_v56 = vpop.f32.mrf.mxu1 }
 0x1c1   : > { %v10488_v28 = vadd.f32 %v3671_v11, %v2361_v3 }
 0x1c2   : > { %v7902_v21 = vpop.f32.mrf.mxu0 }
 0x1c3   : > { %10627 = vst [vmem:[#allocation3_spill] sm:$0xff] %v10488_v28  ;;  %v4057_v28 = vadd.f32 %v8345_v22, %v7897_v46  ;;  %v7903_v4 = vadd.f32 %v7902_v21, %v7901_v45 }
 0x1c4   : > { %v7904_v1 = vpop.f32.mrf.mxu0 }
 0x1c5   : > { %v4079_v22 = vadd.f32 %v10435_v62, %v4057_v28  ;;  %v4065_v45 = vadd.f32 %v7903_v4, %v4064_v56 }
 0x1c6   : > { %v7905_v16 = vpop.f32.mrf.mxu0 }
 0x1c7   : > { %v10490_v17 = vadd.f32 %v7905_v16, %v7904_v1  ;;  %v4049_v16 = vadd.f32 %v10480_v51, %v4048_v15  ;;  %v4062_v15 = vadd.f32 %v10486_v19, %v4061_v31  ;;  %v4081_v19 = vadd.f32 %v10435_v62, %v4065_v45 }
 0x1c8   : > { %v10492_v23 = vpop.f32.mrf.mxu0 }
 0x1c9   : > { %v4077_v51 = vadd.f32 %v10435_v62, %v4049_v16  ;;  %v4080_v49 = vadd.f32 %v10435_v62, %v4062_v15 }
 0x1ca   : > { %v10494_v55 = vpop.f32.mrf.mxu0 }
 0x1cc   : > { %v7938_v20 = vpop.f32.mrf.mxu0 }
 0x1ce   : > { %v7939_v6 = vpop.f32.mrf.mxu0 }
 0x1cf   : > { %v7940_v60 = vadd.f32 %v7939_v6, %v7938_v20  ;;  %v4076_v6 = vadd.f32 %v10435_v62, %v4046_v54 }
 0x1d0   : > { %v7941_v38 = vpop.f32.mrf.mxu0 }
 0x1d2   : > { %v7942_v10 = vpop.f32.mrf.mxu0  ;;  %v8368_v2 = vpop.f32.mrf.mxu1 }
 0x1d3   : > { %v7943_v35 = vadd.f32 %v7942_v10, %v7941_v38 }
 0x1d4   : > { %v7944_v40 = vpop.f32.mrf.mxu0  ;;  %v4456_v7 = vpop.f32.mrf.mxu1 }
 0x1d5   : > { %v4457_v39 = vadd.f32 %v7940_v60, %v4456_v7 }
 0x1d6   : > { %v7945_v18 = vpop.f32.mrf.mxu0  ;;  %v8369_v58 = vpop.f32.mrf.mxu1 }
 0x1d7   : > { %v7946_v26 = vadd.f32 %v7945_v18, %v7944_v40  ;;  %v4487_v18 = vadd.f32 %v4457_v39, %v4076_v6 }
 0x1d8   : > { %v7947_v5 = vpop.f32.mrf.mxu0  ;;  %v4459_v8 = vpop.f32.mrf.mxu1 }
 0x1d9   : > { %v4465_v3 = vadd.f32 %v8368_v2, %v7946_v26  ;;  %v4460_v61 = vadd.f32 %v7943_v35, %v4459_v8 }
 0x1da   : > { %v7948_v33 = vpop.f32.mrf.mxu0  ;;  %v10504_v52 = vpop.f32.mrf.mxu1 }
 0x1db   : > { %v7949_v32 = vadd.f32 %v7948_v33, %v7947_v5  ;;  %v4489_v5 = vadd.f32 %v4465_v3, %v4078_v29 }
 0x1dc   : > { %v7950_v0 = vpop.f32.mrf.mxu0  ;;  %v4472_v27 = vpop.f32.mrf.mxu1 }
 0x1dd   : > { %v4468_v59 = vadd.f32 %v8369_v58, %v7949_v32 }
 0x1de   : > { %v7951_v9 = vpop.f32.mrf.mxu0  ;;  %v10510_v30 = vpop.f32.mrf.mxu1 }
 0x1df   : > { %v7952_v2 = vadd.f32 %v7951_v9, %v7950_v0  ;;  %v4490_v26 = vadd.f32 %v4468_v59, %v4079_v22 }
 0x1e0   : > { %v7953_v50 = vpop.f32.mrf.mxu0  ;;  %v4475_v47 = vpop.f32.mrf.mxu1 }
 0x1e1   : > { %v4473_v0 = vadd.f32 %v7952_v2, %v4472_v27 }
 0x1e2   : > { %v7954_v63 = vpop.f32.mrf.mxu0 }
 0x1e3   : > { %v7955_v21 = vadd.f32 %v7954_v63, %v7953_v50 }
 0x1e4   : > { %v10500_v34 = vpop.f32.mrf.mxu0 }
 0x1e5   : > { %v4476_v31 = vadd.f32 %v7955_v21, %v4475_v47 }
 0x1e6   : > { %v10502_v25 = vpop.f32.mrf.mxu0 }
 0x1e7   : > { %v7958_v16 = vadd.f32 %v10502_v25, %v10500_v34 }
 0x1e8   : > { %v10506_v43 = vpop.f32.mrf.mxu0 }
 0x1ea   : > { %v10508_v44 = vpop.f32.mrf.mxu0 }
 0x1eb   : > { %v7961_v59 = vadd.f32 %v10508_v44, %v10506_v43 }
 0x1ec   : > { %v7990_v36 = vpop.f32.mrf.mxu0 }
 0x1ed   : > { %v4484_v44 = vadd.f32 %v10510_v30, %v7961_v59 }
 0x1ee   : > { %v7991_v12 = vpop.f32.mrf.mxu0 }
 0x1ef   : > { %v7992_v48 = vadd.f32 %v7991_v12, %v7990_v36 }
 0x1f0   : > { %v7993_v13 = vpop.f32.mrf.mxu0 }
 0x1f2   : > { %v7994_v41 = vpop.f32.mrf.mxu0  ;;  %v8392_v11 = vpop.f32.mrf.mxu1 }
 0x1f3   : > { %v7995_v10 = vadd.f32 %v7994_v41, %v7993_v13  ;;  %v4488_v13 = vadd.f32 %v4460_v61, %v4077_v51 }
 0x1f4   : > { %v7996_v14 = vpop.f32.mrf.mxu0  ;;  %v4867_v57 = vpop.f32.mrf.mxu1 }
 0x1f5   : > { %v4868_v38 = vadd.f32 %v7992_v48, %v4867_v57 }
 0x1f6   : > { %v7997_v1 = vpop.f32.mrf.mxu0  ;;  %v8393_v33 = vpop.f32.mrf.mxu1 }
 0x1f7   : > { %v7998_v20 = vadd.f32 %v7997_v1, %v7996_v14  ;;  %v4898_v8 = vadd.f32 %v4868_v38, %v4487_v18  ;;  %v4491_v1 = vadd.f32 %v4473_v0, %v4080_v49 }
 0x1f8   : > { %v7999_v53 = vpop.f32.mrf.mxu0  ;;  %v4870_v12 = vpop.f32.mrf.mxu1 }
 0x1f9   : > { %v4876_v40 = vadd.f32 %v8392_v11, %v7998_v20  ;;  %v4871_v41 = vadd.f32 %v7995_v10, %v4870_v12  ;;  %v4961_v56 = vmul.f32 %v4898_v8, %v4898_v8  ;;  %v7909_v11 = vadd.f32 %v10494_v55, %v10492_v23 }
 0x1fa   : > { %v8000_v7 = vpop.f32.mrf.mxu0  ;;  %v8396_v54 = vpop.f32.mrf.mxu1  ;;  %v4492_v10 = vadd.f32 %v4476_v31, %v4081_v19 }
 0x1fb   : > { %v8001_v36 = vadd.f32 %v8000_v7, %v7999_v53  ;;  %v4900_v58 = vadd.f32 %v4876_v40, %v4489_v5  ;;  %v4899_v35 = vadd.f32 %v4871_v41, %v4488_v13  ;;  %v4070_v53 = vadd.f32 %v10496_v37, %v10490_v17 }
 0x1fc   : > { %v8002_v60 = vpop.f32.mrf.mxu0  ;;  %v4883_v32 = vpop.f32.mrf.mxu1  ;;  %v4073_v18 = vadd.f32 %v10498_v24, %v7909_v11  ;;  %v4481_v5 = vadd.f32 %v10504_v52, %v7958_v16 }
 0x1fd   : > { %v4879_v46 = vadd.f32 %v8393_v33, %v8001_v36  ;;  %v4963_v50 = vmul.f32 %v4900_v58, %v4900_v58  ;;  %v7491_v48 = vpack.c.bf16 %v4899_v35, %v4898_v8  ;;  %v4947_v39 = vadd.f32 %v4899_v35, %v4898_v8 }
 0x1fe   : > { %v8003_v9 = vpop.f32.mrf.mxu0  ;;  %v4962_v3 = vmul.f32 %v4899_v35, %v4899_v35  ;;  %v8397_v29 = vpop.f32.mrf.mxu1  ;;  %v4082_v43 = vadd.f32 %v10435_v62, %v4070_v53  ;;  %v4083_v52 = vadd.f32 %v10435_v62, %v4073_v18 }
 0x1ff   : > { %v4901_v28 = vadd.f32 %v4879_v46, %v4490_v26  ;;  %v8004_v14 = vadd.f32 %v8003_v9, %v8002_v60  ;;  %7550 = vst [vmem:[%s10097_s10 + $0x40] sm:$0xff] %v7491_v48   ;;  %v4948_v4 = vadd.f32 %v4947_v39, %v4900_v58 }
 0x200   : > { %v8005_v63 = vpop.f32.mrf.mxu0  ;;  %v4969_v47 = vadd.f32 %v4962_v3, %v4961_v56  ;;  %v4886_v38 = vpop.f32.mrf.mxu1  ;;  %v4493_v8 = vadd.f32 %v4481_v5, %v4082_v43  ;;  %v4494_v41 = vadd.f32 %v4484_v44, %v4083_v52 }
 0x201   : > { %v7496_v27 = vpack.c.bf16 %v4901_v28, %v4900_v58  ;;  %v4884_v20 = vadd.f32 %v8004_v14, %v4883_v32  ;;  %v4964_v61 = vmul.f32 %v4901_v28, %v4901_v28  ;;  %v4949_v25 = vadd.f32 %v4948_v4, %v4901_v28 }
 0x202   : > { %v8006_v6 = vpop.f32.mrf.mxu0  ;;  %v4970_v34 = vadd.f32 %v4969_v47, %v4963_v50 }
 0x203   : > { %7551 = vst [vmem:[%s10097_s10 + $0x48] sm:$0xff] %v7496_v27   ;;  %v8007_v57 = vadd.f32 %v8006_v6, %v8005_v63  ;;  %v4902_v23 = vadd.f32 %v4884_v20, %v4491_v1 }
 0x204   : > { %v8008_v55 = vpop.f32.mrf.mxu0  ;;  %v4971_v51 = vadd.f32 %v4970_v34, %v4964_v61 }
 0x205   : > { %v4887_v40 = vadd.f32 %v8007_v57, %v4886_v38  ;;  %v4965_v2 = vmul.f32 %v4902_v23, %v4902_v23  ;;  %v4950_v7 = vadd.f32 %v4949_v25, %v4902_v23 }
 0x206   : > { %v8009_v33 = vpop.f32.mrf.mxu0 }
 0x207   : > { %v4903_v17 = vadd.f32 %v4887_v40, %v4492_v10  ;;  %v8010_v37 = vadd.f32 %v8009_v33, %v8008_v55  ;;  %v4972_v15 = vadd.f32 %v4971_v51, %v4965_v2  ;;  %v10629_v40 = vld [vmem:[#allocation3_spill] sm:$0xff] }
 0x208   : > { %v8011_v22 = vpop.f32.mrf.mxu0 }
 0x209   : > { %v7501_v36 = vpack.c.bf16 %v4903_v17, %v4902_v23  ;;  %v4951_v45 = vadd.f32 %v4950_v7, %v4903_v17  ;;  %v4966_v21 = vmul.f32 %v4903_v17, %v4903_v17  ;;  %v4892_v24 = vadd.f32 %v8396_v54, %v8010_v37 }
 0x20a   : > { %v8012_v12 = vpop.f32.mrf.mxu0 }
 0x20b   : > { %7552 = vst [vmem:[%s10097_s10 + $0x50] sm:$0xff] %v7501_v36   ;;  %v4973_v58 = vadd.f32 %v4972_v15, %v4966_v21  ;;  %v8013_v60 = vadd.f32 %v8012_v12, %v8011_v22  ;;  %v4904_v13 = vadd.f32 %v4892_v24, %v4493_v8 }
 0x20c   : > { %v8042_v26 = vpop.f32.mrf.mxu0 }
 0x20d   : > { %v4895_v46 = vadd.f32 %v8397_v29, %v8013_v60  ;;  %v4952_v0 = vadd.f32 %v4951_v45, %v4904_v13  ;;  %v4967_v30 = vmul.f32 %v4904_v13, %v4904_v13 }
 0x20e   : > { %v8043_v9 = vpop.f32.mrf.mxu0 }
 0x20f   : > { %v4905_v49 = vadd.f32 %v4895_v46, %v4494_v41  ;;  %v10538_v35 = vadd.f32 %v8043_v9, %v8042_v26  ;;  %v4974_v28 = vadd.f32 %v4973_v58, %v4967_v30 }
 0x210   : > { %v8045_v14 = vpop.f32.mrf.mxu0 }
 0x211   : > { %v7506_v54 = vpack.c.bf16 %v4905_v49, %v4904_v13  ;;  %v4953_v19 = vadd.f32 %v4952_v0, %v4905_v49  ;;  %v4968_v31 = vmul.f32 %v4905_v49, %v4905_v49 }
 0x212   : > { %v8046_v56 = vpop.f32.mrf.mxu0  ;;  %v8416_v23 = vpop.f32.mrf.mxu1 }
 0x213   : > { %7553 = vst [vmem:[%s10097_s10 + $0x58] sm:$0xff] %v7506_v54   ;;  %v4954_v50 = vrot.slane %v4953_v19, 4  ;;  %v4975_v63 = vadd.f32 %v4974_v28, %v4968_v31  ;;  %v10541_v32 = vadd.f32 %v8046_v56, %v8045_v14 }
 0x214   : > { %v8048_v48 = vpop.f32.mrf.mxu0  ;;  %v5355_v5 = vpop.f32.mrf.mxu1 }
 0x215   : > { %v4955_v39 = vadd.f32 %v4954_v50, %v4953_v19  ;;  %v4976_v3 = vrot.slane %v4975_v63, 4 }
 0x216   : > { %v8049_v27 = vpop.f32.mrf.mxu0  ;;  %v8417_v7 = vpop.f32.mrf.mxu1 }
 0x217   : > { %v4956_v11 = vrot.slane %v4955_v39, 2  ;;  %v4977_v1 = vadd.f32 %v4976_v3, %v4975_v63  ;;  %v8050_v16 = vadd.f32 %v8049_v27, %v8048_v48 }
 0x218   : > { %v8051_v20 = vpop.f32.mrf.mxu0  ;;  %v5358_v37 = vpop.f32.mrf.mxu1 }
 0x219   : > { %v4957_v6 = vadd.f32 %v4956_v11, %v4955_v39  ;;  %v4978_v29 = vrot.slane %v4977_v1, 2 }
 0x21a   : > { %v8052_v47 = vpop.f32.mrf.mxu0 }
 0x21b   : > { %v4958_v4 = vrot.slane %v4957_v6, 1  ;;  %v4979_v61 = vadd.f32 %v4978_v29, %v4977_v1  ;;  %v8053_v11 = vadd.f32 %v8052_v47, %v8051_v20  ;;  %v5356_v1 = vadd.f32 %v10538_v35, %v5355_v5 }
 0x21c   : > { %v8054_v57 = vpop.f32.mrf.mxu0 }
 0x21d   : > { %v4959_v53 = vadd.f32 %v4958_v4, %v4957_v6  ;;  %v4980_v59 = vrot.slane %v4979_v61, 1  ;;  %v5364_v6 = vadd.f32 %v8416_v23, %v8050_v16 }
 0x21e   : > { %v8055_v55 = vpop.f32.mrf.mxu0 }
 0x21f   : > { %v10544_v38 = vadd.f32 %v4959_v53, %v10484_v42  ;;  %v4981_v10 = vadd.f32 %v4980_v59, %v4979_v61  ;;  %v10546_v34 = vadd.f32 %v8055_v55, %v8054_v57  ;;  %v10559_v42 = vpop.f32.mrf.mxu1  ;;  %v5388_v20 = vadd.f32 %v10435_v62, %v5364_v6 }
 0x220   : > { %v8057_v25 = vpop.f32.mrf.mxu0 }
 0x221   : > { %10628 = vst [vmem:[#allocation4_spill] sm:$0xff] %v10544_v38  ;;  %v10549_v18 = vadd.f32 %v4981_v10, %v10629_v40  ;;  %v5371_v15 = vpop.f32.mrf.mxu1  ;;  %v5367_v38 = vadd.f32 %v8417_v7, %v8053_v11 }
 0x222   : > { %v8058_v2 = vpop.f32.mrf.mxu0 }
 0x223   : > { %10630 = vst [vmem:[#allocation3_spill] sm:$0xff] %v10549_v18  ;;  %v10561_v21 = vpop.f32.mrf.mxu1  ;;  %v5359_v18 = vadd.f32 %v10541_v32, %v5358_v37 }
 0x224   : > { %v10551_v33 = vpop.f32.mrf.mxu0 }
 0x225   : > { %v5374_v12 = vpop.f32.mrf.mxu1 }
 0x226   : > { %v10553_v51 = vpop.f32.mrf.mxu0 }
 0x228   : > { %v10555_v17 = vpop.f32.mrf.mxu0 }
 0x22a   : > { %v10557_v43 = vpop.f32.mrf.mxu0 }
 0x22c   : > { %v8094_v44 = vpop.f32.mrf.mxu0 }
 0x22e   : > { %v8095_v22 = vpop.f32.mrf.mxu0 }
 0x22f   : > { %v8096_v39 = vadd.f32 %v8095_v22, %v8094_v44  ;;  %v5386_v22 = vadd.f32 %v10435_v62, %v5356_v1 }
 0x230   : > { %v8097_v36 = vpop.f32.mrf.mxu0 }
 0x232   : > { %v8098_v45 = vpop.f32.mrf.mxu0  ;;  %v8440_v58 = vpop.f32.mrf.mxu1 }
 0x233   : > { %v8099_v29 = vadd.f32 %v8098_v45, %v8097_v36 }
 0x234   : > { %v8100_v8 = vpop.f32.mrf.mxu0  ;;  %v5766_v26 = vpop.f32.mrf.mxu1 }
 0x235   : > { %v5767_v59 = vadd.f32 %v8096_v39, %v5766_v26 }
 0x236   : > { %v8101_v24 = vpop.f32.mrf.mxu0  ;;  %v8441_v0 = vpop.f32.mrf.mxu1 }
 0x237   : > { %v8102_v3 = vadd.f32 %v8101_v24, %v8100_v8  ;;  %v5372_v8 = vadd.f32 %v10546_v34, %v5371_v15  ;;  %v5797_v24 = vadd.f32 %v5767_v59, %v5386_v22  ;;  %v8065_v59 = vadd.f32 %v10557_v43, %v10555_v17 }
 0x238   : > { %v8103_v52 = vpop.f32.mrf.mxu0  ;;  %v5769_v49 = vpop.f32.mrf.mxu1 }
 0x239   : > { %v5775_v55 = vadd.f32 %v8440_v58, %v8102_v3  ;;  %v5770_v35 = vadd.f32 %v8099_v29, %v5769_v49  ;;  %v5390_v15 = vadd.f32 %v10435_v62, %v5372_v8 }
 0x23a   : > { %v8104_v60 = vpop.f32.mrf.mxu0  ;;  %v10567_v14 = vpop.f32.mrf.mxu1 }
 0x23b   : > { %v8105_v57 = vadd.f32 %v8104_v60, %v8103_v52  ;;  %v5799_v52 = vadd.f32 %v5775_v55, %v5388_v20 }
 0x23c   : > { %v8106_v13 = vpop.f32.mrf.mxu0  ;;  %v5782_v31 = vpop.f32.mrf.mxu1 }
 0x23d   : > { %v5778_v23 = vadd.f32 %v8441_v0, %v8105_v57 }
 0x23e   : > { %v8107_v41 = vpop.f32.mrf.mxu0  ;;  %v10573_v63 = vpop.f32.mrf.mxu1 }
 0x23f   : > { %10631 = vst [vmem:[#allocation5_spill] sm:$0xff] %v10573_v63  ;;  %v8059_v63 = vadd.f32 %v8058_v2, %v8057_v25  ;;  %v8108_v58 = vadd.f32 %v8107_v41, %v8106_v13  ;;  %v5387_v25 = vadd.f32 %v10435_v62, %v5359_v18  ;;  %v5389_v2 = vadd.f32 %v10435_v62, %v5367_v38 }
 0x240   : > { %v8109_v46 = vpop.f32.mrf.mxu0  ;;  %v5785_v4 = vpop.f32.mrf.mxu1 }
 0x241   : > { %v5375_v37 = vadd.f32 %v8059_v63, %v5374_v12  ;;  %v5800_v39 = vadd.f32 %v5778_v23, %v5389_v2  ;;  %v5783_v13 = vadd.f32 %v8108_v58, %v5782_v31 }
 0x242   : > { %v8110_v30 = vpop.f32.mrf.mxu0 }
 0x243   : > { %v8111_v26 = vadd.f32 %v8110_v30, %v8109_v46  ;;  %v5391_v18 = vadd.f32 %v10435_v62, %v5375_v37  ;;  %v8062_v46 = vadd.f32 %v10553_v51, %v10551_v33  ;;  %v5801_v55 = vadd.f32 %v5783_v13, %v5390_v15 }
 0x244   : > { %v10563_v9 = vpop.f32.mrf.mxu0 }
 0x245   : > { %v5786_v30 = vadd.f32 %v8111_v26, %v5785_v4 }
 0x246   : > { %v10565_v28 = vpop.f32.mrf.mxu0  ;;  %v10632_v2 = vld [vmem:[#allocation5_spill] sm:$0xff] }
 0x248   : > { %v10569_v54 = vpop.f32.mrf.mxu0 }
 0x24a   : > { %v10571_v19 = vpop.f32.mrf.mxu0 }
 0x24b   : > { %v8117_v17 = vadd.f32 %v10571_v19, %v10569_v54 }
 0x24c   : > { %v8146_v56 = vpop.f32.mrf.mxu0 }
 0x24d   : > { %v5794_v37 = vadd.f32 %v10632_v2, %v8117_v17 }
 0x24e   : > { %v8147_v50 = vpop.f32.mrf.mxu0 }
 0x24f   : > { %v8148_v53 = vadd.f32 %v8147_v50, %v8146_v56 }
 0x250   : > { %v8149_v48 = vpop.f32.mrf.mxu0 }
 0x252   : > { %v8150_v27 = vpop.f32.mrf.mxu0  ;;  %v8464_v10 = vpop.f32.mrf.mxu1 }
 0x253   : > { %v8151_v36 = vadd.f32 %v8150_v27, %v8149_v48  ;;  %v5798_v48 = vadd.f32 %v5770_v35, %v5387_v25  ;;  %v5380_v35 = vadd.f32 %v10559_v42, %v8062_v46 }
 0x254   : > { %v8152_v61 = vpop.f32.mrf.mxu0  ;;  %v6177_v16 = vpop.f32.mrf.mxu1 }
 0x255   : > { %v6178_v5 = vadd.f32 %v8148_v53, %v6177_v16  ;;  %v5802_v16 = vadd.f32 %v5786_v30, %v5391_v18 }
 0x256   : > { %v8153_v40 = vpop.f32.mrf.mxu0  ;;  %v8465_v32 = vpop.f32.mrf.mxu1 }
 0x257   : > { %v8154_v44 = vadd.f32 %v8153_v40, %v8152_v61  ;;  %v6208_v49 = vadd.f32 %v6178_v5, %v5797_v24 }
 0x258   : > { %v8155_v47 = vpop.f32.mrf.mxu0  ;;  %v6180_v56 = vpop.f32.mrf.mxu1 }
 0x259   : > { %v6186_v45 = vadd.f32 %v8464_v10, %v8154_v44  ;;  %v6181_v3 = vadd.f32 %v8151_v36, %v6180_v56  ;;  %v6271_v63 = vmul.f32 %v6208_v49, %v6208_v49  ;;  %v8114_v10 = vadd.f32 %v10565_v28, %v10563_v9 }
 0x25a   : > { %v8156_v7 = vpop.f32.mrf.mxu0  ;;  %v8468_v41 = vpop.f32.mrf.mxu1  ;;  %v5383_v36 = vadd.f32 %v10561_v21, %v8065_v59 }
 0x25b   : > { %v8157_v60 = vadd.f32 %v8156_v7, %v8155_v47  ;;  %v6210_v0 = vadd.f32 %v6186_v45, %v5799_v52  ;;  %v6209_v11 = vadd.f32 %v6181_v3, %v5798_v48  ;;  %v5791_v45 = vadd.f32 %v10567_v14, %v8114_v10  ;;  %v10634_v10 = vld [vmem:[#allocation3_spill] sm:$0xff] }
 0x25c   : > { %v8158_v50 = vpop.f32.mrf.mxu0  ;;  %v6193_v6 = vpop.f32.mrf.mxu1  ;;  %v5392_v7 = vadd.f32 %v10435_v62, %v5380_v35  ;;  %v5393_v14 = vadd.f32 %v10435_v62, %v5383_v36 }
 0x25d   : > { %v6189_v34 = vadd.f32 %v8465_v32, %v8157_v60  ;;  %v6273_v1 = vmul.f32 %v6210_v0, %v6210_v0  ;;  %v7511_v61 = vpack.c.bf16 %v6209_v11, %v6208_v49  ;;  %v6257_v57 = vadd.f32 %v6209_v11, %v6208_v49 }
 0x25e   : > { %v8159_v27 = vpop.f32.mrf.mxu0  ;;  %v6272_v31 = vmul.f32 %v6209_v11, %v6209_v11  ;;  %v8469_v33 = vpop.f32.mrf.mxu1  ;;  %v5803_v60 = vadd.f32 %v5791_v45, %v5392_v7  ;;  %v5804_v48 = vadd.f32 %v5794_v37, %v5393_v14 }
 0x25f   : > { %v6211_v38 = vadd.f32 %v6189_v34, %v5800_v39  ;;  %v8160_v12 = vadd.f32 %v8159_v27, %v8158_v50  ;;  %7554 = vst [vmem:[%s10097_s10 + $0x60] sm:$0xff] %v7511_v61   ;;  %v6258_v44 = vadd.f32 %v6257_v57, %v6210_v0 }
 0x260   : > { %v8161_v29 = vpop.f32.mrf.mxu0  ;;  %v6279_v4 = vadd.f32 %v6272_v31, %v6271_v63  ;;  %v6196_v23 = vpop.f32.mrf.mxu1 }
 0x261   : > { %v7516_v53 = vpack.c.bf16 %v6211_v38, %v6210_v0  ;;  %v6194_v40 = vadd.f32 %v8160_v12, %v6193_v6  ;;  %v6274_v22 = vmul.f32 %v6211_v38, %v6211_v38  ;;  %v6259_v9 = vadd.f32 %v6258_v44, %v6211_v38 }
 0x262   : > { %v8162_v51 = vpop.f32.mrf.mxu0  ;;  %v6280_v43 = vadd.f32 %v6279_v4, %v6273_v1 }
 0x263   : > { %7555 = vst [vmem:[%s10097_s10 + $0x68] sm:$0xff] %v7516_v53   ;;  %v8163_v20 = vadd.f32 %v8162_v51, %v8161_v29  ;;  %v6212_v47 = vadd.f32 %v6194_v40, %v5801_v55  ;;  %v10633_v53 = vld [vmem:[#allocation4_spill] sm:$0xff] }
 0x264   : > { %v8164_v5 = vpop.f32.mrf.mxu0  ;;  %v6281_v58 = vadd.f32 %v6280_v43, %v6274_v22 }
 0x265   : > { %v6197_v28 = vadd.f32 %v8163_v20, %v6196_v23  ;;  %v6275_v8 = vmul.f32 %v6212_v47, %v6212_v47  ;;  %v6260_v52 = vadd.f32 %v6259_v9, %v6212_v47 }
 0x266   : > { %v8165_v24 = vpop.f32.mrf.mxu0 }
 0x267   : > { %v6213_v42 = vadd.f32 %v6197_v28, %v5802_v16  ;;  %v8166_v32 = vadd.f32 %v8165_v24, %v8164_v5  ;;  %v6282_v54 = vadd.f32 %v6281_v58, %v6275_v8 }
 0x268   : > { %v8167_v25 = vpop.f32.mrf.mxu0 }
 0x269   : > { %v7521_v19 = vpack.c.bf16 %v6213_v42, %v6212_v47  ;;  %v6276_v26 = vmul.f32 %v6213_v42, %v6213_v42  ;;  %v6202_v49 = vadd.f32 %v8468_v41, %v8166_v32  ;;  %v6261_v0 = vadd.f32 %v6260_v52, %v6213_v42 }
 0x26a   : > { %v8168_v21 = vpop.f32.mrf.mxu0 }
 0x26b   : > { %7556 = vst [vmem:[%s10097_s10 + $0x70] sm:$0xff] %v7521_v19   ;;  %v8169_v56 = vadd.f32 %v8168_v21, %v8167_v25  ;;  %v6214_v50 = vadd.f32 %v6202_v49, %v5803_v60  ;;  %v6283_v3 = vadd.f32 %v6282_v54, %v6276_v26 }
 0x26d   : > { %v6205_v39 = vadd.f32 %v8469_v33, %v8169_v56  ;;  %v6262_v34 = vadd.f32 %v6261_v0, %v6214_v50  ;;  %v6277_v15 = vmul.f32 %v6214_v50, %v6214_v50 }
 0x26f   : > { %v6215_v13 = vadd.f32 %v6205_v39, %v5804_v48  ;;  %v6284_v27 = vadd.f32 %v6283_v3, %v6277_v15 }
 0x271   : > { %v7526_v18 = vpack.c.bf16 %v6215_v13, %v6214_v50  ;;  %v6263_v11 = vadd.f32 %v6262_v34, %v6215_v13  ;;  %v6278_v38 = vmul.f32 %v6215_v13, %v6215_v13 }
 0x273   : > { %7557 = vst [vmem:[%s10097_s10 + $0x78] sm:$0xff] %v7526_v18   ;;  %v6264_v41 = vrot.slane %v6263_v11, 4  ;;  %v6285_v12 = vadd.f32 %v6284_v27, %v6278_v38 }
 0x275   : > { %v6265_v62 = vadd.f32 %v6264_v41, %v6263_v11  ;;  %v6286_v46 = vrot.slane %v6285_v12, 4 }
 0x277   : > { %v6266_v30 = vrot.slane %v6265_v62, 2  ;;  %v6287_v63 = vadd.f32 %v6286_v46, %v6285_v12 }
 0x279   : > { %v6267_v1 = vadd.f32 %v6266_v30, %v6265_v62  ;;  %v6288_v6 = vrot.slane %v6287_v63, 2 }
 0x27b   : > { %v6268_v29 = vrot.slane %v6267_v1, 1  ;;  %v6289_v61 = vadd.f32 %v6288_v6, %v6287_v63 }
 0x27d   : > { %v6269_v57 = vadd.f32 %v6268_v29, %v6267_v1  ;;  %v6290_v31 = vrot.slane %v6289_v61, 1 }
 0x27f   : > { %v6270_v59 = vadd.f32 %v6269_v57, %v10633_v53  ;;  %v6291_v55 = vadd.f32 %v6290_v31, %v6289_v61 }
 0x281   : > { %v6292_v40 = vadd.f32 %v6291_v55, %v10634_v10  ;;  %6293 = vst [vmem:[%s292_s9] sm:$0x1] %v6270_v59 }
 0x283   : > { %6294 = vst [vmem:[%s295_s8] sm:$0x1] %v6292_v40 }
 0x284 PF: > { %s18_s24 = sadd.s32 1, %s8829_s24  }
 0x285   : > { %p15_p4 = scmp.ge.s32.totalorder %s18_s24, 4  }
 0x287   :  { %17 = sbr.rel (!%p15_p4) target bundleno = 1 (0x1), region = 111 }

</bundles_post_ra>
